<compile_context>
chip_gen: v5e
topology: v5e:2x2
jax: 0.10.0
libtpu: 0.0.40
codegen_flags: <defaults>
</compile_context>

<pallas_src>
import jax
import jax.numpy as jnp
from jax.experimental import pallas as pl
from jax.experimental.pallas import tpu as pltpu

KERNEL_SIZE = 7
PAD = KERNEL_SIZE // 2


def _spatial_attention_kernel(w_ref, x_ref, o_ref, avg_sc, max_sc):
    # w_ref : SMEM, flat [2*K*K] conv weights; avg-channel taps pre-scaled by 1/C
    # x_ref : VMEM, [C, H, W] unpadded input (one batch element)
    # o_ref : VMEM, [H, W] -> sigmoid(conv(cat([mean_c, max_c])))
    # avg_sc, max_sc : VMEM scratch [H+2p, W+2p] zero-padded feature maps
    K = KERNEL_SIZE
    C, H, W = x_ref.shape
    Hp, Wp = H + 2 * PAD, W + 2 * PAD

    # --- streamed channel reduction: only two [H, W] f32 accumulators live ---
    x0 = x_ref[0].astype(jnp.float32)

    def chan_body(c, carry):
        s_acc, m_acc = carry
        xc = x_ref[c].astype(jnp.float32)          # one channel slab at a time
        return s_acc + xc, jnp.maximum(m_acc, xc)

    s, m = jax.lax.fori_loop(1, C, chan_body, (x0, x0), unroll=True)

    # --- fused zero-padding: pre-zero scratch, write interior only ---
    avg_sc[...] = jnp.zeros((Hp, Wp), jnp.float32)
    max_sc[...] = jnp.zeros((Hp, Wp), jnp.float32)
    avg_sc[PAD:PAD + H, PAD:PAD + W] = s           # channel *sum*; 1/C is in weights
    max_sc[PAD:PAD + H, PAD:PAD + W] = m

    g_avg = avg_sc[...]                            # [Hp, Wp] padded features as values
    g_max = max_sc[...]

    # --- 7x7 conv: column (lane) shifts hoisted out of the tap loop ---
    parts = [jnp.zeros((H, W), jnp.float32) for _ in range(4)]
    t = 0
    for c, g in enumerate((g_avg, g_max)):
        for dj in range(K):
            col = g[:, dj:dj + W]                  # one lane-direction slice per dj (14 total)
            for di in range(K):
                wv = w_ref[c * K * K + di * K + dj]          # scalar from SMEM
                parts[t % 4] = parts[t % 4] + wv * col[di:di + H, :]  # sublane slice only
                t += 1
    acc = (parts[0] + parts[1]) + (parts[2] + parts[3])

    o_ref[...] = jax.nn.sigmoid(acc).astype(o_ref.dtype)


def spatial_attention(x, weight):
    """x: [B, C, H, W]; weight: [1, 2, K, K] (conv1.weight, bias=False)."""
    B, C, H, W = x.shape
    K = KERNEL_SIZE
    Hp, Wp = H + 2 * PAD, W + 2 * PAD

    # Fold 1/C into the avg-channel taps -> kernel uses a channel sum (no divide).
    w = weight.astype(jnp.float32).reshape(2, K, K)
    w = w * jnp.array([1.0 / C, 1.0], jnp.float32).reshape(2, 1, 1)
    w_flat = w.reshape(-1)

    # NOTE: for large C*H*W, add an H-tile grid axis with a 2*PAD halo so the
    # per-step input block stays well under v7x's 64 MiB VMEM (and feeds both
    # of its TensorCores even when B == 1), and raise vmem_limit_bytes on
    # v5e/v6e to keep larger resident blocks. At these shapes a per-batch
    # block is only a few KiB, so the defaults are fine.
    return pl.pallas_call(
        _spatial_attention_kernel,
        out_shape=jax.ShapeDtypeStruct((B, 1, H, W), x.dtype),
        grid=(B,),
        in_specs=[
            pl.BlockSpec(memory_space=pltpu.MemorySpace.SMEM),        # conv weights
            pl.BlockSpec((None, C, H, W), lambda b: (b, 0, 0, 0)),    # unpadded x block
        ],
        out_specs=pl.BlockSpec((None, None, H, W), lambda b: (b, 0, 0, 0)),
        scratch_shapes=[
            pltpu.VMEM((Hp, Wp), jnp.float32),     # padded avg feature map
            pltpu.VMEM((Hp, Wp), jnp.float32),     # padded max feature map
        ],
        compiler_params=pltpu.CompilerParams(
            dimension_semantics=("parallel",)),
    )(w_flat, x)


def spatial_attention_ref(x, weight):
    """Pure-JAX reference matching the PyTorch module."""
    avg = jnp.mean(x, axis=1, keepdims=True)
    mx = jnp.max(x, axis=1, keepdims=True)
    feat = jnp.concatenate([avg, mx], axis=1)
    out = jax.lax.conv_general_dilated(
        feat, weight, window_strides=(1, 1),
        padding=[(PAD, PAD), (PAD, PAD)],
        dimension_numbers=("NCHW", "OIHW", "NCHW"))
    return jax.nn.sigmoid(out)


if __name__ == "__main__":
    key = jax.random.PRNGKey(0)
    kx, kw = jax.random.split(key)

    B, C, H, W = 2, 4, 16, 16
    x = jax.random.normal(kx, (B, C, H, W), dtype=jnp.float32)
    # Deterministic synthetic conv1 weight: shape (out=1, in=2, 7, 7), no bias.
    weight = 0.1 * jax.random.normal(kw, (1, 2, KERNEL_SIZE, KERNEL_SIZE),
                                     dtype=jnp.float32)

    out = jax.block_until_ready(spatial_attention(x, weight))
    ref = jax.block_until_ready(spatial_attention_ref(x, weight))

    assert out.shape == (B, 1, H, W)
    assert jnp.allclose(out, ref, atol=1e-5, rtol=1e-5), \
        f"max abs err = {jnp.max(jnp.abs(out - ref))}"

    print("KERNEL_OK")
</pallas_src>

<mosaic_0001>
module attributes {stable_mosaic.version = 11 : i64} {
  func.func @_spatial_attention_kernel(%arg0: i32, %arg1: memref<98xf32, #tpu.memory_space<smem>>, %arg2: memref<1x4x16x16xf32, #tpu.memory_space<vmem>>, %arg3: memref<1x1x16x16xf32, #tpu.memory_space<vmem>>, %arg4: memref<22x22xf32, #tpu.memory_space<vmem>>, %arg5: memref<22x22xf32, #tpu.memory_space<vmem>>) attributes {dimension_semantics = [#tpu.dimension_semantics<parallel>], iteration_bounds = array<i64: 2>, scalar_prefetch = 0 : i64, scratch_operands = 2 : i64, tpu.core_type = #tpu.core_type<tc>, window_params = [{transform_indices = @transform_0, window_bounds = array<i64: 98>}, {transform_indices = @transform_1, window_bounds = array<i64: 1, 4, 16, 16>}, {transform_indices = @transform_2, window_bounds = array<i64: 1, 1, 16, 16>}]} {
    %c0 = arith.constant 0 : index
    %c0_0 = arith.constant 0 : index
    %c0_1 = arith.constant 0 : index
    %c0_2 = arith.constant 0 : index
    %0 = vector.load %arg2[%c0, %c0_0, %c0_1, %c0_2] : memref<1x4x16x16xf32, #tpu.memory_space<vmem>>, vector<1x1x16x16xf32>
    %1 = vector.shape_cast %0 : vector<1x1x16x16xf32> to vector<16x16xf32>
    %c1_i32 = arith.constant 1 : i32
    %c0_3 = arith.constant 0 : index
    %2 = arith.index_cast %c1_i32 : i32 to index
    %c0_4 = arith.constant 0 : index
    %c0_5 = arith.constant 0 : index
    %3 = vector.load %arg2[%c0_3, %2, %c0_4, %c0_5] : memref<1x4x16x16xf32, #tpu.memory_space<vmem>>, vector<1x1x16x16xf32>
    %4 = vector.shape_cast %3 : vector<1x1x16x16xf32> to vector<16x16xf32>
    %5 = arith.addf %1, %4 : vector<16x16xf32>
    %6 = arith.maximumf %1, %4 : vector<16x16xf32>
    %c2_i32 = arith.constant 2 : i32
    %c0_6 = arith.constant 0 : index
    %7 = arith.index_cast %c2_i32 : i32 to index
    %c0_7 = arith.constant 0 : index
    %c0_8 = arith.constant 0 : index
    %8 = vector.load %arg2[%c0_6, %7, %c0_7, %c0_8] : memref<1x4x16x16xf32, #tpu.memory_space<vmem>>, vector<1x1x16x16xf32>
    %9 = vector.shape_cast %8 : vector<1x1x16x16xf32> to vector<16x16xf32>
    %10 = arith.addf %5, %9 : vector<16x16xf32>
    %11 = arith.maximumf %6, %9 : vector<16x16xf32>
    %c3_i32 = arith.constant 3 : i32
    %c0_9 = arith.constant 0 : index
    %12 = arith.index_cast %c3_i32 : i32 to index
    %c0_10 = arith.constant 0 : index
    %c0_11 = arith.constant 0 : index
    %13 = vector.load %arg2[%c0_9, %12, %c0_10, %c0_11] : memref<1x4x16x16xf32, #tpu.memory_space<vmem>>, vector<1x1x16x16xf32>
    %14 = vector.shape_cast %13 : vector<1x1x16x16xf32> to vector<16x16xf32>
    %15 = arith.addf %10, %14 : vector<16x16xf32>
    %16 = arith.maximumf %11, %14 : vector<16x16xf32>
    %c3_i32_12 = arith.constant 3 : i32
    %cst = arith.constant 0.000000e+00 : f32
    %17 = vector.broadcast %cst : f32 to vector<22x22xf32>
    %c0_13 = arith.constant 0 : index
    %c0_14 = arith.constant 0 : index
    %18 = vector.load %arg4[%c0_13, %c0_14] : memref<22x22xf32, #tpu.memory_space<vmem>>, vector<22x22xf32>
    tpu.vector_store %arg4[%c0_13, %c0_14], %17 {strides = array<i32>} : memref<22x22xf32, #tpu.memory_space<vmem>>, vector<22x22xf32>,
    %cst_15 = arith.constant 0.000000e+00 : f32
    %19 = vector.broadcast %cst_15 : f32 to vector<22x22xf32>
    %c0_16 = arith.constant 0 : index
    %c0_17 = arith.constant 0 : index
    %20 = vector.load %arg5[%c0_16, %c0_17] : memref<22x22xf32, #tpu.memory_space<vmem>>, vector<22x22xf32>
    tpu.vector_store %arg5[%c0_16, %c0_17], %19 {strides = array<i32>} : memref<22x22xf32, #tpu.memory_space<vmem>>, vector<22x22xf32>,
    %c3 = arith.constant 3 : index
    %c3_18 = arith.constant 3 : index
    %21 = vector.load %arg4[%c3, %c3_18] : memref<22x22xf32, #tpu.memory_space<vmem>>, vector<16x16xf32>
    tpu.vector_store %arg4[%c3, %c3_18], %15 {strides = array<i32>} : memref<22x22xf32, #tpu.memory_space<vmem>>, vector<16x16xf32>,
    %c3_19 = arith.constant 3 : index
    %c3_20 = arith.constant 3 : index
    %22 = vector.load %arg5[%c3_19, %c3_20] : memref<22x22xf32, #tpu.memory_space<vmem>>, vector<16x16xf32>
    tpu.vector_store %arg5[%c3_19, %c3_20], %16 {strides = array<i32>} : memref<22x22xf32, #tpu.memory_space<vmem>>, vector<16x16xf32>,
    %c0_21 = arith.constant 0 : index
    %c0_22 = arith.constant 0 : index
    %23 = vector.load %arg4[%c0_21, %c0_22] : memref<22x22xf32, #tpu.memory_space<vmem>>, vector<22x22xf32>
    %c0_23 = arith.constant 0 : index
    %c0_24 = arith.constant 0 : index
    %24 = vector.load %arg5[%c0_23, %c0_24] : memref<22x22xf32, #tpu.memory_space<vmem>>, vector<22x22xf32>
    %cst_25 = arith.constant 0.000000e+00 : f32
    %25 = vector.broadcast %cst_25 : f32 to vector<16x16xf32>
    %cst_26 = arith.constant 0.000000e+00 : f32
    %26 = vector.broadcast %cst_26 : f32 to vector<16x16xf32>
    %cst_27 = arith.constant 0.000000e+00 : f32
    %27 = vector.broadcast %cst_27 : f32 to vector<16x16xf32>
    %cst_28 = arith.constant 0.000000e+00 : f32
    %28 = vector.broadcast %cst_28 : f32 to vector<16x16xf32>
    %29 = vector.extract_strided_slice %23 {offsets = [0, 0], sizes = [22, 16], strides = [1, 1]} : vector<22x22xf32> to vector<22x16xf32>
    %c0_29 = arith.constant 0 : index
    %30 = memref.load %arg1[%c0_29] : memref<98xf32, #tpu.memory_space<smem>>
    %31 = vector.extract_strided_slice %29 {offsets = [0, 0], sizes = [16, 16], strides = [1, 1]} : vector<22x16xf32> to vector<16x16xf32>
    %32 = vector.broadcast %30 : f32 to vector<16x16xf32>
    %33 = arith.mulf %32, %31 : vector<16x16xf32>
    %34 = arith.addf %25, %33 : vector<16x16xf32>
    %c7 = arith.constant 7 : index
    %35 = memref.load %arg1[%c7] : memref<98xf32, #tpu.memory_space<smem>>
    %36 = vector.extract_strided_slice %29 {offsets = [1, 0], sizes = [16, 16], strides = [1, 1]} : vector<22x16xf32> to vector<16x16xf32>
    %37 = vector.broadcast %35 : f32 to vector<16x16xf32>
    %38 = arith.mulf %37, %36 : vector<16x16xf32>
    %39 = arith.addf %26, %38 : vector<16x16xf32>
    %c14 = arith.constant 14 : index
    %40 = memref.load %arg1[%c14] : memref<98xf32, #tpu.memory_space<smem>>
    %41 = vector.extract_strided_slice %29 {offsets = [2, 0], sizes = [16, 16], strides = [1, 1]} : vector<22x16xf32> to vector<16x16xf32>
    %42 = vector.broadcast %40 : f32 to vector<16x16xf32>
    %43 = arith.mulf %42, %41 : vector<16x16xf32>
    %44 = arith.addf %27, %43 : vector<16x16xf32>
    %c21 = arith.constant 21 : index
    %45 = memref.load %arg1[%c21] : memref<98xf32, #tpu.memory_space<smem>>
    %46 = vector.extract_strided_slice %29 {offsets = [3, 0], sizes = [16, 16], strides = [1, 1]} : vector<22x16xf32> to vector<16x16xf32>
    %47 = vector.broadcast %45 : f32 to vector<16x16xf32>
    %48 = arith.mulf %47, %46 : vector<16x16xf32>
    %49 = arith.addf %28, %48 : vector<16x16xf32>
    %c28 = arith.constant 28 : index
    %50 = memref.load %arg1[%c28] : memref<98xf32, #tpu.memory_space<smem>>
    %51 = vector.extract_strided_slice %29 {offsets = [4, 0], sizes = [16, 16], strides = [1, 1]} : vector<22x16xf32> to vector<16x16xf32>
    %52 = vector.broadcast %50 : f32 to vector<16x16xf32>
    %53 = arith.mulf %52, %51 : vector<16x16xf32>
    %54 = arith.addf %34, %53 : vector<16x16xf32>
    %c35 = arith.constant 35 : index
    %55 = memref.load %arg1[%c35] : memref<98xf32, #tpu.memory_space<smem>>
    %56 = vector.extract_strided_slice %29 {offsets = [5, 0], sizes = [16, 16], strides = [1, 1]} : vector<22x16xf32> to vector<16x16xf32>
    %57 = vector.broadcast %55 : f32 to vector<16x16xf32>
    %58 = arith.mulf %57, %56 : vector<16x16xf32>
    %59 = arith.addf %39, %58 : vector<16x16xf32>
    %c42 = arith.constant 42 : index
    %60 = memref.load %arg1[%c42] : memref<98xf32, #tpu.memory_space<smem>>
    %61 = vector.extract_strided_slice %29 {offsets = [6, 0], sizes = [16, 16], strides = [1, 1]} : vector<22x16xf32> to vector<16x16xf32>
    %62 = vector.broadcast %60 : f32 to vector<16x16xf32>
    %63 = arith.mulf %62, %61 : vector<16x16xf32>
    %64 = arith.addf %44, %63 : vector<16x16xf32>
    %65 = vector.extract_strided_slice %23 {offsets = [0, 1], sizes = [22, 16], strides = [1, 1]} : vector<22x22xf32> to vector<22x16xf32>
    %c1 = arith.constant 1 : index
    %66 = memref.load %arg1[%c1] : memref<98xf32, #tpu.memory_space<smem>>
    %67 = vector.extract_strided_slice %65 {offsets = [0, 0], sizes = [16, 16], strides = [1, 1]} : vector<22x16xf32> to vector<16x16xf32>
    %68 = vector.broadcast %66 : f32 to vector<16x16xf32>
    %69 = arith.mulf %68, %67 : vector<16x16xf32>
    %70 = arith.addf %49, %69 : vector<16x16xf32>
    %c8 = arith.constant 8 : index
    %71 = memref.load %arg1[%c8] : memref<98xf32, #tpu.memory_space<smem>>
    %72 = vector.extract_strided_slice %65 {offsets = [1, 0], sizes = [16, 16], strides = [1, 1]} : vector<22x16xf32> to vector<16x16xf32>
    %73 = vector.broadcast %71 : f32 to vector<16x16xf32>
    %74 = arith.mulf %73, %72 : vector<16x16xf32>
    %75 = arith.addf %54, %74 : vector<16x16xf32>
    %c15 = arith.constant 15 : index
    %76 = memref.load %arg1[%c15] : memref<98xf32, #tpu.memory_space<smem>>
    %77 = vector.extract_strided_slice %65 {offsets = [2, 0], sizes = [16, 16], strides = [1, 1]} : vector<22x16xf32> to vector<16x16xf32>
    %78 = vector.broadcast %76 : f32 to vector<16x16xf32>
    %79 = arith.mulf %78, %77 : vector<16x16xf32>
    %80 = arith.addf %59, %79 : vector<16x16xf32>
    %c22 = arith.constant 22 : index
    %81 = memref.load %arg1[%c22] : memref<98xf32, #tpu.memory_space<smem>>
    %82 = vector.extract_strided_slice %65 {offsets = [3, 0], sizes = [16, 16], strides = [1, 1]} : vector<22x16xf32> to vector<16x16xf32>
    %83 = vector.broadcast %81 : f32 to vector<16x16xf32>
    %84 = arith.mulf %83, %82 : vector<16x16xf32>
    %85 = arith.addf %64, %84 : vector<16x16xf32>
    %c29 = arith.constant 29 : index
    %86 = memref.load %arg1[%c29] : memref<98xf32, #tpu.memory_space<smem>>
    %87 = vector.extract_strided_slice %65 {offsets = [4, 0], sizes = [16, 16], strides = [1, 1]} : vector<22x16xf32> to vector<16x16xf32>
    %88 = vector.broadcast %86 : f32 to vector<16x16xf32>
    %89 = arith.mulf %88, %87 : vector<16x16xf32>
    %90 = arith.addf %70, %89 : vector<16x16xf32>
    %c36 = arith.constant 36 : index
    %91 = memref.load %arg1[%c36] : memref<98xf32, #tpu.memory_space<smem>>
    %92 = vector.extract_strided_slice %65 {offsets = [5, 0], sizes = [16, 16], strides = [1, 1]} : vector<22x16xf32> to vector<16x16xf32>
    %93 = vector.broadcast %91 : f32 to vector<16x16xf32>
    %94 = arith.mulf %93, %92 : vector<16x16xf32>
    %95 = arith.addf %75, %94 : vector<16x16xf32>
    %c43 = arith.constant 43 : index
    %96 = memref.load %arg1[%c43] : memref<98xf32, #tpu.memory_space<smem>>
    %97 = vector.extract_strided_slice %65 {offsets = [6, 0], sizes = [16, 16], strides = [1, 1]} : vector<22x16xf32> to vector<16x16xf32>
    %98 = vector.broadcast %96 : f32 to vector<16x16xf32>
    %99 = arith.mulf %98, %97 : vector<16x16xf32>
    %100 = arith.addf %80, %99 : vector<16x16xf32>
    %101 = vector.extract_strided_slice %23 {offsets = [0, 2], sizes = [22, 16], strides = [1, 1]} : vector<22x22xf32> to vector<22x16xf32>
    %c2 = arith.constant 2 : index
    %102 = memref.load %arg1[%c2] : memref<98xf32, #tpu.memory_space<smem>>
    %103 = vector.extract_strided_slice %101 {offsets = [0, 0], sizes = [16, 16], strides = [1, 1]} : vector<22x16xf32> to vector<16x16xf32>
    %104 = vector.broadcast %102 : f32 to vector<16x16xf32>
    %105 = arith.mulf %104, %103 : vector<16x16xf32>
    %106 = arith.addf %85, %105 : vector<16x16xf32>
    %c9 = arith.constant 9 : index
    %107 = memref.load %arg1[%c9] : memref<98xf32, #tpu.memory_space<smem>>
    %108 = vector.extract_strided_slice %101 {offsets = [1, 0], sizes = [16, 16], strides = [1, 1]} : vector<22x16xf32> to vector<16x16xf32>
    %109 = vector.broadcast %107 : f32 to vector<16x16xf32>
    %110 = arith.mulf %109, %108 : vector<16x16xf32>
    %111 = arith.addf %90, %110 : vector<16x16xf32>
    %c16 = arith.constant 16 : index
    %112 = memref.load %arg1[%c16] : memref<98xf32, #tpu.memory_space<smem>>
    %113 = vector.extract_strided_slice %101 {offsets = [2, 0], sizes = [16, 16], strides = [1, 1]} : vector<22x16xf32> to vector<16x16xf32>
    %114 = vector.broadcast %112 : f32 to vector<16x16xf32>
    %115 = arith.mulf %114, %113 : vector<16x16xf32>
    %116 = arith.addf %95, %115 : vector<16x16xf32>
    %c23 = arith.constant 23 : index
    %117 = memref.load %arg1[%c23] : memref<98xf32, #tpu.memory_space<smem>>
    %118 = vector.extract_strided_slice %101 {offsets = [3, 0], sizes = [16, 16], strides = [1, 1]} : vector<22x16xf32> to vector<16x16xf32>
    %119 = vector.broadcast %117 : f32 to vector<16x16xf32>
    %120 = arith.mulf %119, %118 : vector<16x16xf32>
    %121 = arith.addf %100, %120 : vector<16x16xf32>
    %c30 = arith.constant 30 : index
    %122 = memref.load %arg1[%c30] : memref<98xf32, #tpu.memory_space<smem>>
    %123 = vector.extract_strided_slice %101 {offsets = [4, 0], sizes = [16, 16], strides = [1, 1]} : vector<22x16xf32> to vector<16x16xf32>
    %124 = vector.broadcast %122 : f32 to vector<16x16xf32>
    %125 = arith.mulf %124, %123 : vector<16x16xf32>
    %126 = arith.addf %106, %125 : vector<16x16xf32>
    %c37 = arith.constant 37 : index
    %127 = memref.load %arg1[%c37] : memref<98xf32, #tpu.memory_space<smem>>
    %128 = vector.extract_strided_slice %101 {offsets = [5, 0], sizes = [16, 16], strides = [1, 1]} : vector<22x16xf32> to vector<16x16xf32>
    %129 = vector.broadcast %127 : f32 to vector<16x16xf32>
    %130 = arith.mulf %129, %128 : vector<16x16xf32>
    %131 = arith.addf %111, %130 : vector<16x16xf32>
    %c44 = arith.constant 44 : index
    %132 = memref.load %arg1[%c44] : memref<98xf32, #tpu.memory_space<smem>>
    %133 = vector.extract_strided_slice %101 {offsets = [6, 0], sizes = [16, 16], strides = [1, 1]} : vector<22x16xf32> to vector<16x16xf32>
    %134 = vector.broadcast %132 : f32 to vector<16x16xf32>
    %135 = arith.mulf %134, %133 : vector<16x16xf32>
    %136 = arith.addf %116, %135 : vector<16x16xf32>
    %137 = vector.extract_strided_slice %23 {offsets = [0, 3], sizes = [22, 16], strides = [1, 1]} : vector<22x22xf32> to vector<22x16xf32>
    %c3_30 = arith.constant 3 : index
    %138 = memref.load %arg1[%c3_30] : memref<98xf32, #tpu.memory_space<smem>>
    %139 = vector.extract_strided_slice %137 {offsets = [0, 0], sizes = [16, 16], strides = [1, 1]} : vector<22x16xf32> to vector<16x16xf32>
    %140 = vector.broadcast %138 : f32 to vector<16x16xf32>
    %141 = arith.mulf %140, %139 : vector<16x16xf32>
    %142 = arith.addf %121, %141 : vector<16x16xf32>
    %c10 = arith.constant 10 : index
    %143 = memref.load %arg1[%c10] : memref<98xf32, #tpu.memory_space<smem>>
    %144 = vector.extract_strided_slice %137 {offsets = [1, 0], sizes = [16, 16], strides = [1, 1]} : vector<22x16xf32> to vector<16x16xf32>
    %145 = vector.broadcast %143 : f32 to vector<16x16xf32>
    %146 = arith.mulf %145, %144 : vector<16x16xf32>
    %147 = arith.addf %126, %146 : vector<16x16xf32>
    %c17 = arith.constant 17 : index
    %148 = memref.load %arg1[%c17] : memref<98xf32, #tpu.memory_space<smem>>
    %149 = vector.extract_strided_slice %137 {offsets = [2, 0], sizes = [16, 16], strides = [1, 1]} : vector<22x16xf32> to vector<16x16xf32>
    %150 = vector.broadcast %148 : f32 to vector<16x16xf32>
    %151 = arith.mulf %150, %149 : vector<16x16xf32>
    %152 = arith.addf %131, %151 : vector<16x16xf32>
    %c24 = arith.constant 24 : index
    %153 = memref.load %arg1[%c24] : memref<98xf32, #tpu.memory_space<smem>>
    %154 = vector.extract_strided_slice %137 {offsets = [3, 0], sizes = [16, 16], strides = [1, 1]} : vector<22x16xf32> to vector<16x16xf32>
    %155 = vector.broadcast %153 : f32 to vector<16x16xf32>
    %156 = arith.mulf %155, %154 : vector<16x16xf32>
    %157 = arith.addf %136, %156 : vector<16x16xf32>
    %c31 = arith.constant 31 : index
    %158 = memref.load %arg1[%c31] : memref<98xf32, #tpu.memory_space<smem>>
    %159 = vector.extract_strided_slice %137 {offsets = [4, 0], sizes = [16, 16], strides = [1, 1]} : vector<22x16xf32> to vector<16x16xf32>
    %160 = vector.broadcast %158 : f32 to vector<16x16xf32>
    %161 = arith.mulf %160, %159 : vector<16x16xf32>
    %162 = arith.addf %142, %161 : vector<16x16xf32>
    %c38 = arith.constant 38 : index
    %163 = memref.load %arg1[%c38] : memref<98xf32, #tpu.memory_space<smem>>
    %164 = vector.extract_strided_slice %137 {offsets = [5, 0], sizes = [16, 16], strides = [1, 1]} : vector<22x16xf32> to vector<16x16xf32>
    %165 = vector.broadcast %163 : f32 to vector<16x16xf32>
    %166 = arith.mulf %165, %164 : vector<16x16xf32>
    %167 = arith.addf %147, %166 : vector<16x16xf32>
    %c45 = arith.constant 45 : index
    %168 = memref.load %arg1[%c45] : memref<98xf32, #tpu.memory_space<smem>>
    %169 = vector.extract_strided_slice %137 {offsets = [6, 0], sizes = [16, 16], strides = [1, 1]} : vector<22x16xf32> to vector<16x16xf32>
    %170 = vector.broadcast %168 : f32 to vector<16x16xf32>
    %171 = arith.mulf %170, %169 : vector<16x16xf32>
    %172 = arith.addf %152, %171 : vector<16x16xf32>
    %173 = vector.extract_strided_slice %23 {offsets = [0, 4], sizes = [22, 16], strides = [1, 1]} : vector<22x22xf32> to vector<22x16xf32>
    %c4 = arith.constant 4 : index
    %174 = memref.load %arg1[%c4] : memref<98xf32, #tpu.memory_space<smem>>
    %175 = vector.extract_strided_slice %173 {offsets = [0, 0], sizes = [16, 16], strides = [1, 1]} : vector<22x16xf32> to vector<16x16xf32>
    %176 = vector.broadcast %174 : f32 to vector<16x16xf32>
    %177 = arith.mulf %176, %175 : vector<16x16xf32>
    %178 = arith.addf %157, %177 : vector<16x16xf32>
    %c11 = arith.constant 11 : index
    %179 = memref.load %arg1[%c11] : memref<98xf32, #tpu.memory_space<smem>>
    %180 = vector.extract_strided_slice %173 {offsets = [1, 0], sizes = [16, 16], strides = [1, 1]} : vector<22x16xf32> to vector<16x16xf32>
    %181 = vector.broadcast %179 : f32 to vector<16x16xf32>
    %182 = arith.mulf %181, %180 : vector<16x16xf32>
    %183 = arith.addf %162, %182 : vector<16x16xf32>
    %c18 = arith.constant 18 : index
    %184 = memref.load %arg1[%c18] : memref<98xf32, #tpu.memory_space<smem>>
    %185 = vector.extract_strided_slice %173 {offsets = [2, 0], sizes = [16, 16], strides = [1, 1]} : vector<22x16xf32> to vector<16x16xf32>
    %186 = vector.broadcast %184 : f32 to vector<16x16xf32>
    %187 = arith.mulf %186, %185 : vector<16x16xf32>
    %188 = arith.addf %167, %187 : vector<16x16xf32>
    %c25 = arith.constant 25 : index
    %189 = memref.load %arg1[%c25] : memref<98xf32, #tpu.memory_space<smem>>
    %190 = vector.extract_strided_slice %173 {offsets = [3, 0], sizes = [16, 16], strides = [1, 1]} : vector<22x16xf32> to vector<16x16xf32>
    %191 = vector.broadcast %189 : f32 to vector<16x16xf32>
    %192 = arith.mulf %191, %190 : vector<16x16xf32>
    %193 = arith.addf %172, %192 : vector<16x16xf32>
    %c32 = arith.constant 32 : index
    %194 = memref.load %arg1[%c32] : memref<98xf32, #tpu.memory_space<smem>>
    %195 = vector.extract_strided_slice %173 {offsets = [4, 0], sizes = [16, 16], strides = [1, 1]} : vector<22x16xf32> to vector<16x16xf32>
    %196 = vector.broadcast %194 : f32 to vector<16x16xf32>
    %197 = arith.mulf %196, %195 : vector<16x16xf32>
    %198 = arith.addf %178, %197 : vector<16x16xf32>
    %c39 = arith.constant 39 : index
    %199 = memref.load %arg1[%c39] : memref<98xf32, #tpu.memory_space<smem>>
    %200 = vector.extract_strided_slice %173 {offsets = [5, 0], sizes = [16, 16], strides = [1, 1]} : vector<22x16xf32> to vector<16x16xf32>
    %201 = vector.broadcast %199 : f32 to vector<16x16xf32>
    %202 = arith.mulf %201, %200 : vector<16x16xf32>
    %203 = arith.addf %183, %202 : vector<16x16xf32>
    %c46 = arith.constant 46 : index
    %204 = memref.load %arg1[%c46] : memref<98xf32, #tpu.memory_space<smem>>
    %205 = vector.extract_strided_slice %173 {offsets = [6, 0], sizes = [16, 16], strides = [1, 1]} : vector<22x16xf32> to vector<16x16xf32>
    %206 = vector.broadcast %204 : f32 to vector<16x16xf32>
    %207 = arith.mulf %206, %205 : vector<16x16xf32>
    %208 = arith.addf %188, %207 : vector<16x16xf32>
    %209 = vector.extract_strided_slice %23 {offsets = [0, 5], sizes = [22, 16], strides = [1, 1]} : vector<22x22xf32> to vector<22x16xf32>
    %c5 = arith.constant 5 : index
    %210 = memref.load %arg1[%c5] : memref<98xf32, #tpu.memory_space<smem>>
    %211 = vector.extract_strided_slice %209 {offsets = [0, 0], sizes = [16, 16], strides = [1, 1]} : vector<22x16xf32> to vector<16x16xf32>
    %212 = vector.broadcast %210 : f32 to vector<16x16xf32>
    %213 = arith.mulf %212, %211 : vector<16x16xf32>
    %214 = arith.addf %193, %213 : vector<16x16xf32>
    %c12 = arith.constant 12 : index
    %215 = memref.load %arg1[%c12] : memref<98xf32, #tpu.memory_space<smem>>
    %216 = vector.extract_strided_slice %209 {offsets = [1, 0], sizes = [16, 16], strides = [1, 1]} : vector<22x16xf32> to vector<16x16xf32>
    %217 = vector.broadcast %215 : f32 to vector<16x16xf32>
    %218 = arith.mulf %217, %216 : vector<16x16xf32>
    %219 = arith.addf %198, %218 : vector<16x16xf32>
    %c19 = arith.constant 19 : index
    %220 = memref.load %arg1[%c19] : memref<98xf32, #tpu.memory_space<smem>>
    %221 = vector.extract_strided_slice %209 {offsets = [2, 0], sizes = [16, 16], strides = [1, 1]} : vector<22x16xf32> to vector<16x16xf32>
    %222 = vector.broadcast %220 : f32 to vector<16x16xf32>
    %223 = arith.mulf %222, %221 : vector<16x16xf32>
    %224 = arith.addf %203, %223 : vector<16x16xf32>
    %c26 = arith.constant 26 : index
    %225 = memref.load %arg1[%c26] : memref<98xf32, #tpu.memory_space<smem>>
    %226 = vector.extract_strided_slice %209 {offsets = [3, 0], sizes = [16, 16], strides = [1, 1]} : vector<22x16xf32> to vector<16x16xf32>
    %227 = vector.broadcast %225 : f32 to vector<16x16xf32>
    %228 = arith.mulf %227, %226 : vector<16x16xf32>
    %229 = arith.addf %208, %228 : vector<16x16xf32>
    %c33 = arith.constant 33 : index
    %230 = memref.load %arg1[%c33] : memref<98xf32, #tpu.memory_space<smem>>
    %231 = vector.extract_strided_slice %209 {offsets = [4, 0], sizes = [16, 16], strides = [1, 1]} : vector<22x16xf32> to vector<16x16xf32>
    %232 = vector.broadcast %230 : f32 to vector<16x16xf32>
    %233 = arith.mulf %232, %231 : vector<16x16xf32>
    %234 = arith.addf %214, %233 : vector<16x16xf32>
    %c40 = arith.constant 40 : index
    %235 = memref.load %arg1[%c40] : memref<98xf32, #tpu.memory_space<smem>>
    %236 = vector.extract_strided_slice %209 {offsets = [5, 0], sizes = [16, 16], strides = [1, 1]} : vector<22x16xf32> to vector<16x16xf32>
    %237 = vector.broadcast %235 : f32 to vector<16x16xf32>
    %238 = arith.mulf %237, %236 : vector<16x16xf32>
    %239 = arith.addf %219, %238 : vector<16x16xf32>
    %c47 = arith.constant 47 : index
    %240 = memref.load %arg1[%c47] : memref<98xf32, #tpu.memory_space<smem>>
    %241 = vector.extract_strided_slice %209 {offsets = [6, 0], sizes = [16, 16], strides = [1, 1]} : vector<22x16xf32> to vector<16x16xf32>
    %242 = vector.broadcast %240 : f32 to vector<16x16xf32>
    %243 = arith.mulf %242, %241 : vector<16x16xf32>
    %244 = arith.addf %224, %243 : vector<16x16xf32>
    %245 = vector.extract_strided_slice %23 {offsets = [0, 6], sizes = [22, 16], strides = [1, 1]} : vector<22x22xf32> to vector<22x16xf32>
    %c6 = arith.constant 6 : index
    %246 = memref.load %arg1[%c6] : memref<98xf32, #tpu.memory_space<smem>>
    %247 = vector.extract_strided_slice %245 {offsets = [0, 0], sizes = [16, 16], strides = [1, 1]} : vector<22x16xf32> to vector<16x16xf32>
    %248 = vector.broadcast %246 : f32 to vector<16x16xf32>
    %249 = arith.mulf %248, %247 : vector<16x16xf32>
    %250 = arith.addf %229, %249 : vector<16x16xf32>
    %c13 = arith.constant 13 : index
    %251 = memref.load %arg1[%c13] : memref<98xf32, #tpu.memory_space<smem>>
    %252 = vector.extract_strided_slice %245 {offsets = [1, 0], sizes = [16, 16], strides = [1, 1]} : vector<22x16xf32> to vector<16x16xf32>
    %253 = vector.broadcast %251 : f32 to vector<16x16xf32>
    %254 = arith.mulf %253, %252 : vector<16x16xf32>
    %255 = arith.addf %234, %254 : vector<16x16xf32>
    %c20 = arith.constant 20 : index
    %256 = memref.load %arg1[%c20] : memref<98xf32, #tpu.memory_space<smem>>
    %257 = vector.extract_strided_slice %245 {offsets = [2, 0], sizes = [16, 16], strides = [1, 1]} : vector<22x16xf32> to vector<16x16xf32>
    %258 = vector.broadcast %256 : f32 to vector<16x16xf32>
    %259 = arith.mulf %258, %257 : vector<16x16xf32>
    %260 = arith.addf %239, %259 : vector<16x16xf32>
    %c27 = arith.constant 27 : index
    %261 = memref.load %arg1[%c27] : memref<98xf32, #tpu.memory_space<smem>>
    %262 = vector.extract_strided_slice %245 {offsets = [3, 0], sizes = [16, 16], strides = [1, 1]} : vector<22x16xf32> to vector<16x16xf32>
    %263 = vector.broadcast %261 : f32 to vector<16x16xf32>
    %264 = arith.mulf %263, %262 : vector<16x16xf32>
    %265 = arith.addf %244, %264 : vector<16x16xf32>
    %c34 = arith.constant 34 : index
    %266 = memref.load %arg1[%c34] : memref<98xf32, #tpu.memory_space<smem>>
    %267 = vector.extract_strided_slice %245 {offsets = [4, 0], sizes = [16, 16], strides = [1, 1]} : vector<22x16xf32> to vector<16x16xf32>
    %268 = vector.broadcast %266 : f32 to vector<16x16xf32>
    %269 = arith.mulf %268, %267 : vector<16x16xf32>
    %270 = arith.addf %250, %269 : vector<16x16xf32>
    %c41 = arith.constant 41 : index
    %271 = memref.load %arg1[%c41] : memref<98xf32, #tpu.memory_space<smem>>
    %272 = vector.extract_strided_slice %245 {offsets = [5, 0], sizes = [16, 16], strides = [1, 1]} : vector<22x16xf32> to vector<16x16xf32>
    %273 = vector.broadcast %271 : f32 to vector<16x16xf32>
    %274 = arith.mulf %273, %272 : vector<16x16xf32>
    %275 = arith.addf %255, %274 : vector<16x16xf32>
    %c48 = arith.constant 48 : index
    %276 = memref.load %arg1[%c48] : memref<98xf32, #tpu.memory_space<smem>>
    %277 = vector.extract_strided_slice %245 {offsets = [6, 0], sizes = [16, 16], strides = [1, 1]} : vector<22x16xf32> to vector<16x16xf32>
    %278 = vector.broadcast %276 : f32 to vector<16x16xf32>
    %279 = arith.mulf %278, %277 : vector<16x16xf32>
    %280 = arith.addf %260, %279 : vector<16x16xf32>
    %281 = vector.extract_strided_slice %24 {offsets = [0, 0], sizes = [22, 16], strides = [1, 1]} : vector<22x22xf32> to vector<22x16xf32>
    %c49 = arith.constant 49 : index
    %282 = memref.load %arg1[%c49] : memref<98xf32, #tpu.memory_space<smem>>
    %283 = vector.extract_strided_slice %281 {offsets = [0, 0], sizes = [16, 16], strides = [1, 1]} : vector<22x16xf32> to vector<16x16xf32>
    %284 = vector.broadcast %282 : f32 to vector<16x16xf32>
    %285 = arith.mulf %284, %283 : vector<16x16xf32>
    %286 = arith.addf %265, %285 : vector<16x16xf32>
    %c56 = arith.constant 56 : index
    %287 = memref.load %arg1[%c56] : memref<98xf32, #tpu.memory_space<smem>>
    %288 = vector.extract_strided_slice %281 {offsets = [1, 0], sizes = [16, 16], strides = [1, 1]} : vector<22x16xf32> to vector<16x16xf32>
    %289 = vector.broadcast %287 : f32 to vector<16x16xf32>
    %290 = arith.mulf %289, %288 : vector<16x16xf32>
    %291 = arith.addf %270, %290 : vector<16x16xf32>
    %c63 = arith.constant 63 : index
    %292 = memref.load %arg1[%c63] : memref<98xf32, #tpu.memory_space<smem>>
    %293 = vector.extract_strided_slice %281 {offsets = [2, 0], sizes = [16, 16], strides = [1, 1]} : vector<22x16xf32> to vector<16x16xf32>
    %294 = vector.broadcast %292 : f32 to vector<16x16xf32>
    %295 = arith.mulf %294, %293 : vector<16x16xf32>
    %296 = arith.addf %275, %295 : vector<16x16xf32>
    %c70 = arith.constant 70 : index
    %297 = memref.load %arg1[%c70] : memref<98xf32, #tpu.memory_space<smem>>
    %298 = vector.extract_strided_slice %281 {offsets = [3, 0], sizes = [16, 16], strides = [1, 1]} : vector<22x16xf32> to vector<16x16xf32>
    %299 = vector.broadcast %297 : f32 to vector<16x16xf32>
    %300 = arith.mulf %299, %298 : vector<16x16xf32>
    %301 = arith.addf %280, %300 : vector<16x16xf32>
    %c77 = arith.constant 77 : index
    %302 = memref.load %arg1[%c77] : memref<98xf32, #tpu.memory_space<smem>>
    %303 = vector.extract_strided_slice %281 {offsets = [4, 0], sizes = [16, 16], strides = [1, 1]} : vector<22x16xf32> to vector<16x16xf32>
    %304 = vector.broadcast %302 : f32 to vector<16x16xf32>
    %305 = arith.mulf %304, %303 : vector<16x16xf32>
    %306 = arith.addf %286, %305 : vector<16x16xf32>
    %c84 = arith.constant 84 : index
    %307 = memref.load %arg1[%c84] : memref<98xf32, #tpu.memory_space<smem>>
    %308 = vector.extract_strided_slice %281 {offsets = [5, 0], sizes = [16, 16], strides = [1, 1]} : vector<22x16xf32> to vector<16x16xf32>
    %309 = vector.broadcast %307 : f32 to vector<16x16xf32>
    %310 = arith.mulf %309, %308 : vector<16x16xf32>
    %311 = arith.addf %291, %310 : vector<16x16xf32>
    %c91 = arith.constant 91 : index
    %312 = memref.load %arg1[%c91] : memref<98xf32, #tpu.memory_space<smem>>
    %313 = vector.extract_strided_slice %281 {offsets = [6, 0], sizes = [16, 16], strides = [1, 1]} : vector<22x16xf32> to vector<16x16xf32>
    %314 = vector.broadcast %312 : f32 to vector<16x16xf32>
    %315 = arith.mulf %314, %313 : vector<16x16xf32>
    %316 = arith.addf %296, %315 : vector<16x16xf32>
    %317 = vector.extract_strided_slice %24 {offsets = [0, 1], sizes = [22, 16], strides = [1, 1]} : vector<22x22xf32> to vector<22x16xf32>
    %c50 = arith.constant 50 : index
    %318 = memref.load %arg1[%c50] : memref<98xf32, #tpu.memory_space<smem>>
    %319 = vector.extract_strided_slice %317 {offsets = [0, 0], sizes = [16, 16], strides = [1, 1]} : vector<22x16xf32> to vector<16x16xf32>
    %320 = vector.broadcast %318 : f32 to vector<16x16xf32>
    %321 = arith.mulf %320, %319 : vector<16x16xf32>
    %322 = arith.addf %301, %321 : vector<16x16xf32>
    %c57 = arith.constant 57 : index
    %323 = memref.load %arg1[%c57] : memref<98xf32, #tpu.memory_space<smem>>
    %324 = vector.extract_strided_slice %317 {offsets = [1, 0], sizes = [16, 16], strides = [1, 1]} : vector<22x16xf32> to vector<16x16xf32>
    %325 = vector.broadcast %323 : f32 to vector<16x16xf32>
    %326 = arith.mulf %325, %324 : vector<16x16xf32>
    %327 = arith.addf %306, %326 : vector<16x16xf32>
    %c64 = arith.constant 64 : index
    %328 = memref.load %arg1[%c64] : memref<98xf32, #tpu.memory_space<smem>>
    %329 = vector.extract_strided_slice %317 {offsets = [2, 0], sizes = [16, 16], strides = [1, 1]} : vector<22x16xf32> to vector<16x16xf32>
    %330 = vector.broadcast %328 : f32 to vector<16x16xf32>
    %331 = arith.mulf %330, %329 : vector<16x16xf32>
    %332 = arith.addf %311, %331 : vector<16x16xf32>
    %c71 = arith.constant 71 : index
    %333 = memref.load %arg1[%c71] : memref<98xf32, #tpu.memory_space<smem>>
    %334 = vector.extract_strided_slice %317 {offsets = [3, 0], sizes = [16, 16], strides = [1, 1]} : vector<22x16xf32> to vector<16x16xf32>
    %335 = vector.broadcast %333 : f32 to vector<16x16xf32>
    %336 = arith.mulf %335, %334 : vector<16x16xf32>
    %337 = arith.addf %316, %336 : vector<16x16xf32>
    %c78 = arith.constant 78 : index
    %338 = memref.load %arg1[%c78] : memref<98xf32, #tpu.memory_space<smem>>
    %339 = vector.extract_strided_slice %317 {offsets = [4, 0], sizes = [16, 16], strides = [1, 1]} : vector<22x16xf32> to vector<16x16xf32>
    %340 = vector.broadcast %338 : f32 to vector<16x16xf32>
    %341 = arith.mulf %340, %339 : vector<16x16xf32>
    %342 = arith.addf %322, %341 : vector<16x16xf32>
    %c85 = arith.constant 85 : index
    %343 = memref.load %arg1[%c85] : memref<98xf32, #tpu.memory_space<smem>>
    %344 = vector.extract_strided_slice %317 {offsets = [5, 0], sizes = [16, 16], strides = [1, 1]} : vector<22x16xf32> to vector<16x16xf32>
    %345 = vector.broadcast %343 : f32 to vector<16x16xf32>
    %346 = arith.mulf %345, %344 : vector<16x16xf32>
    %347 = arith.addf %327, %346 : vector<16x16xf32>
    %c92 = arith.constant 92 : index
    %348 = memref.load %arg1[%c92] : memref<98xf32, #tpu.memory_space<smem>>
    %349 = vector.extract_strided_slice %317 {offsets = [6, 0], sizes = [16, 16], strides = [1, 1]} : vector<22x16xf32> to vector<16x16xf32>
    %350 = vector.broadcast %348 : f32 to vector<16x16xf32>
    %351 = arith.mulf %350, %349 : vector<16x16xf32>
    %352 = arith.addf %332, %351 : vector<16x16xf32>
    %353 = vector.extract_strided_slice %24 {offsets = [0, 2], sizes = [22, 16], strides = [1, 1]} : vector<22x22xf32> to vector<22x16xf32>
    %c51 = arith.constant 51 : index
    %354 = memref.load %arg1[%c51] : memref<98xf32, #tpu.memory_space<smem>>
    %355 = vector.extract_strided_slice %353 {offsets = [0, 0], sizes = [16, 16], strides = [1, 1]} : vector<22x16xf32> to vector<16x16xf32>
    %356 = vector.broadcast %354 : f32 to vector<16x16xf32>
    %357 = arith.mulf %356, %355 : vector<16x16xf32>
    %358 = arith.addf %337, %357 : vector<16x16xf32>
    %c58 = arith.constant 58 : index
    %359 = memref.load %arg1[%c58] : memref<98xf32, #tpu.memory_space<smem>>
    %360 = vector.extract_strided_slice %353 {offsets = [1, 0], sizes = [16, 16], strides = [1, 1]} : vector<22x16xf32> to vector<16x16xf32>
    %361 = vector.broadcast %359 : f32 to vector<16x16xf32>
    %362 = arith.mulf %361, %360 : vector<16x16xf32>
    %363 = arith.addf %342, %362 : vector<16x16xf32>
    %c65 = arith.constant 65 : index
    %364 = memref.load %arg1[%c65] : memref<98xf32, #tpu.memory_space<smem>>
    %365 = vector.extract_strided_slice %353 {offsets = [2, 0], sizes = [16, 16], strides = [1, 1]} : vector<22x16xf32> to vector<16x16xf32>
    %366 = vector.broadcast %364 : f32 to vector<16x16xf32>
    %367 = arith.mulf %366, %365 : vector<16x16xf32>
    %368 = arith.addf %347, %367 : vector<16x16xf32>
    %c72 = arith.constant 72 : index
    %369 = memref.load %arg1[%c72] : memref<98xf32, #tpu.memory_space<smem>>
    %370 = vector.extract_strided_slice %353 {offsets = [3, 0], sizes = [16, 16], strides = [1, 1]} : vector<22x16xf32> to vector<16x16xf32>
    %371 = vector.broadcast %369 : f32 to vector<16x16xf32>
    %372 = arith.mulf %371, %370 : vector<16x16xf32>
    %373 = arith.addf %352, %372 : vector<16x16xf32>
    %c79 = arith.constant 79 : index
    %374 = memref.load %arg1[%c79] : memref<98xf32, #tpu.memory_space<smem>>
    %375 = vector.extract_strided_slice %353 {offsets = [4, 0], sizes = [16, 16], strides = [1, 1]} : vector<22x16xf32> to vector<16x16xf32>
    %376 = vector.broadcast %374 : f32 to vector<16x16xf32>
    %377 = arith.mulf %376, %375 : vector<16x16xf32>
    %378 = arith.addf %358, %377 : vector<16x16xf32>
    %c86 = arith.constant 86 : index
    %379 = memref.load %arg1[%c86] : memref<98xf32, #tpu.memory_space<smem>>
    %380 = vector.extract_strided_slice %353 {offsets = [5, 0], sizes = [16, 16], strides = [1, 1]} : vector<22x16xf32> to vector<16x16xf32>
    %381 = vector.broadcast %379 : f32 to vector<16x16xf32>
    %382 = arith.mulf %381, %380 : vector<16x16xf32>
    %383 = arith.addf %363, %382 : vector<16x16xf32>
    %c93 = arith.constant 93 : index
    %384 = memref.load %arg1[%c93] : memref<98xf32, #tpu.memory_space<smem>>
    %385 = vector.extract_strided_slice %353 {offsets = [6, 0], sizes = [16, 16], strides = [1, 1]} : vector<22x16xf32> to vector<16x16xf32>
    %386 = vector.broadcast %384 : f32 to vector<16x16xf32>
    %387 = arith.mulf %386, %385 : vector<16x16xf32>
    %388 = arith.addf %368, %387 : vector<16x16xf32>
    %389 = vector.extract_strided_slice %24 {offsets = [0, 3], sizes = [22, 16], strides = [1, 1]} : vector<22x22xf32> to vector<22x16xf32>
    %c52 = arith.constant 52 : index
    %390 = memref.load %arg1[%c52] : memref<98xf32, #tpu.memory_space<smem>>
    %391 = vector.extract_strided_slice %389 {offsets = [0, 0], sizes = [16, 16], strides = [1, 1]} : vector<22x16xf32> to vector<16x16xf32>
    %392 = vector.broadcast %390 : f32 to vector<16x16xf32>
    %393 = arith.mulf %392, %391 : vector<16x16xf32>
    %394 = arith.addf %373, %393 : vector<16x16xf32>
    %c59 = arith.constant 59 : index
    %395 = memref.load %arg1[%c59] : memref<98xf32, #tpu.memory_space<smem>>
    %396 = vector.extract_strided_slice %389 {offsets = [1, 0], sizes = [16, 16], strides = [1, 1]} : vector<22x16xf32> to vector<16x16xf32>
    %397 = vector.broadcast %395 : f32 to vector<16x16xf32>
    %398 = arith.mulf %397, %396 : vector<16x16xf32>
    %399 = arith.addf %378, %398 : vector<16x16xf32>
    %c66 = arith.constant 66 : index
    %400 = memref.load %arg1[%c66] : memref<98xf32, #tpu.memory_space<smem>>
    %401 = vector.extract_strided_slice %389 {offsets = [2, 0], sizes = [16, 16], strides = [1, 1]} : vector<22x16xf32> to vector<16x16xf32>
    %402 = vector.broadcast %400 : f32 to vector<16x16xf32>
    %403 = arith.mulf %402, %401 : vector<16x16xf32>
    %404 = arith.addf %383, %403 : vector<16x16xf32>
    %c73 = arith.constant 73 : index
    %405 = memref.load %arg1[%c73] : memref<98xf32, #tpu.memory_space<smem>>
    %406 = vector.extract_strided_slice %389 {offsets = [3, 0], sizes = [16, 16], strides = [1, 1]} : vector<22x16xf32> to vector<16x16xf32>
    %407 = vector.broadcast %405 : f32 to vector<16x16xf32>
    %408 = arith.mulf %407, %406 : vector<16x16xf32>
    %409 = arith.addf %388, %408 : vector<16x16xf32>
    %c80 = arith.constant 80 : index
    %410 = memref.load %arg1[%c80] : memref<98xf32, #tpu.memory_space<smem>>
    %411 = vector.extract_strided_slice %389 {offsets = [4, 0], sizes = [16, 16], strides = [1, 1]} : vector<22x16xf32> to vector<16x16xf32>
    %412 = vector.broadcast %410 : f32 to vector<16x16xf32>
    %413 = arith.mulf %412, %411 : vector<16x16xf32>
    %414 = arith.addf %394, %413 : vector<16x16xf32>
    %c87 = arith.constant 87 : index
    %415 = memref.load %arg1[%c87] : memref<98xf32, #tpu.memory_space<smem>>
    %416 = vector.extract_strided_slice %389 {offsets = [5, 0], sizes = [16, 16], strides = [1, 1]} : vector<22x16xf32> to vector<16x16xf32>
    %417 = vector.broadcast %415 : f32 to vector<16x16xf32>
    %418 = arith.mulf %417, %416 : vector<16x16xf32>
    %419 = arith.addf %399, %418 : vector<16x16xf32>
    %c94 = arith.constant 94 : index
    %420 = memref.load %arg1[%c94] : memref<98xf32, #tpu.memory_space<smem>>
    %421 = vector.extract_strided_slice %389 {offsets = [6, 0], sizes = [16, 16], strides = [1, 1]} : vector<22x16xf32> to vector<16x16xf32>
    %422 = vector.broadcast %420 : f32 to vector<16x16xf32>
    %423 = arith.mulf %422, %421 : vector<16x16xf32>
    %424 = arith.addf %404, %423 : vector<16x16xf32>
    %425 = vector.extract_strided_slice %24 {offsets = [0, 4], sizes = [22, 16], strides = [1, 1]} : vector<22x22xf32> to vector<22x16xf32>
    %c53 = arith.constant 53 : index
    %426 = memref.load %arg1[%c53] : memref<98xf32, #tpu.memory_space<smem>>
    %427 = vector.extract_strided_slice %425 {offsets = [0, 0], sizes = [16, 16], strides = [1, 1]} : vector<22x16xf32> to vector<16x16xf32>
    %428 = vector.broadcast %426 : f32 to vector<16x16xf32>
    %429 = arith.mulf %428, %427 : vector<16x16xf32>
    %430 = arith.addf %409, %429 : vector<16x16xf32>
    %c60 = arith.constant 60 : index
    %431 = memref.load %arg1[%c60] : memref<98xf32, #tpu.memory_space<smem>>
    %432 = vector.extract_strided_slice %425 {offsets = [1, 0], sizes = [16, 16], strides = [1, 1]} : vector<22x16xf32> to vector<16x16xf32>
    %433 = vector.broadcast %431 : f32 to vector<16x16xf32>
    %434 = arith.mulf %433, %432 : vector<16x16xf32>
    %435 = arith.addf %414, %434 : vector<16x16xf32>
    %c67 = arith.constant 67 : index
    %436 = memref.load %arg1[%c67] : memref<98xf32, #tpu.memory_space<smem>>
    %437 = vector.extract_strided_slice %425 {offsets = [2, 0], sizes = [16, 16], strides = [1, 1]} : vector<22x16xf32> to vector<16x16xf32>
    %438 = vector.broadcast %436 : f32 to vector<16x16xf32>
    %439 = arith.mulf %438, %437 : vector<16x16xf32>
    %440 = arith.addf %419, %439 : vector<16x16xf32>
    %c74 = arith.constant 74 : index
    %441 = memref.load %arg1[%c74] : memref<98xf32, #tpu.memory_space<smem>>
    %442 = vector.extract_strided_slice %425 {offsets = [3, 0], sizes = [16, 16], strides = [1, 1]} : vector<22x16xf32> to vector<16x16xf32>
    %443 = vector.broadcast %441 : f32 to vector<16x16xf32>
    %444 = arith.mulf %443, %442 : vector<16x16xf32>
    %445 = arith.addf %424, %444 : vector<16x16xf32>
    %c81 = arith.constant 81 : index
    %446 = memref.load %arg1[%c81] : memref<98xf32, #tpu.memory_space<smem>>
    %447 = vector.extract_strided_slice %425 {offsets = [4, 0], sizes = [16, 16], strides = [1, 1]} : vector<22x16xf32> to vector<16x16xf32>
    %448 = vector.broadcast %446 : f32 to vector<16x16xf32>
    %449 = arith.mulf %448, %447 : vector<16x16xf32>
    %450 = arith.addf %430, %449 : vector<16x16xf32>
    %c88 = arith.constant 88 : index
    %451 = memref.load %arg1[%c88] : memref<98xf32, #tpu.memory_space<smem>>
    %452 = vector.extract_strided_slice %425 {offsets = [5, 0], sizes = [16, 16], strides = [1, 1]} : vector<22x16xf32> to vector<16x16xf32>
    %453 = vector.broadcast %451 : f32 to vector<16x16xf32>
    %454 = arith.mulf %453, %452 : vector<16x16xf32>
    %455 = arith.addf %435, %454 : vector<16x16xf32>
    %c95 = arith.constant 95 : index
    %456 = memref.load %arg1[%c95] : memref<98xf32, #tpu.memory_space<smem>>
    %457 = vector.extract_strided_slice %425 {offsets = [6, 0], sizes = [16, 16], strides = [1, 1]} : vector<22x16xf32> to vector<16x16xf32>
    %458 = vector.broadcast %456 : f32 to vector<16x16xf32>
    %459 = arith.mulf %458, %457 : vector<16x16xf32>
    %460 = arith.addf %440, %459 : vector<16x16xf32>
    %461 = vector.extract_strided_slice %24 {offsets = [0, 5], sizes = [22, 16], strides = [1, 1]} : vector<22x22xf32> to vector<22x16xf32>
    %c54 = arith.constant 54 : index
    %462 = memref.load %arg1[%c54] : memref<98xf32, #tpu.memory_space<smem>>
    %463 = vector.extract_strided_slice %461 {offsets = [0, 0], sizes = [16, 16], strides = [1, 1]} : vector<22x16xf32> to vector<16x16xf32>
    %464 = vector.broadcast %462 : f32 to vector<16x16xf32>
    %465 = arith.mulf %464, %463 : vector<16x16xf32>
    %466 = arith.addf %445, %465 : vector<16x16xf32>
    %c61 = arith.constant 61 : index
    %467 = memref.load %arg1[%c61] : memref<98xf32, #tpu.memory_space<smem>>
    %468 = vector.extract_strided_slice %461 {offsets = [1, 0], sizes = [16, 16], strides = [1, 1]} : vector<22x16xf32> to vector<16x16xf32>
    %469 = vector.broadcast %467 : f32 to vector<16x16xf32>
    %470 = arith.mulf %469, %468 : vector<16x16xf32>
    %471 = arith.addf %450, %470 : vector<16x16xf32>
    %c68 = arith.constant 68 : index
    %472 = memref.load %arg1[%c68] : memref<98xf32, #tpu.memory_space<smem>>
    %473 = vector.extract_strided_slice %461 {offsets = [2, 0], sizes = [16, 16], strides = [1, 1]} : vector<22x16xf32> to vector<16x16xf32>
    %474 = vector.broadcast %472 : f32 to vector<16x16xf32>
    %475 = arith.mulf %474, %473 : vector<16x16xf32>
    %476 = arith.addf %455, %475 : vector<16x16xf32>
    %c75 = arith.constant 75 : index
    %477 = memref.load %arg1[%c75] : memref<98xf32, #tpu.memory_space<smem>>
    %478 = vector.extract_strided_slice %461 {offsets = [3, 0], sizes = [16, 16], strides = [1, 1]} : vector<22x16xf32> to vector<16x16xf32>
    %479 = vector.broadcast %477 : f32 to vector<16x16xf32>
    %480 = arith.mulf %479, %478 : vector<16x16xf32>
    %481 = arith.addf %460, %480 : vector<16x16xf32>
    %c82 = arith.constant 82 : index
    %482 = memref.load %arg1[%c82] : memref<98xf32, #tpu.memory_space<smem>>
    %483 = vector.extract_strided_slice %461 {offsets = [4, 0], sizes = [16, 16], strides = [1, 1]} : vector<22x16xf32> to vector<16x16xf32>
    %484 = vector.broadcast %482 : f32 to vector<16x16xf32>
    %485 = arith.mulf %484, %483 : vector<16x16xf32>
    %486 = arith.addf %466, %485 : vector<16x16xf32>
    %c89 = arith.constant 89 : index
    %487 = memref.load %arg1[%c89] : memref<98xf32, #tpu.memory_space<smem>>
    %488 = vector.extract_strided_slice %461 {offsets = [5, 0], sizes = [16, 16], strides = [1, 1]} : vector<22x16xf32> to vector<16x16xf32>
    %489 = vector.broadcast %487 : f32 to vector<16x16xf32>
    %490 = arith.mulf %489, %488 : vector<16x16xf32>
    %491 = arith.addf %471, %490 : vector<16x16xf32>
    %c96 = arith.constant 96 : index
    %492 = memref.load %arg1[%c96] : memref<98xf32, #tpu.memory_space<smem>>
    %493 = vector.extract_strided_slice %461 {offsets = [6, 0], sizes = [16, 16], strides = [1, 1]} : vector<22x16xf32> to vector<16x16xf32>
    %494 = vector.broadcast %492 : f32 to vector<16x16xf32>
    %495 = arith.mulf %494, %493 : vector<16x16xf32>
    %496 = arith.addf %476, %495 : vector<16x16xf32>
    %497 = vector.extract_strided_slice %24 {offsets = [0, 6], sizes = [22, 16], strides = [1, 1]} : vector<22x22xf32> to vector<22x16xf32>
    %c55 = arith.constant 55 : index
    %498 = memref.load %arg1[%c55] : memref<98xf32, #tpu.memory_space<smem>>
    %499 = vector.extract_strided_slice %497 {offsets = [0, 0], sizes = [16, 16], strides = [1, 1]} : vector<22x16xf32> to vector<16x16xf32>
    %500 = vector.broadcast %498 : f32 to vector<16x16xf32>
    %501 = arith.mulf %500, %499 : vector<16x16xf32>
    %502 = arith.addf %481, %501 : vector<16x16xf32>
    %c62 = arith.constant 62 : index
    %503 = memref.load %arg1[%c62] : memref<98xf32, #tpu.memory_space<smem>>
    %504 = vector.extract_strided_slice %497 {offsets = [1, 0], sizes = [16, 16], strides = [1, 1]} : vector<22x16xf32> to vector<16x16xf32>
    %505 = vector.broadcast %503 : f32 to vector<16x16xf32>
    %506 = arith.mulf %505, %504 : vector<16x16xf32>
    %507 = arith.addf %486, %506 : vector<16x16xf32>
    %c69 = arith.constant 69 : index
    %508 = memref.load %arg1[%c69] : memref<98xf32, #tpu.memory_space<smem>>
    %509 = vector.extract_strided_slice %497 {offsets = [2, 0], sizes = [16, 16], strides = [1, 1]} : vector<22x16xf32> to vector<16x16xf32>
    %510 = vector.broadcast %508 : f32 to vector<16x16xf32>
    %511 = arith.mulf %510, %509 : vector<16x16xf32>
    %512 = arith.addf %491, %511 : vector<16x16xf32>
    %c76 = arith.constant 76 : index
    %513 = memref.load %arg1[%c76] : memref<98xf32, #tpu.memory_space<smem>>
    %514 = vector.extract_strided_slice %497 {offsets = [3, 0], sizes = [16, 16], strides = [1, 1]} : vector<22x16xf32> to vector<16x16xf32>
    %515 = vector.broadcast %513 : f32 to vector<16x16xf32>
    %516 = arith.mulf %515, %514 : vector<16x16xf32>
    %517 = arith.addf %496, %516 : vector<16x16xf32>
    %c83 = arith.constant 83 : index
    %518 = memref.load %arg1[%c83] : memref<98xf32, #tpu.memory_space<smem>>
    %519 = vector.extract_strided_slice %497 {offsets = [4, 0], sizes = [16, 16], strides = [1, 1]} : vector<22x16xf32> to vector<16x16xf32>
    %520 = vector.broadcast %518 : f32 to vector<16x16xf32>
    %521 = arith.mulf %520, %519 : vector<16x16xf32>
    %522 = arith.addf %502, %521 : vector<16x16xf32>
    %c90 = arith.constant 90 : index
    %523 = memref.load %arg1[%c90] : memref<98xf32, #tpu.memory_space<smem>>
    %524 = vector.extract_strided_slice %497 {offsets = [5, 0], sizes = [16, 16], strides = [1, 1]} : vector<22x16xf32> to vector<16x16xf32>
    %525 = vector.broadcast %523 : f32 to vector<16x16xf32>
    %526 = arith.mulf %525, %524 : vector<16x16xf32>
    %527 = arith.addf %507, %526 : vector<16x16xf32>
    %c97 = arith.constant 97 : index
    %528 = memref.load %arg1[%c97] : memref<98xf32, #tpu.memory_space<smem>>
    %529 = vector.extract_strided_slice %497 {offsets = [6, 0], sizes = [16, 16], strides = [1, 1]} : vector<22x16xf32> to vector<16x16xf32>
    %530 = vector.broadcast %528 : f32 to vector<16x16xf32>
    %531 = arith.mulf %530, %529 : vector<16x16xf32>
    %532 = arith.addf %512, %531 : vector<16x16xf32>
    %533 = arith.addf %527, %532 : vector<16x16xf32>
    %534 = arith.addf %517, %522 : vector<16x16xf32>
    %535 = arith.addf %533, %534 : vector<16x16xf32>
    %536 = arith.negf %535 : vector<16x16xf32>
    %537 = math.exp %536 : vector<16x16xf32>
    %cst_31 = arith.constant 1.000000e+00 : f32
    %538 = vector.broadcast %cst_31 : f32 to vector<16x16xf32>
    %539 = arith.addf %538, %537 : vector<16x16xf32>
    %540 = arith.divf %538, %539 : vector<16x16xf32>
    %c0_32 = arith.constant 0 : index
    %c0_33 = arith.constant 0 : index
    %c0_34 = arith.constant 0 : index
    %c0_35 = arith.constant 0 : index
    %541 = vector.load %arg3[%c0_32, %c0_33, %c0_34, %c0_35] : memref<1x1x16x16xf32, #tpu.memory_space<vmem>>, vector<1x1x16x16xf32>
    %542 = vector.shape_cast %541 : vector<1x1x16x16xf32> to vector<16x16xf32>
    %543 = vector.shape_cast %540 : vector<16x16xf32> to vector<1x1x16x16xf32>
    tpu.vector_store %arg3[%c0_32, %c0_33, %c0_34, %c0_35], %543 {strides = array<i32>} : memref<1x1x16x16xf32, #tpu.memory_space<vmem>>, vector<1x1x16x16xf32>,
    return
  }
  func.func @transform_0(%arg0: i32) -> i32 {
    %c0_i32 = arith.constant 0 : i32
    %c0_i32_0 = arith.constant 0 : i32
    return %c0_i32 : i32
  }
  func.func @transform_1(%arg0: i32) -> (i32, i32, i32, i32) {
    %c0_i32 = arith.constant 0 : i32
    %c0_i32_0 = arith.constant 0 : i32
    %c0_i32_1 = arith.constant 0 : i32
    %c0_i32_2 = arith.constant 0 : i32
    return %arg0, %c0_i32, %c0_i32_0, %c0_i32_1 : i32, i32, i32, i32
  }
  func.func @transform_2(%arg0: i32) -> (i32, i32, i32, i32) {
    %c0_i32 = arith.constant 0 : i32
    %c0_i32_0 = arith.constant 0 : i32
    %c0_i32_1 = arith.constant 0 : i32
    %c0_i32_2 = arith.constant 0 : i32
    return %arg0, %c0_i32, %c0_i32_0, %c0_i32_1 : i32, i32, i32, i32
  }
}

</mosaic_0001>

<bundles_post_ra>
// kernel: tpu_custom_call.1
= control target key start
LH: loop header
LB: loop body
LE: loop exit
PB: predicated region body
PF: predicated region fallthrough
CT: control target
= control target key end

     0   :  { %7 = vsyncpa [#allocation7], 0  ;;  %s4642_s0 = inlined_call_operand.hbm [shape: f32[98], index: 0, kind: input, shape index: {}]   ;;  %s4643_s1 = inlined_call_operand.hbm [shape: f32[2,4,16,16], index: 1, kind: input, shape index: {}]   ;;  %s4644_s2 = inlined_call_operand.hbm [shape: f32[2,1,16,16], index: 2, kind: output, shape index: {}]  }
   0x1   :  { %8 = vsyncpa [#allocation5], 0 }
   0x2   :  { %10 = vsyncpa [#allocation5 + $0x1], 0 }
   0x3   :  { %11 = vsyncpa [#allocation6], 0 }
   0x4   :  { %13 = vsyncpa [#allocation6 + $0x1], 0  ;;  %s2896_s9 = smov 0   ;;  %s2898_s10 = smov 0  }
   0x5   :  { %s2900_s11 = smov 0   ;;  %s2902_s12 = smov 0  }
   0x6 LB: > { %s2917_s13 = sadd.s32 4294967295, %s2866_s12   ;;  %s2545_s14 = sadd.s32 4294967294, %s2866_s12   ;;  %s2866_s12 = sphi %s2902_s12, %s4779_s12   ;;  %s2862_s11 = sphi %s2900_s11, %s4778_s11   ;;  %s2858_s10 = sphi %s2898_s10, %s4777_s10   ;;  %s2854_s9 = sphi %s2896_s9, %s4776_s9  }
   0x7   : > { %s2921_s15 = sadd.s32 1, %s2866_s12   ;;  %s47_s16 = sadd.s32 1, %s2862_s11 }
   0x8   : > { %s44_s17 = ssub.s32 %s2866_s12, %s2921_s15  ;;  %p54_p0 = scmp.ne.s32.totalorder %s2862_s11, %s2858_s10 }
   0x9   : > { %p45_p1 = scmp.eq.s32.totalorder %s44_s17, 0  ;;  %p55_p2 = scmp.eq.s32.totalorder %s2866_s12, 0 }
   0xa   : > { %p60_p3 = scmp.ne.s32.totalorder %s2858_s10, %s2854_s9  ;;  %p61_p4 = scmp.eq.s32.totalorder %s2917_s13, 0 }
   0xb   : > { %s2933_s18 = scalar_select %p45_p1, %s2862_s11, %s47_s16  }
   0xc   : > { %p2935_p5 = por %p55_p2, %p54_p0  ;;  %p2941_p6 = por %p61_p4, %p60_p3 }
   0xd   : > { %p84_p7 = scmp.eq.s32.totalorder %s2917_s13, 1  ;;  %p90_p8 = scmp.eq.s32.totalorder %s2545_s14, 1 }
   0xe   : > { %p2546_p9 = scmp.ge.s32.totalorder %s2866_s12, 1  ;;  %p97_p10 = scmp.lt.s32.totalorder %s2866_s12, 3 }
   0xf   : > { %p2948_p11 = por %p84_p7, %p54_p0  ;;  %p2952_p12 = por %p90_p8, %p60_p3 }
  0x10   : > { %p2956_p13 = pnand %p2546_p9, %p97_p10  ;;  %s109_s26 = sshll.u32 %s4642_s0, 4  ;;  %s110_s26 = int_to_ptr.hbm [resolvable:$true] %s109_s26 }
  0x11   : > { %p2689_p2 = scmp.lt.s32.totalorder %s2866_s12, 2  ;;  %s120_s27 = sand.u32 1, %s2862_s11  }
  0x12   : > { %p2676_p1 = pneg %p2956_p13  ;;  %s2549_s29 = sshll.u32 %s120_s27, 6 }
  0x13   : > { %p2972_p3 = pnand %p2689_p2, %p2935_p5  ;;  %s2868_s30 = smov [#allocation4]  }
  0x14   : > { %p2677_p7 = pnand %p2676_p1, %p61_p4  ;;  %s2666_s3 = sshll.u32 %s2866_s12, 6 }
  0x15   : > { %s124_s4 = scalar_lea.vmem [#allocation8], %s2549_s29  ;;  %s129_s8 = scalar_lea.hbm %s4643_s1, %s2666_s3 }
  0x16   : > { %2679 = dma.hbm_to_smem (!%p2677_p7), %s110_s26, 16, %s2868_s30, [#allocation7]  }
  0x17   : > { %s132_s5 = sshll.u32 %s124_s4, 4  ;;  %s130_s14 = sshll.u32 %s129_s8, 4  ;;  %s133_s5 = int_to_ptr.vmem [resolvable:$true] %s132_s5  ;;  %s131_s14 = int_to_ptr.hbm [resolvable:$true] %s130_s14 }
  0x18   : > { %s121_s16 = scalar_lea.sflag [#allocation5], %s120_s27  ;;  %s2766_s17 = sshra.s32 %s131_s14, 4  ;;  %s2767_s17 = int_to_ptr.hbm [resolvable:$true] %s2766_s17 }
  0x19   : > { %s2768_s19 = scalar_lea.hbm %s2767_s17, 64  ;;  %p2770_p8 = pneg %p2972_p3 }
  0x1a   : > { %p2769_p5 = scmp.ne.s32.totalorder %s2767_s17, %s2768_s19  ;;  %s2773_s26 = scalar_lea.hbm %s4643_s1, 128 }
  0x1b   : > { %p2774_p1 = scmp.lt.s32.totalorder %s2767_s17, %s4643_s1  ;;  %p2775_p2 = scmp.lt.s32.totalorder %s2773_s26, %s2768_s19 }
  0x1c   : > { %p2771_p9 = pnand %p2770_p8, %p2769_p5 }
  0x1d   : > { %p2776_p7 = por %p2775_p2, %p2774_p1 }
  0x1e   : > { %p2772_p10 = pneg %p2771_p9 }
  0x20   : > { %p2777_p0 = pnand %p2776_p7, %p2772_p10 }
  0x22   : > { %2780 = shalt.err (!%p2777_p0)
}
  0x23   : > { %s2869_s27 = smov 128   ;;  %s2870_s3 = smov 8  }
  0x24   : > { %2683 = dma.hbm_to_vmem [thread:$0]  (!%p2972_p3), %s131_s14, 1024, %s133_s5, %s121_s16, %s2869_s27, %s2869_s27, %s2870_s3  }
  0x25   : > { %144 = sbr.rel (%p2956_p13) target bundleno = 947 (0x3b3), region = 28 }
  0x2a   : > { %2841 = dma.done.wait (%p61_p4), [#allocation7], 16  }
  0x2b   : > { %2843 = vsyncadd (%p61_p4), [#allocation7], 4294967280  ;;  %s2997_s4 = sand.u32 1, %s2858_s10  }
  0x2c   : > { %s2554_s6 = sshll.u32 %s2997_s4, 6  ;;  %s152_s7 = scalar_lea.sflag [#allocation5], %s2997_s4 }
  0x2d   : > { %s155_s8 = scalar_lea.vmem [#allocation8], %s2554_s6 }
  0x2e   : > { %2845 = dma.done.wait (%p2941_p6), %s152_s7, 1024  }
  0x2f   : > { %2847 = vsyncadd (%p2941_p6), %s152_s7, 4294966272 }
  0x30   : > { %161 = sfence }
  0x31   : > { %v178_v0 = vld [vmem:[%s155_s8] sm:$0xff]  ;;  %v2556_v1 = vld [vmem:[%s155_s8 + $0x10] sm:$0xff]  ;;  %vm201_vm0 = vcmask 179200   ;;  %v179_v4 = vld [vmem:[%s155_s8 + $0x8] sm:$0xff]  ;;  %v2871_v7 = vmov 0.0   ;;  %s2872_s20 = smov 3  }
  0x32   : > { %v2558_v2 = vld [vmem:[%s155_s8 + $0x20] sm:$0xff]  ;;  %v183_v3 = vadd.f32 %v2556_v1, %v178_v0  ;;  %v2557_v5 = vld [vmem:[%s155_s8 + $0x18] sm:$0xff]  ;;  %v185_v6 = vmax.f32 %v178_v0, %v2556_v1  ;;  %202 = vst.msk [vmem:[#allocation2] sm:$0xff] %vm201_vm0, %v2871_v7  ;;  %v2560_v8 = vld [vmem:[%s155_s8 + $0x30] sm:$0xff]  ;;  %vm204_vm1 = vcmask 177152   ;;  %vm217_vm2 = vcmask 154648  }
  0x33   : > { %203 = vst.msk [vmem:[#allocation2 + $0x8] sm:$0xff] %vm201_vm0, %v2871_v7  ;;  %v184_v10 = vadd.f32 %v2557_v5, %v179_v4  ;;  %v2559_v12 = vld [vmem:[%s155_s8 + $0x28] sm:$0xff]  ;;  %v2561_v16 = vld [vmem:[%s155_s8 + $0x38] sm:$0xff]  ;;  %v186_v18 = vmax.f32 %v179_v4, %v2557_v5  ;;  %s2568_s23 = sld [smem:[#allocation4 + $0x1]]  ;;  %s2873_s14 = smov 127   ;;  %vm352_vm3 = vcmask 1046528  }
  0x34   : > { %v190_v9 = vadd.f32 %v2558_v2, %v183_v3  ;;  %v192_v11 = vmax.f32 %v185_v6, %v2558_v2  ;;  %206 = vst.msk [vmem:[#allocation3] sm:$0xff] %vm201_vm0, %v2871_v7  ;;  %s2574_s28 = sld [smem:[#allocation4 + $0x2b]]  ;;  %s2874_s29 = smov 126   ;;  %vm493_vm4 = vcmask 1041408   ;;  %vm328_vm5 = vcmask 1042432  }
  0x35   : > { %207 = vst.msk [vmem:[#allocation3 + $0x8] sm:$0xff] %vm201_vm0, %v2871_v7  ;;  %v191_v15 = vadd.f32 %v2559_v12, %v184_v10  ;;  %v193_v19 = vmax.f32 %v186_v18, %v2559_v12  ;;  %s2570_s5 = sld [smem:[#allocation4 + $0xf]]  ;;  %vm542_vm6 = vcmask 1045504   ;;  %vm658_vm7 = vcmask 1040384  }
  0x36   : > { %v197_v13 = vadd.f32 %v2560_v8, %v190_v9  ;;  %v199_v14 = vmax.f32 %v192_v11, %v2560_v8  ;;  %205 = vst.msk [vmem:[#allocation2 + $0x10] sm:$0x3f] %vm204_vm1, %v2871_v7  ;;  %s2571_s16 = sld [smem:[#allocation4 + $0x16]]  ;;  %vm732_vm8 = vcmask 1044480   ;;  %vm274_vm9 = vcmask 1043456  }
  0x37   : > { %v198_v17 = vadd.f32 %v2561_v16, %v191_v15  ;;  %v200_v20 = vmax.f32 %v193_v19, %v2561_v16  ;;  %208 = vst.msk [vmem:[#allocation3 + $0x10] sm:$0x3f] %vm204_vm1, %v2871_v7  ;;  %s3016_s17 = sld [smem:[#allocation4 + $0x2]]  ;;  %vm2441_vm12 = vcmask 130048  }
  0x38   : > { %211 = vrot.lane.b32.xlu0 %v197_v13, %s2872_s20  ;;  %222 = vrot.lane.b32.xlu1 %v199_v14, %s2872_s20  ;;  %s2578_s19 = sld [smem:[#allocation4 + $0x17]] }
  0x39   : > { %v323_v22 = vstv %s2568_s23  ;;  %s2569_s24 = sld [smem:[#allocation4 + $0x8]] }
  0x3a   : > { %v3022_v29 = vstv %s2574_s28  ;;  %s2572_s25 = sld [smem:[#allocation4 + $0x1d]] }
  0x3b   : > { %v3024_v30 = vstv %s2570_s5  ;;  %s2579_s26 = sld [smem:[#allocation4 + $0x1e]] }
  0x3c   : > { %v3044_v37 = vstv %s2571_s16  ;;  %s2580_s30 = sld [smem:[#allocation4 + $0x25]] }
  0x3d   : > { %v488_v38 = vstv %s3016_s17  ;;  %s2576_s27 = sld [smem:[#allocation4 + $0x9]] }
  0x3e   : > { %v3050_v41 = vstv %s2578_s19  ;;  %s2582_s3 = sld [smem:[#allocation4 + $0x3]] }
  0x3f   : > { %v3056_v45 = vstv %s2569_s24  ;;  %s2583_s6 = sld [smem:[#allocation4 + $0xa]] }
  0x40   : > { %213 = vrot.lane.b32.xlu0 %v198_v17, %s2872_s20  ;;  %224 = vrot.lane.b32.xlu1 %v200_v20, %s2872_s20  ;;  %v3068_v48 = vstv %s2572_s25  ;;  %s2573_s7 = sld [smem:[#allocation4 + $0x24]]  ;;  %s2875_s20 = smov 125  }
  0x41   : > { %v3075_v52 = vstv %s2579_s26  ;;  %s2584_s8 = sld [smem:[#allocation4 + $0x11]] }
  0x42   : > { %v3098_v62 = vstv %s2580_s30  ;;  %s2577_s23 = sld [smem:[#allocation4 + $0x10]]  ;;  %s2876_s30 = smov 124  }
  0x43   : > { %v510_v3 = vstv %s2576_s27  ;;  %s2581_s28 = sld [smem:[#allocation4 + $0x2c]] }
  0x44   : > { %v653_v5 = vstv %s2582_s3  ;;  %s2585_s5 = sld [smem:[#allocation4 + $0x18]] }
  0x45   : > { %v3138_v13 = vstv %s2583_s6  ;;  %s2586_s16 = sld [smem:[#allocation4 + $0x1f]] }
  0x46   : > { %v3152_v18 = vstv %s2573_s7  ;;  %s2587_s17 = sld [smem:[#allocation4 + $0x26]] }
  0x47   : > { %v3154_v19 = vstv %s2584_s8  ;;  %s2588_s19 = sld [smem:[#allocation4 + $0x2d]] }
  0x48   : > { %s2590_s24 = sld [smem:[#allocation4 + $0xb]] }
  0x49   : > { %s2589_s25 = sld [smem:[#allocation4 + $0x4]] }
  0x4a   : > { %s2591_s26 = sld [smem:[#allocation4 + $0x12]] }
  0x4b   : > { %s2592_s27 = sld [smem:[#allocation4 + $0x19]] }
  0x4c   : > { %s2593_s3 = sld [smem:[#allocation4 + $0x20]] }
  0x4d   : > { %s2594_s6 = sld [smem:[#allocation4 + $0x27]] }
  0x4e   : > { %s2595_s7 = sld [smem:[#allocation4 + $0x2e]] }
  0x4f   : > { %s2596_s8 = sld [smem:[#allocation4 + $0x5]] }
  0xaa   : > { %v212_v21 = vpop.permute.xlu0 %211 }
  0xab   : > { %218 = vst.msk [vmem:[#allocation2 + $0x3] sm:$0xff] %vm217_vm2, %v212_v21 }
  0xb2   : > { %v3006_v23 = vld [vmem:[#allocation2] sm:$0xff]  ;;  %v214_v24 = vpop.permute.xlu0 %213 }
  0xb3   : > { %219 = vst.msk [vmem:[#allocation2 + $0xb] sm:$0xff] %vm217_vm2, %v214_v24  ;;  %v3010_v25 = vmul.f32 %v323_v22, %v3006_v23  ;;  %v346_v49 = vmul.f32 %v3056_v45, %v3006_v23  ;;  %v489_v50 = vmul.f32 %v488_v38, %v3006_v23  ;;  %v3119_v6 = vmul.f32 %v510_v3, %v3006_v23 }
  0xb4   : > { %v3123_v8 = vmul.f32 %v653_v5, %v3006_v23  ;;  %v3149_v16 = vmul.f32 %v3138_v13, %v3006_v23 }
  0xb5   : > { %v329_v26 = vrot.slane %v3010_v25, 5  ;;  %v353_v55 = vrot.slane %v346_v49, 1  ;;  %v494_v56 = vrot.slane %v489_v50, 6  ;;  %v517_v9 = vrot.slane %v3119_v6, 6 }
  0xb6   : > { %v659_v11 = vrot.slane %v3123_v8, 7  ;;  %v682_v21 = vrot.slane %v3149_v16, 7  ;;  %v368_v25 = vmul.f32 %v3024_v30, %v3006_v23 }
  0xb7   : > { %332 = vrot.lane.b32.xlu2 %v329_v26, %s2873_s14 }
  0xba   : > { %v3018_v27 = vld [vmem:[#allocation2 + $0x8] sm:$0xff]  ;;  %v3020_v28 = vld [vmem:[#allocation2 + $0x10] sm:$0x3f] }
  0xbb   : > { %v3027_v31 = vmul.f32 %v323_v22, %v3018_v27  ;;  %v3031_v32 = vmul.f32 %v3022_v29, %v3020_v28  ;;  %v370_v33 = vmul.f32 %v3024_v30, %v3020_v28  ;;  %v395_v39 = vmul.f32 %v3044_v37, %v3020_v28 }
  0xbc   : > { %v490_v40 = vmul.f32 %v488_v38, %v3018_v27  ;;  %v3054_v42 = vmul.f32 %v3050_v41, %v3020_v28  ;;  %v3061_v47 = vmul.f32 %v3056_v45, %v3018_v27  ;;  %v420_v51 = vmul.f32 %v3068_v48, %v3020_v28 }
  0xbd   : > { %v473_v34 = vrot.slane %v3031_v32, 5  ;;  %v377_v35 = vrot.slane %v370_v33, 1  ;;  %v330_v36 = vrot.slane %v3027_v31, 5  ;;  %v402_v43 = vrot.slane %v395_v39, 1 }
  0xbe   : > { %v495_v44 = vrot.slane %v490_v40, 6  ;;  %v567_v46 = vrot.slane %v3054_v42, 2  ;;  %v354_v53 = vrot.slane %v3061_v47, 1  ;;  %v3080_v54 = vmul.f32 %v3075_v52, %v3020_v28 }
  0xbf   : > { %479 = vrot.lane.b32.xlu1 %v473_v34, %s2873_s14  ;;  %383 = vrot.lane.b32.xlu2 %v377_v35, %s2873_s14  ;;  %v427_v57 = vrot.slane %v420_v51, 1  ;;  %v3088_v60 = vmul.f32 %v3024_v30, %v3018_v27  ;;  %v3103_v0 = vmul.f32 %v3098_v62, %v3020_v28  ;;  %v3111_v4 = vmul.f32 %v3044_v37, %v3018_v27 }
  0xc0   : > { %336 = vrot.lane.b32.xlu0 %v330_v36, %s2873_s14  ;;  %v355_v58 = vsel %vm352_vm3, %v353_v55, %v354_v53  ;;  %v592_v59 = vrot.slane %v3080_v54, 2  ;;  %v3091_v61 = vsel %vm493_vm4, %v494_v56, %v495_v44  ;;  %v3132_v12 = vmul.f32 %v3068_v48, %v3018_v27 }
  0xc1   : > { %v375_v63 = vrot.slane %v3088_v60, 1  ;;  %v617_v2 = vrot.slane %v3103_v0, 2  ;;  %v400_v7 = vrot.slane %v3111_v4, 1  ;;  %v3144_v14 = vmul.f32 %v653_v5, %v3018_v27  ;;  %v223_v5 = vpop.permute.xlu1 %222 }
  0xc2   : > { %v425_v15 = vrot.slane %v3132_v12, 1  ;;  %v3162_v22 = vmul.f32 %v3152_v18, %v3018_v27  ;;  %v445_v24 = vmul.f32 %v3152_v18, %v3020_v28  ;;  %v3175_v33 = vmul.f32 %v3154_v19, %v3006_v23  ;;  %228 = vst.msk [vmem:[#allocation3 + $0x3] sm:$0xff] %vm217_vm2, %v223_v5 }
  0xc3   : > { %v378_v1 = vsel %vm352_vm3, %v375_v63, %v377_v35  ;;  %v403_v10 = vsel %vm352_vm3, %v400_v7, %v402_v43  ;;  %v660_v17 = vrot.slane %v3144_v14, 7  ;;  %v331_v40 = vsel %vm328_vm5, %v329_v26, %v330_v36 }
  0xc4   : > { %v428_v20 = vsel %vm352_vm3, %v425_v15, %v427_v57  ;;  %v450_v35 = vrot.slane %v3162_v22, 5  ;;  %v452_v38 = vrot.slane %v445_v24, 5  ;;  %v707_v39 = vrot.slane %v3175_v33, 7 }
  0xc5   : > { %v513_v49 = vmul.f32 %v510_v3, %v3020_v28  ;;  %v348_v50 = vmul.f32 %v3056_v45, %v3020_v28  ;;  %v374_v51 = vrot.slane %v368_v25, 1  ;;  %v3211_v30 = vmul.f32 %v3022_v29, %v3018_v27 }
  0xc6   : > { %v558_v47 = vmul.f32 %v3050_v41, %v3006_v23  ;;  %v661_v54 = vsel %vm658_vm7, %v659_v11, %v660_v17  ;;  %v677_v32 = vmul.f32 %v3138_v13, %v3018_v27 }
  0xc7   : > { %408 = vrot.lane.b32.xlu2 %v402_v43, %s2873_s14  ;;  %501 = vrot.lane.b32.xlu1 %v495_v44, %s2874_s29  ;;  %v453_v43 = vsel %vm328_vm5, %v450_v35, %v452_v38  ;;  %v3188_v44 = vmul.f32 %v510_v3, %v3018_v27  ;;  %v520_v31 = vrot.slane %v513_v49, 6  ;;  %v356_v36 = vrot.slane %v348_v50, 1 }
  0xc8   : > { %573 = vrot.lane.b32.xlu0 %v567_v46, %s2874_s29  ;;  %v471_v3 = vrot.slane %v3211_v30, 5  ;;  %v564_v60 = vrot.slane %v558_v47, 2  ;;  %v418_v49 = vmul.f32 %v3068_v48, %v3006_v23  ;;  %v683_v8 = vrot.slane %v677_v32, 7 }
  0xc9   : > { %v518_v26 = vrot.slane %v3188_v44, 6  ;;  %v357_v55 = vsel %vm352_vm3, %v354_v53, %v356_v36  ;;  %v464_v53 = vmul.f32 %v3022_v29, %v3006_v23  ;;  %v584_v29 = vmul.f32 %v3075_v52, %v3018_v27 }
  0xca   : > { %v474_v22 = vsel %vm328_vm5, %v471_v3, %v473_v34  ;;  %v684_v0 = vsel %vm658_vm7, %v682_v21, %v683_v8 }
  0xcb   : > { %v521_v45 = vsel %vm493_vm4, %v518_v26, %v520_v31  ;;  %v590_v50 = vrot.slane %v584_v29, 2  ;;  %v225_v31 = vpop.permute.xlu1 %224 }
  0xcc   : > { %229 = vst.msk [vmem:[#allocation3 + $0xb] sm:$0xff] %vm217_vm2, %v225_v31 }
  0xcf   : > { %433 = vrot.lane.b32.xlu2 %v427_v57, %s2873_s14  ;;  %358 = vrot.lane.b32.xlu1 %v355_v58, %s2873_s14  ;;  %v376_v57 = vsel %vm352_vm3, %v374_v51, %v375_v63  ;;  %v393_v58 = vmul.f32 %v3044_v37, %v3006_v23  ;;  %v470_v63 = vrot.slane %v464_v53, 5  ;;  %v632_v53 = vstv %s2581_s28  ;;  %s2598_s28 = sld [smem:[#allocation4 + $0x13]] }
  0xd0   : > { %598 = vrot.lane.b32.xlu0 %v592_v59, %s2874_s29  ;;  %v635_v34 = vmul.f32 %v632_v53, %v3020_v28 }
  0xd1   : > { %v472_v24 = vsel %vm328_vm5, %v470_v63, %v471_v3  ;;  %v678_v3 = vmul.f32 %v3138_v13, %v3020_v28 }
  0xd7   : > { %497 = vrot.lane.b32.xlu2 %v494_v56, %s2874_s29  ;;  %381 = vrot.lane.b32.xlu1 %v378_v1, %s2873_s14  ;;  %v559_v56 = vmul.f32 %v3050_v41, %v3018_v27 }
  0xd8   : > { %623 = vrot.lane.b32.xlu0 %v617_v2, %s2874_s29 }
  0xd9   : > { %v565_v1 = vrot.slane %v559_v56, 2  ;;  %v443_v56 = vmul.f32 %v3152_v18, %v3006_v23  ;;  %v633_v18 = vmul.f32 %v632_v53, %v3006_v23 }
  0xdb   : > { %v566_v41 = vsel %vm542_vm6, %v564_v60, %v565_v1  ;;  %v449_v47 = vrot.slane %v443_v56, 5  ;;  %v568_v12 = vsel %vm542_vm6, %v565_v1, %v567_v46  ;;  %v639_v42 = vrot.slane %v633_v18, 6 }
  0xdc   : > { %v593_v1 = vsel %vm542_vm6, %v590_v50, %v592_v59 }
  0xdf   : > { %522 = vrot.lane.b32.xlu2 %v517_v9, %s2874_s29  ;;  %406 = vrot.lane.b32.xlu1 %v403_v10, %s2873_s14  ;;  %v399_v10 = vrot.slane %v393_v58, 1 }
  0xe0   : > { %662 = vrot.lane.b32.xlu0 %v659_v11, %s2875_s20  ;;  %v642_v11 = vrot.slane %v635_v34, 6 }
  0xe1   : > { %v401_v38 = vsel %vm352_vm3, %v399_v10, %v400_v7  ;;  %v424_v7 = vrot.slane %v418_v49, 1  ;;  %v685_v10 = vrot.slane %v678_v3, 7 }
  0xe3   : > { %v426_v48 = vsel %vm352_vm3, %v424_v7, %v425_v15  ;;  %v634_v15 = vmul.f32 %v632_v53, %v3018_v27 }
  0xe5   : > { %v640_v60 = vrot.slane %v634_v15, 6 }
  0xe7   : > { %666 = vrot.lane.b32.xlu2 %v660_v17, %s2875_s20  ;;  %431 = vrot.lane.b32.xlu1 %v428_v20, %s2873_s14  ;;  %v3227_v20 = vstv %s2577_s23  ;;  %v641_v46 = vsel %vm493_vm4, %v639_v42, %v640_v60  ;;  %v702_v17 = vmul.f32 %v3154_v19, %v3018_v27  ;;  %s2597_s23 = sld [smem:[#allocation4 + $0xc]] }
  0xe8   : > { %687 = vrot.lane.b32.xlu0 %v682_v21, %s2875_s20  ;;  %v3235_v37 = vmul.f32 %v3227_v20, %v3018_v27  ;;  %v538_v16 = vmul.f32 %v3227_v20, %v3020_v28 }
  0xe9   : > { %v708_v63 = vrot.slane %v702_v17, 7 }
  0xea   : > { %v544_v25 = vrot.slane %v3235_v37, 2  ;;  %v546_v13 = vrot.slane %v538_v16, 2  ;;  %v747_v37 = vstv %s2586_s16  ;;  %s2599_s16 = sld [smem:[#allocation4 + $0x1a]] }
  0xeb   : > { %v709_v6 = vsel %vm658_vm7, %v707_v39, %v708_v63  ;;  %v749_v31 = vmul.f32 %v747_v37, %v3018_v27  ;;  %v748_v7 = vmul.f32 %v747_v37, %v3006_v23 }
  0xed   : > { %v754_v56 = vrot.slane %v748_v7, 3  ;;  %v896_v7 = vstv %s2593_s3  ;;  %s2878_s3 = smov 122  }
  0xef   : > { %456 = vrot.lane.b32.xlu1 %v453_v43, %s2873_s14  ;;  %334 = vrot.lane.b32.xlu2 %v331_v40, %s2873_s14  ;;  %v583_v40 = vmul.f32 %v3075_v52, %v3006_v23  ;;  %v536_v43 = vmul.f32 %v3227_v20, %v3006_v23  ;;  %v547_v20 = vsel %vm542_vm6, %v544_v25, %v546_v13 }
  0xf0   : > { %712 = vrot.lane.b32.xlu0 %v707_v39, %s2875_s20 }
  0xf1   : > { %v589_v4 = vrot.slane %v583_v40, 2  ;;  %v543_v36 = vrot.slane %v536_v43, 2 }
  0xf3   : > { %v591_v51 = vsel %vm542_vm6, %v589_v4, %v590_v50  ;;  %v545_v52 = vsel %vm542_vm6, %v543_v36, %v544_v25  ;;  %v750_v36 = vmul.f32 %v747_v37, %v3020_v28 }
  0xf7   : > { %526 = vrot.lane.b32.xlu1 %v521_v45, %s2874_s29  ;;  %360 = vrot.lane.b32.xlu2 %v357_v55, %s2873_s14  ;;  %v609_v45 = vmul.f32 %v3098_v62, %v3018_v27  ;;  %v608_v55 = vmul.f32 %v3098_v62, %v3006_v23  ;;  %v451_v62 = vsel %vm328_vm5, %v449_v47, %v450_v35 }
  0xf8   : > { %379 = vrot.lane.b32.xlu0 %v376_v57, %s2873_s14 }
  0xf9   : > { %v615_v30 = vrot.slane %v609_v45, 2  ;;  %v614_v57 = vrot.slane %v608_v55, 2  ;;  %v757_v55 = vrot.slane %v750_v36, 3 }
  0xfb   : > { %v616_v58 = vsel %vm542_vm6, %v614_v57, %v615_v30  ;;  %v618_v59 = vsel %vm542_vm6, %v615_v30, %v617_v2  ;;  %v643_v2 = vsel %vm493_vm4, %v640_v60, %v642_v11  ;;  %v772_v30 = vstv %s2587_s17  ;;  %s2600_s17 = sld [smem:[#allocation4 + $0x21]] }
  0xfc   : > { %v774_v47 = vmul.f32 %v772_v30, %v3018_v27 }
  0xfe   : > { %v780_v60 = vrot.slane %v774_v47, 3 }
  0xff   : > { %569 = vrot.lane.b32.xlu1 %v566_v41, %s2874_s29  ;;  %475 = vrot.lane.b32.xlu2 %v472_v24, %s2873_s14  ;;  %v725_v41 = vstv %s2585_s5  ;;  %s2877_s5 = smov 123  }
 0x100   : > { %404 = vrot.lane.b32.xlu0 %v401_v38, %s2873_s14  ;;  %v727_v24 = vmul.f32 %v725_v41, %v3018_v27  ;;  %v728_v44 = vmul.f32 %v725_v41, %v3020_v28  ;;  %v726_v29 = vmul.f32 %v725_v41, %v3006_v23  ;;  %v836_v41 = vstv %s2590_s24  ;;  %s2601_s24 = sld [smem:[#allocation4 + $0x28]] }
 0x102   : > { %v734_v40 = vrot.slane %v727_v24, 3  ;;  %v733_v49 = vrot.slane %v726_v29, 3  ;;  %v822_v24 = vstv %s2589_s25  ;;  %s3545_s25 = sld [smem:[#allocation4 + $0x6]] }
 0x104   : > { %v735_v4 = vsel %vm732_vm8, %v733_v49, %v734_v40  ;;  %v839_v49 = vmul.f32 %v836_v41, %v3020_v28 }
 0x107   : > { %594 = vrot.lane.b32.xlu1 %v591_v51, %s2874_s29  ;;  %548 = vrot.lane.b32.xlu2 %v545_v52, %s2874_s29 }
 0x108   : > { %429 = vrot.lane.b32.xlu0 %v426_v48, %s2873_s14  ;;  %v755_v48 = vrot.slane %v749_v31, 3  ;;  %v876_v31 = vstv %s2592_s27  ;;  %s2605_s27 = sld [smem:[#allocation4 + $0x14]] }
 0x10a   : > { %v756_v57 = vsel %vm732_vm8, %v754_v56, %v755_v48  ;;  %v758_v53 = vsel %vm732_vm8, %v755_v48, %v757_v55  ;;  %v897_v56 = vmul.f32 %v896_v7, %v3006_v23 }
 0x10f   : > { %619 = vrot.lane.b32.xlu1 %v616_v58, %s2874_s29  ;;  %571 = vrot.lane.b32.xlu2 %v568_v12, %s2874_s29  ;;  %v775_v58 = vmul.f32 %v772_v30, %v3020_v28  ;;  %v773_v12 = vmul.f32 %v772_v30, %v3006_v23 }
 0x110   : > { %454 = vrot.lane.b32.xlu0 %v451_v62, %s2873_s14 }
 0x111   : > { %v3279_v5 = vpop.permute.xlu2 %332  ;;  %v782_v42 = vrot.slane %v775_v58, 3  ;;  %v903_v58 = vrot.slane %v897_v56, 4 }
 0x117   : > { %644 = vrot.lane.b32.xlu1 %v641_v46, %s2874_s29  ;;  %596 = vrot.lane.b32.xlu2 %v593_v1, %s2874_s29  ;;  %v779_v46 = vrot.slane %v773_v12, 3  ;;  %v797_v1 = vstv %s2588_s19  ;;  %v879_v12 = vmul.f32 %v876_v31, %v3020_v28  ;;  %s2602_s19 = sld [smem:[#allocation4 + $0x2f]] }
 0x118   : > { %477 = vrot.lane.b32.xlu0 %v474_v22, %s2873_s14  ;;  %v800_v32 = vmul.f32 %v797_v1, %v3020_v28  ;;  %v798_v34 = vmul.f32 %v797_v1, %v3006_v23 }
 0x119   : > { %v3291_v35 = vpop.permute.xlu2 %383  ;;  %v781_v22 = vsel %vm732_vm8, %v779_v46, %v780_v60 }
 0x11a   : > { %v807_v17 = vrot.slane %v800_v32, 3  ;;  %v804_v3 = vrot.slane %v798_v34, 3 }
 0x11f   : > { %664 = vrot.lane.b32.xlu1 %v661_v54, %s2875_s20  ;;  %621 = vrot.lane.b32.xlu2 %v618_v59, %s2874_s29  ;;  %v799_v54 = vmul.f32 %v797_v1, %v3018_v27  ;;  %v783_v59 = vsel %vm732_vm8, %v780_v60, %v782_v42  ;;  %v878_v60 = vmul.f32 %v876_v31, %v3018_v27 }
 0x120   : > { %499 = vrot.lane.b32.xlu0 %v3091_v61, %s2874_s29  ;;  %v519_v61 = vsel %vm493_vm4, %v517_v9, %v518_v26  ;;  %v686_v9 = vsel %vm658_vm7, %v683_v8, %v685_v10  ;;  %v703_v26 = vmul.f32 %v3154_v19, %v3020_v28  ;;  %v736_v19 = vrot.slane %v728_v44, 3 }
 0x121   : > { %v3308_v14 = vpop.permute.xlu2 %408  ;;  %v824_v44 = vmul.f32 %v822_v24, %v3018_v27 }
 0x122   : > { %v710_v43 = vrot.slane %v703_v26, 7  ;;  %v737_v50 = vsel %vm732_vm8, %v734_v40, %v736_v19  ;;  %v856_v40 = vstv %s2591_s26  ;;  %s2604_s26 = sld [smem:[#allocation4 + $0xd]] }
 0x123   : > { %v857_v19 = vmul.f32 %v856_v40, %v3006_v23  ;;  %v858_v36 = vmul.f32 %v856_v40, %v3018_v27  ;;  %v859_v48 = vmul.f32 %v856_v40, %v3020_v28 }
 0x124   : > { %v711_v25 = vsel %vm658_vm7, %v708_v63, %v710_v43  ;;  %v838_v43 = vmul.f32 %v836_v41, %v3018_v27 }
 0x127   : > { %689 = vrot.lane.b32.xlu1 %v684_v0, %s2875_s20  ;;  %646 = vrot.lane.b32.xlu2 %v643_v2, %s2874_s29  ;;  %v805_v2 = vrot.slane %v799_v54, 3  ;;  %v899_v54 = vmul.f32 %v896_v7, %v3020_v28 }
 0x128   : > { %524 = vrot.lane.b32.xlu0 %v519_v61, %s2874_s29 }
 0x129   : > { %v3328_v21 = vpop.permute.xlu2 %433  ;;  %v806_v61 = vsel %vm732_vm8, %v804_v3, %v805_v2  ;;  %v808_v16 = vsel %vm732_vm8, %v805_v2, %v807_v17 }
 0x12a   : > { %4654 = vst [vmem:[#allocation13_spill] sm:$0xff] %v3328_v21 }
 0x12f   : > { %714 = vrot.lane.b32.xlu1 %v709_v6, %s2875_s20  ;;  %691 = vrot.lane.b32.xlu2 %v686_v9, %s2875_s20  ;;  %v837_v6 = vmul.f32 %v836_v41, %v3006_v23  ;;  %v823_v9 = vmul.f32 %v822_v24, %v3006_v23  ;;  %v942_v41 = vstv %s2595_s7  ;;  %s2607_s7 = sld [smem:[#allocation4 + $0x22]] }
 0x130   : > { %550 = vrot.lane.b32.xlu0 %v547_v20, %s2874_s29 }
 0x131   : > { %v3344_v33 = vpop.permute.xlu1 %479  ;;  %v3346_v39 = vpop.permute.xlu2 %497 }
 0x132   : > { %v3349_v38 = vpop.permute.xlu0 %336 }
 0x133   : > { %4655 = vst [vmem:[#allocation14_spill] sm:$0xff] %v3349_v38 }
 0x137   : > { %740 = vrot.lane.b32.xlu1 %v737_v50, %s2875_s20  ;;  %716 = vrot.lane.b32.xlu2 %v711_v25, %s2875_s20 }
 0x138   : > { %738 = vrot.lane.b32.xlu0 %v735_v4, %s2875_s20  ;;  %v877_v4 = vmul.f32 %v876_v31, %v3006_v23 }
 0x139   : > { %v3360_v51 = vpop.permute.xlu2 %522  ;;  %v3362_v52 = vpop.permute.xlu1 %501 }
 0x13a   : > { %4656 = vst [vmem:[#allocation15_spill] sm:$0xff] %v3360_v51  ;;  %v3364_v45 = vpop.permute.xlu0 %573 }
 0x13b   : > { %4657 = vst [vmem:[#allocation16_spill] sm:$0xff] %v3362_v52 }
 0x13c   : > { %4658 = vst [vmem:[#allocation17_spill] sm:$0xff] %v3364_v45 }
 0x13f   : > { %763 = vrot.lane.b32.xlu1 %v757_v55, %s2875_s20  ;;  %759 = vrot.lane.b32.xlu2 %v756_v57, %s2875_s20  ;;  %v898_v55 = vmul.f32 %v896_v7, %v3018_v27 }
 0x140   : > { %761 = vrot.lane.b32.xlu0 %v758_v53, %s2875_s20 }
 0x141   : > { %v3374_v15 = vpop.permute.xlu2 %666  ;;  %v3376_v62 = vpop.permute.xlu1 %358  ;;  %v904_v53 = vrot.slane %v898_v55, 4 }
 0x142   : > { %4659 = vst [vmem:[#allocation18_spill] sm:$0xff] %v3374_v15  ;;  %v3378_v18 = vpop.permute.xlu0 %598 }
 0x143   : > { %4660 = vst [vmem:[#allocation19_spill] sm:$0xff] %v3376_v62  ;;  %v905_v46 = vsel %vm274_vm9, %v903_v58, %v904_v53 }
 0x144   : > { %4661 = vst [vmem:[#allocation20_spill] sm:$0xff] %v3378_v18 }
 0x147   : > { %788 = vrot.lane.b32.xlu1 %v782_v42, %s2875_s20  ;;  %784 = vrot.lane.b32.xlu2 %v781_v22, %s2875_s20  ;;  %v917_v42 = vstv %s2594_s6  ;;  %s2606_s6 = sld [smem:[#allocation4 + $0x1b]] }
 0x148   : > { %786 = vrot.lane.b32.xlu0 %v783_v59, %s2875_s20  ;;  %v919_v1 = vmul.f32 %v917_v42, %v3018_v27  ;;  %v920_v22 = vmul.f32 %v917_v42, %v3020_v28  ;;  %v918_v34 = vmul.f32 %v917_v42, %v3006_v23 }
 0x149   : > { %v3388_v8 = vpop.permute.xlu1 %381  ;;  %v3390_v11 = vpop.permute.xlu2 %334 }
 0x14a   : > { %v3392_v0 = vpop.permute.xlu0 %623  ;;  %v927_v3 = vrot.slane %v920_v22, 4  ;;  %v988_v22 = vstv %s2597_s23  ;;  %s2609_s23 = sld [smem:[#allocation4 + $0x30]] }
 0x14b   : > { %4662 = vst [vmem:[#allocation21_spill] sm:$0xff] %v3392_v0 }
 0x14f   : > { %813 = vrot.lane.b32.xlu1 %v807_v17, %s2875_s20  ;;  %809 = vrot.lane.b32.xlu2 %v806_v61, %s2875_s20  ;;  %v925_v17 = vrot.slane %v919_v1, 4  ;;  %v906_v61 = vrot.slane %v899_v54, 4 }
 0x150   : > { %811 = vrot.lane.b32.xlu0 %v808_v16, %s2875_s20  ;;  %v924_v16 = vrot.slane %v918_v34, 4  ;;  %v990_v34 = vmul.f32 %v988_v22, %v3018_v27 }
 0x151   : > { %v3399_v63 = vpop.permute.xlu1 %406  ;;  %v3401_v10 = vpop.permute.xlu2 %360  ;;  %v928_v24 = vsel %vm274_vm9, %v925_v17, %v927_v3 }
 0x152   : > { %v3403_v13 = vpop.permute.xlu0 %662  ;;  %v926_v40 = vsel %vm274_vm9, %v924_v16, %v925_v17  ;;  %v991_v17 = vmul.f32 %v988_v22, %v3020_v28  ;;  %v989_v16 = vmul.f32 %v988_v22, %v3006_v23  ;;  %v1034_v22 = vstv %s2599_s16  ;;  %s2617_s16 = sld [smem:[#allocation4 + $0x32]] }
 0x153   : > { %4663 = vst [vmem:[#allocation22_spill] sm:$0xff] %v3403_v13 }
 0x157   : > { %843 = vrot.lane.b32.xlu1 %v837_v6, %s2876_s30  ;;  %827 = vrot.lane.b32.xlu2 %v823_v9, %s2876_s30  ;;  %v907_v6 = vsel %vm274_vm9, %v904_v53, %v906_v61  ;;  %v944_v9 = vmul.f32 %v942_v41, %v3018_v27 }
 0x158   : > { %829 = vrot.lane.b32.xlu0 %v824_v44, %s2876_s30  ;;  %v945_v44 = vmul.f32 %v942_v41, %v3020_v28 }
 0x159   : > { %v3411_v26 = vpop.permute.xlu1 %431  ;;  %v3413_v20 = vpop.permute.xlu2 %475 }
 0x15a   : > { %4664 = vst [vmem:[#allocation23_spill] sm:$0xff] %v3413_v20  ;;  %v3415_v29 = vpop.permute.xlu0 %687 }
 0x15b   : > { %4665 = vst [vmem:[#allocation24_spill] sm:$0xff] %v3415_v29 }
 0x15f   : > { %863 = vrot.lane.b32.xlu1 %v857_v19, %s2876_s30  ;;  %845 = vrot.lane.b32.xlu2 %v838_v43, %s2876_s30 }
 0x160   : > { %847 = vrot.lane.b32.xlu0 %v839_v49, %s2876_s30  ;;  %v943_v49 = vmul.f32 %v942_v41, %v3006_v23 }
 0x161   : > { %v3423_v37 = vpop.permute.xlu1 %456  ;;  %v3425_v50 = vpop.permute.xlu2 %548 }
 0x162   : > { %4666 = vst [vmem:[#allocation25_spill] sm:$0xff] %v3425_v50  ;;  %v3427_v25 = vpop.permute.xlu0 %712  ;;  %v949_v7 = vrot.slane %v943_v49, 4 }
 0x163   : > { %4667 = vst [vmem:[#allocation26_spill] sm:$0xff] %v3427_v25  ;;  %v1197_v25 = vstv %s2606_s6  ;;  %s2563_s6 = sld [smem:[#allocation4 + $0xe]] }
 0x167   : > { %883 = vrot.lane.b32.xlu1 %v877_v4, %s2876_s30  ;;  %865 = vrot.lane.b32.xlu2 %v858_v36, %s2876_s30  ;;  %v950_v4 = vrot.slane %v944_v9, 4  ;;  %v952_v36 = vrot.slane %v945_v44, 4  ;;  %v995_v9 = vrot.slane %v989_v16, 1  ;;  %v1009_v44 = vstv %s2598_s28  ;;  %s2618_s28 = sld [smem:[#allocation4 + $0x39]] }
 0x168   : > { %867 = vrot.lane.b32.xlu0 %v859_v48, %s2876_s30  ;;  %v967_v48 = vstv %s2596_s8  ;;  %v1011_v49 = vmul.f32 %v1009_v44, %v3018_v27  ;;  %v1035_v16 = vmul.f32 %v1034_v22, %v3006_v23  ;;  %s2608_s8 = sld [smem:[#allocation4 + $0x29]] }
 0x169   : > { %v3437_v30 = vpop.permute.xlu1 %526  ;;  %v3439_v57 = vpop.permute.xlu2 %571  ;;  %v953_v55 = vsel %vm274_vm9, %v950_v4, %v952_v36  ;;  %v969_v56 = vmul.f32 %v967_v48, %v3018_v27  ;;  %v951_v53 = vsel %vm274_vm9, %v949_v7, %v950_v4  ;;  %v968_v58 = vmul.f32 %v967_v48, %v3006_v23 }
 0x16a   : > { %4668 = vst [vmem:[#allocation27_spill] sm:$0xff] %v3437_v30  ;;  %v3441_v47 = vpop.permute.xlu0 %379  ;;  %v1010_v7 = vmul.f32 %v1009_v44, %v3006_v23 }
 0x16b   : > { %4669 = vst [vmem:[#allocation28_spill] sm:$0xff] %v3441_v47  ;;  %v972_v1 = vrot.slane %v968_v58, 5  ;;  %v1222_v47 = vstv %s2607_s7  ;;  %s2622_s7 = sld [smem:[#allocation4 + $0x55]] }
 0x16f   : > { %908 = vrot.lane.b32.xlu1 %v905_v46, %s2876_s30  ;;  %885 = vrot.lane.b32.xlu2 %v878_v60, %s2876_s30  ;;  %v973_v46 = vrot.slane %v969_v56, 5 }
 0x170   : > { %887 = vrot.lane.b32.xlu0 %v879_v12, %s2876_s30 }
 0x171   : > { %v3452_v59 = vpop.permute.xlu1 %569  ;;  %v3454_v32 = vpop.permute.xlu2 %596  ;;  %v974_v54 = vsel %vm328_vm5, %v972_v1, %v973_v46 }
 0x172   : > { %4670 = vst [vmem:[#allocation29_spill] sm:$0xff] %v3452_v59  ;;  %v3457_v2 = vpop.permute.xlu0 %404 }
 0x177   : > { %931 = vrot.lane.b32.xlu1 %v928_v24, %s2876_s30  ;;  %910 = vrot.lane.b32.xlu2 %v907_v6, %s2876_s30  ;;  %v996_v24 = vrot.slane %v990_v34, 1  ;;  %v998_v6 = vrot.slane %v991_v17, 1  ;;  %v1037_v17 = vmul.f32 %v1034_v22, %v3020_v28 }
 0x178   : > { %929 = vrot.lane.b32.xlu0 %v926_v40, %s2876_s30 }
 0x179   : > { %v3467_v19 = vpop.permute.xlu1 %594  ;;  %v3469_v43 = vpop.permute.xlu2 %621  ;;  %v999_v40 = vsel %vm352_vm3, %v996_v24, %v998_v6  ;;  %v997_v4 = vsel %vm352_vm3, %v995_v9, %v996_v24 }
 0x17a   : > { %v3472_v31 = vpop.permute.xlu0 %429 }
 0x17b   : > { %4671 = vst [vmem:[#allocation30_spill] sm:$0xff] %v3472_v31 }
 0x17f   : > { %956 = vrot.lane.b32.xlu1 %v953_v55, %s2876_s30  ;;  %933 = vrot.lane.b32.xlu2 %v927_v3, %s2876_s30 }
 0x180   : > { %954 = vrot.lane.b32.xlu0 %v951_v53, %s2876_s30  ;;  %v1017_v53 = vrot.slane %v1011_v49, 1  ;;  %v1041_v49 = vrot.slane %v1035_v16, 1 }
 0x181   : > { %v3481_v12 = vpop.permute.xlu1 %619  ;;  %v3483_v60 = vpop.permute.xlu2 %646 }
 0x182   : > { %4672 = vst [vmem:[#allocation31_spill] sm:$0xff] %v3481_v12  ;;  %v3485_v42 = vpop.permute.xlu0 %454  ;;  %v1247_v12 = vstv %s2608_s8  ;;  %s2565_s8 = sld [smem:[#allocation4 + $0x1c]] }
 0x183   : > { %4673 = vst [vmem:[#allocation32_spill] sm:$0xff] %v3483_v60 }
 0x184   : > { %4674 = vst [vmem:[#allocation33_spill] sm:$0xff] %v3485_v42  ;;  %v1199_v42 = vmul.f32 %v1197_v25, %v3018_v27 }
 0x187   : > { %977 = vrot.lane.b32.xlu1 %v974_v54, %s2877_s5  ;;  %958 = vrot.lane.b32.xlu2 %v952_v36, %s2876_s30  ;;  %v1012_v36 = vmul.f32 %v1009_v44, %v3020_v28 }
 0x188   : > { %975 = vrot.lane.b32.xlu0 %v972_v1, %s2877_s5  ;;  %v1016_v1 = vrot.slane %v1010_v7, 1 }
 0x189   : > { %v3493_v3 = vpop.permute.xlu1 %644  ;;  %v3495_v61 = vpop.permute.xlu2 %691  ;;  %v1019_v58 = vrot.slane %v1012_v36, 1 }
 0x18a   : > { %4675 = vst [vmem:[#allocation34_spill] sm:$0xff] %v3493_v3  ;;  %v3498_v41 = vpop.permute.xlu0 %477  ;;  %v1018_v54 = vsel %vm352_vm3, %v1016_v1, %v1017_v53 }
 0x18b   : > { %4676 = vst [vmem:[#allocation35_spill] sm:$0xff] %v3495_v61  ;;  %v1020_v34 = vsel %vm352_vm3, %v1017_v53, %v1019_v58 }
 0x18f   : > { %1002 = vrot.lane.b32.xlu1 %v999_v40, %s2877_s5  ;;  %979 = vrot.lane.b32.xlu2 %v973_v46, %s2877_s5  ;;  %v1036_v46 = vmul.f32 %v1034_v22, %v3018_v27  ;;  %v1044_v40 = vrot.slane %v1037_v17, 1 }
 0x190   : > { %1000 = vrot.lane.b32.xlu0 %v997_v4, %s2877_s5  ;;  %v1059_v4 = vstv %s2600_s17  ;;  %s2566_s17 = sld [smem:[#allocation4 + $0x23]] }
 0x191   : > { %v3508_v48 = vpop.permute.xlu1 %664  ;;  %v3510_v55 = vpop.permute.xlu2 %716  ;;  %v1042_v44 = vrot.slane %v1036_v46, 1  ;;  %v1061_v7 = vmul.f32 %v1059_v4, %v3018_v27  ;;  %v1060_v1 = vmul.f32 %v1059_v4, %v3006_v23 }
 0x192   : > { %4677 = vst [vmem:[#allocation36_spill] sm:$0xff] %v3510_v55  ;;  %v3512_v56 = vpop.permute.xlu0 %499 }
 0x193   : > { %v1043_v36 = vsel %vm352_vm3, %v1041_v49, %v1042_v44  ;;  %v1045_v53 = vsel %vm352_vm3, %v1042_v44, %v1044_v40  ;;  %v1066_v16 = vrot.slane %v1060_v1, 1  ;;  %v1105_v49 = vstv %s2602_s19  ;;  %s2619_s19 = sld [smem:[#allocation4 + $0x40]] }
 0x194   : > { %v1108_v20 = vmul.f32 %v1105_v49, %v3020_v28 }
 0x197   : > { %1025 = vrot.lane.b32.xlu1 %v1019_v58, %s2877_s5  ;;  %1021 = vrot.lane.b32.xlu2 %v1018_v54, %s2877_s5  ;;  %v1062_v58 = vmul.f32 %v1059_v4, %v3020_v28 }
 0x198   : > { %1023 = vrot.lane.b32.xlu0 %v1020_v34, %s2877_s5  ;;  %v1067_v34 = vrot.slane %v1061_v7, 1 }
 0x199   : > { %v3522_v24 = vpop.permute.xlu1 %689  ;;  %v3524_v6 = vpop.permute.xlu2 %759  ;;  %v1069_v17 = vrot.slane %v1062_v58, 1 }
 0x19a   : > { %4678 = vst [vmem:[#allocation37_spill] sm:$0xff] %v3524_v6  ;;  %v3526_v9 = vpop.permute.xlu0 %524  ;;  %v1084_v6 = vstv %s2601_s24  ;;  %v1068_v44 = vsel %vm352_vm3, %v1066_v16, %v1067_v34  ;;  %s2567_s24 = sld [smem:[#allocation4 + $0x2a]] }
 0x19b   : > { %v1070_v4 = vsel %vm352_vm3, %v1067_v34, %v1069_v17  ;;  %v1087_v7 = vmul.f32 %v1084_v6, %v3020_v28  ;;  %v1085_v58 = vmul.f32 %v1084_v6, %v3006_v23 }
 0x19d   : > { %v1094_v34 = vrot.slane %v1087_v7, 5  ;;  %v1091_v3 = vrot.slane %v1085_v58, 5 }
 0x19f   : > { %1050 = vrot.lane.b32.xlu1 %v1044_v40, %s2877_s5  ;;  %1046 = vrot.lane.b32.xlu2 %v1043_v36, %s2877_s5  ;;  %v1107_v40 = vmul.f32 %v1105_v49, %v3018_v27  ;;  %v1086_v36 = vmul.f32 %v1084_v6, %v3018_v27 }
 0x1a0   : > { %1048 = vrot.lane.b32.xlu0 %v1045_v53, %s2877_s5  ;;  %v1106_v53 = vmul.f32 %v1105_v49, %v3006_v23 }
 0x1a1   : > { %v3536_v22 = vpop.permute.xlu1 %714  ;;  %v3538_v54 = vpop.permute.xlu2 %784  ;;  %v1113_v55 = vrot.slane %v1107_v40, 5  ;;  %v1092_v59 = vrot.slane %v1086_v36, 5 }
 0x1a2   : > { %4679 = vst [vmem:[#allocation38_spill] sm:$0xff] %v3538_v54  ;;  %v3540_v46 = vpop.permute.xlu0 %550 }
 0x1a3   : > { %v1093_v0 = vsel %vm328_vm5, %v1091_v3, %v1092_v59  ;;  %v1095_v6 = vsel %vm328_vm5, %v1092_v59, %v1094_v34  ;;  %v1115_v3 = vrot.slane %v1108_v20, 5 }
 0x1a5   : > { %v1116_v49 = vsel %vm328_vm5, %v1113_v55, %v1115_v3 }
 0x1a7   : > { %1075 = vrot.lane.b32.xlu1 %v1069_v17, %s2877_s5  ;;  %1071 = vrot.lane.b32.xlu2 %v1068_v44, %s2877_s5  ;;  %v1112_v17 = vrot.slane %v1106_v53, 5 }
 0x1a8   : > { %1073 = vrot.lane.b32.xlu0 %v1070_v4, %s2877_s5  ;;  %v1130_v4 = vstv %s3545_s25  ;;  %s2562_s25 = sld [smem:[#allocation4 + $0x7]] }
 0x1a9   : > { %v3554_v1 = vpop.permute.xlu1 %740  ;;  %v3556_v16 = vpop.permute.xlu2 %809  ;;  %v1114_v44 = vsel %vm328_vm5, %v1112_v17, %v1113_v55  ;;  %v1131_v7 = vmul.f32 %v1130_v4, %v3006_v23  ;;  %v1151_v17 = vstv %s2604_s26  ;;  %v1132_v59 = vmul.f32 %v1130_v4, %v3018_v27  ;;  %s2620_s26 = sld [smem:[#allocation4 + $0x47]] }
 0x1aa   : > { %4680 = vst [vmem:[#allocation39_spill] sm:$0xff] %v3554_v1  ;;  %v3558_v13 = vpop.permute.xlu0 %738  ;;  %v1152_v20 = vmul.f32 %v1151_v17, %v3006_v23 }
 0x1ab   : > { %4681 = vst [vmem:[#allocation40_spill] sm:$0xff] %v3556_v16  ;;  %v1135_v58 = vrot.slane %v1131_v7, 6  ;;  %v1176_v7 = vstv %s2605_s27  ;;  %s2621_s27 = sld [smem:[#allocation4 + $0x4e]] }
 0x1ac   : > { %4682 = vst [vmem:[#allocation41_spill] sm:$0xff] %v3558_v13  ;;  %v1158_v55 = vrot.slane %v1152_v20, 6  ;;  %v1177_v13 = vmul.f32 %v1176_v7, %v3006_v23 }
 0x1ae   : > { %v1183_v61 = vrot.slane %v1177_v13, 2  ;;  %v3729_v18 = vstv %s2562_s25  ;;  %s3969_s25 = sld [smem:[#allocation4 + $0x4f]] }
 0x1af   : > { %1117 = vrot.lane.b32.xlu1 %v1114_v44, %s2877_s5  ;;  %1096 = vrot.lane.b32.xlu2 %v1093_v0, %s2877_s5 }
 0x1b0   : > { %1098 = vrot.lane.b32.xlu0 %v1095_v6, %s2877_s5  ;;  %v1136_v6 = vrot.slane %v1132_v59, 6 }
 0x1b1   : > { %v3568_v40 = vpop.permute.xlu1 %763  ;;  %v3570_v36 = vpop.permute.xlu2 %827  ;;  %v1494_v62 = vstv %s2621_s27  ;;  %s2629_s27 = sld [smem:[#allocation4 + $0x56]] }
 0x1b2   : > { %4683 = vst [vmem:[#allocation42_spill] sm:$0xff] %v3568_v40  ;;  %v3573_v53 = vpop.permute.xlu0 %761  ;;  %v1137_v4 = vsel %vm493_vm4, %v1135_v58, %v1136_v6 }
 0x1b3   : > { %4684 = vst [vmem:[#allocation43_spill] sm:$0xff] %v3570_v36  ;;  %v1178_v36 = vmul.f32 %v1176_v7, %v3018_v27 }
 0x1b7   : > { %1138 = vrot.lane.b32.xlu1 %v1135_v58, %s2878_s3  ;;  %1119 = vrot.lane.b32.xlu2 %v1116_v49, %s2877_s5  ;;  %v1153_v49 = vmul.f32 %v1151_v17, %v3018_v27  ;;  %v1184_v58 = vrot.slane %v1178_v36, 2 }
 0x1b8   : > { %1121 = vrot.lane.b32.xlu0 %v1115_v3, %s2877_s5  ;;  %v1154_v3 = vmul.f32 %v1151_v17, %v3020_v28 }
 0x1b9   : > { %v3580_v0 = vpop.permute.xlu1 %788  ;;  %v3582_v34 = vpop.permute.xlu2 %845  ;;  %v1185_v28 = vsel %vm542_vm6, %v1183_v61, %v1184_v58  ;;  %v3616_v61 = vld [vmem:[#allocation2] sm:$0xff] }
 0x1ba   : > { %4685 = vst [vmem:[#allocation44_spill] sm:$0xff] %v3580_v0  ;;  %v3585_v44 = vpop.permute.xlu0 %786  ;;  %v1159_v0 = vrot.slane %v1153_v49, 6  ;;  %v1161_v16 = vrot.slane %v1154_v3, 6  ;;  %v1205_v3 = vrot.slane %v1199_v42, 2 }
 0x1bc   : > { %v1160_v17 = vsel %vm493_vm4, %v1158_v55, %v1159_v0  ;;  %v1162_v36 = vsel %vm493_vm4, %v1159_v0, %v1161_v16 }
 0x1bf   : > { %1163 = vrot.lane.b32.xlu1 %v1158_v55, %s2878_s3  ;;  %1140 = vrot.lane.b32.xlu2 %v1137_v4, %s2878_s3  ;;  %v1198_v55 = vmul.f32 %v3616_v61, %v1197_v25 }
 0x1c0   : > { %1142 = vrot.lane.b32.xlu0 %v1136_v6, %s2878_s3  ;;  %v3604_v6 = vld [vmem:[#allocation2 + $0x10] sm:$0x3f] }
 0x1c1   : > { %v3595_v59 = vpop.permute.xlu1 %813  ;;  %v3597_v20 = vpop.permute.xlu2 %865  ;;  %v1200_v23 = vmul.f32 %v3604_v6, %v1197_v25  ;;  %v1179_v4 = vmul.f32 %v3604_v6, %v1176_v7 }
 0x1c2   : > { %4686 = vst [vmem:[#allocation45_spill] sm:$0xff] %v3595_v59  ;;  %v3599_v50 = vpop.permute.xlu0 %811 }
 0x1c3   : > { %v1207_v7 = vrot.slane %v1200_v23, 2  ;;  %v1186_v59 = vrot.slane %v1179_v4, 2 }
 0x1c5   : > { %v1208_v16 = vsel %vm542_vm6, %v1205_v3, %v1207_v7  ;;  %v1187_v0 = vsel %vm542_vm6, %v1184_v58, %v1186_v59  ;;  %v1223_v59 = vmul.f32 %v3616_v61, %v1222_v47 }
 0x1c7   : > { %1188 = vrot.lane.b32.xlu1 %v1185_v28, %s2878_s3  ;;  %1165 = vrot.lane.b32.xlu2 %v1160_v17, %s2878_s3  ;;  %v1204_v28 = vrot.slane %v1198_v55, 2  ;;  %v3623_v17 = vld [vmem:[#allocation2 + $0x8] sm:$0xff]  ;;  %v1229_v30 = vrot.slane %v1223_v59, 2 }
 0x1c8   : > { %1167 = vrot.lane.b32.xlu0 %v1162_v36, %s2878_s3  ;;  %v1224_v36 = vmul.f32 %v3623_v17, %v1222_v47 }
 0x1c9   : > { %v3612_v27 = vpop.permute.xlu1 %843  ;;  %v3614_v13 = vpop.permute.xlu2 %885  ;;  %v1206_v25 = vsel %vm542_vm6, %v1204_v28, %v1205_v3  ;;  %v1249_v3 = vmul.f32 %v3623_v17, %v1247_v12  ;;  %v1250_v28 = vmul.f32 %v3604_v6, %v1247_v12 }
 0x1ca   : > { %4687 = vst [vmem:[#allocation46_spill] sm:$0xff] %v3612_v27  ;;  %v3619_v49 = vpop.permute.xlu0 %829  ;;  %v1225_v27 = vmul.f32 %v3604_v6, %v1222_v47  ;;  %v1230_v4 = vrot.slane %v1224_v36, 2  ;;  %v1248_v36 = vmul.f32 %v3616_v61, %v1247_v12 }
 0x1cb   : > { %4688 = vst [vmem:[#allocation47_spill] sm:$0xff] %v3619_v49  ;;  %v1255_v59 = vrot.slane %v1249_v3, 2  ;;  %v245_v49 = vmul.f32 %v3623_v17, %v3729_v18 }
 0x1cc   : > { %v1232_v55 = vrot.slane %v1225_v27, 2 }
 0x1cf   : > { %1211 = vrot.lane.b32.xlu1 %v1208_v16, %s2878_s3  ;;  %1190 = vrot.lane.b32.xlu2 %v1187_v0, %s2878_s3  ;;  %v1233_v16 = vsel %vm542_vm6, %v1230_v4, %v1232_v55  ;;  %v1231_v0 = vsel %vm542_vm6, %v1229_v30, %v1230_v4 }
 0x1d0   : > { %1209 = vrot.lane.b32.xlu0 %v1206_v25, %s2878_s3 }
 0x1d1   : > { %v3631_v42 = vpop.permute.xlu1 %863  ;;  %v3633_v23 = vpop.permute.xlu2 %910 }
 0x1d2   : > { %4689 = vst [vmem:[#allocation48_spill] sm:$0xff] %v3631_v42  ;;  %v3636_v58 = vpop.permute.xlu0 %847  ;;  %v1272_v42 = vstv %s2609_s23  ;;  %s3751_s23 = sld [smem:[#allocation4 + $0x15]] }
 0x1d3   : > { %4690 = vst [vmem:[#allocation49_spill] sm:$0xff] %v3633_v23  ;;  %v1254_v23 = vrot.slane %v1248_v36, 2  ;;  %v1274_v30 = vmul.f32 %v3623_v17, %v1272_v42 }
 0x1d4   : > { %4691 = vst [vmem:[#allocation50_spill] sm:$0xff] %v3636_v58  ;;  %v1257_v58 = vrot.slane %v1250_v28, 2  ;;  %v1273_v28 = vmul.f32 %v3616_v61, %v1272_v42 }
 0x1d5   : > { %v1256_v4 = vsel %vm542_vm6, %v1254_v23, %v1255_v59  ;;  %v1280_v36 = vrot.slane %v1274_v30, 6 }
 0x1d7   : > { %1236 = vrot.lane.b32.xlu1 %v1233_v16, %s2878_s3  ;;  %1213 = vrot.lane.b32.xlu2 %v1207_v7, %s2878_s3  ;;  %v1258_v16 = vsel %vm542_vm6, %v1255_v59, %v1257_v58  ;;  %v1275_v7 = vmul.f32 %v3604_v6, %v1272_v42  ;;  %v3675_v59 = vld [vmem:[#allocation3] sm:$0xff] }
 0x1d8   : > { %1234 = vrot.lane.b32.xlu0 %v1231_v0, %s2878_s3  ;;  %v1495_v29 = vmul.f32 %v1494_v62, %v3675_v59 }
 0x1d9   : > { %v3645_v47 = vpop.permute.xlu1 %883  ;;  %v3647_v27 = vpop.permute.xlu2 %933 }
 0x1da   : > { %4692 = vst [vmem:[#allocation51_spill] sm:$0xff] %v3645_v47  ;;  %v3650_v25 = vpop.permute.xlu0 %867  ;;  %v1279_v47 = vrot.slane %v1273_v28, 6 }
 0x1db   : > { %4693 = vst [vmem:[#allocation52_spill] sm:$0xff] %v3647_v27  ;;  %v3712_v27 = vstv %s2567_s24  ;;  %s3887_s24 = sld [smem:[#allocation4 + $0x41]] }
 0x1dc   : > { %4694 = vst [vmem:[#allocation53_spill] sm:$0xff] %v3650_v25  ;;  %v1282_v25 = vrot.slane %v1275_v7, 6  ;;  %v1281_v23 = vsel %vm493_vm4, %v1279_v47, %v1280_v36  ;;  %v1434_v7 = vstv %s2618_s28  ;;  %s2623_s28 = sld [smem:[#allocation4 + $0x5c]] }
 0x1dd   : > { %v1435_v47 = vmul.f32 %v1434_v7, %v3675_v59 }
 0x1df   : > { %1261 = vrot.lane.b32.xlu1 %v1258_v16, %s2878_s3  ;;  %1238 = vrot.lane.b32.xlu2 %v1232_v55, %s2878_s3  ;;  %v1283_v16 = vsel %vm493_vm4, %v1280_v36, %v1282_v25  ;;  %v3679_v25 = vld [vmem:[#allocation3 + $0x8] sm:$0xff] }
 0x1e0   : > { %1259 = vrot.lane.b32.xlu0 %v1256_v4, %s2878_s3  ;;  %v1420_v4 = vstv %s2617_s16  ;;  %v3745_v52 = vmul.f32 %v1494_v62, %v3679_v25  ;;  %s3770_s16 = sld [smem:[#allocation4]] }
 0x1e1   : > { %v3659_v12 = vpop.permute.xlu1 %908  ;;  %v3661_v3 = vpop.permute.xlu2 %958  ;;  %v1422_v28 = vmul.f32 %v1420_v4, %v3679_v25 }
 0x1e2   : > { %4695 = vst [vmem:[#allocation54_spill] sm:$0xff] %v3659_v12  ;;  %v3664_v0 = vpop.permute.xlu0 %887  ;;  %v1540_v60 = vstv %s2623_s28  ;;  %s2612_s28 = sld [smem:[#allocation4 + $0x3f]] }
 0x1e3   : > { %4696 = vst [vmem:[#allocation55_spill] sm:$0xff] %v3661_v3 }
 0x1e4   : > { %4697 = vst [vmem:[#allocation56_spill] sm:$0xff] %v3664_v0 }
 0x1e7   : > { %1286 = vrot.lane.b32.xlu1 %v1283_v16, %s2878_s3  ;;  %1263 = vrot.lane.b32.xlu2 %v1257_v58, %s2878_s3  ;;  %v1421_v58 = vmul.f32 %v1420_v4, %v3675_v59 }
 0x1e8   : > { %1284 = vrot.lane.b32.xlu0 %v1281_v23, %s2878_s3  ;;  %v3691_v23 = vstv %s2566_s17  ;;  %s3801_s17 = sld [smem:[#allocation4 + $0x33]] }
 0x1e9   : > { %v3671_v55 = vpop.permute.xlu1 %931  ;;  %v3673_v42 = vpop.permute.xlu2 %979  ;;  %v3697_v4 = vmul.f32 %v3604_v6, %v3691_v23 }
 0x1ea   : > { %4698 = vst [vmem:[#allocation57_spill] sm:$0xff] %v3673_v42  ;;  %v3677_v30 = vpop.permute.xlu0 %929  ;;  %v1454_v42 = vstv %s2619_s19  ;;  %s3841_s19 = sld [smem:[#allocation4 + $0x3a]] }
 0x1eb   : > { %4699 = vst [vmem:[#allocation58_spill] sm:$0xff] %v3677_v30  ;;  %v1456_v51 = vmul.f32 %v1454_v42, %v3679_v25 }
 0x1ef   : > { %1441 = vrot.lane.b32.xlu1 %v1435_v47, %s2873_s14  ;;  %1425 = vrot.lane.b32.xlu2 %v1421_v58, %s2873_s14  ;;  %v3701_v47 = vmul.f32 %v3623_v17, %v3691_v23  ;;  %v3703_v58 = vld [vmem:[#allocation3 + $0x10] sm:$0x3f] }
 0x1f0   : > { %1427 = vrot.lane.b32.xlu0 %v1422_v28, %s2873_s14  ;;  %v1455_v28 = vmul.f32 %v1454_v42, %v3675_v59  ;;  %v1437_v0 = vmul.f32 %v1434_v7, %v3703_v58  ;;  %v1457_v1 = vmul.f32 %v1454_v42, %v3703_v58 }
 0x1f1   : > { %v3687_v36 = vpop.permute.xlu1 %956  ;;  %v3689_v16 = vpop.permute.xlu2 %1021  ;;  %v4706_v40 = vrot.slane %v3701_v47, 4 }
 0x1f2   : > { %4700 = vst [vmem:[#allocation59_spill] sm:$0xff] %v3689_v16  ;;  %v3693_v30 = vpop.permute.xlu0 %954  ;;  %v1436_v16 = vmul.f32 %v1434_v7, %v3679_v25  ;;  %v3721_v7 = vmul.f32 %v3623_v17, %v3712_v27 }
 0x1f3   : > { %4701 = vst [vmem:[#allocation60_spill] sm:$0xff] %v3693_v30  ;;  %v3717_v30 = vmul.f32 %v3604_v6, %v3712_v27 }
 0x1f5   : > { %v4645_v54 = vrot.slane %v3717_v30, 4 }
 0x1f7   : > { %1461 = vrot.lane.b32.xlu1 %v1455_v28, %s2873_s14  ;;  %1443 = vrot.lane.b32.xlu2 %v1436_v16, %s2873_s14  ;;  %v1474_v16 = vstv %s2620_s26  ;;  %s2630_s26 = sld [smem:[#allocation4 + $0x5d]] }
 0x1f8   : > { %1445 = vrot.lane.b32.xlu0 %v1437_v0, %s2873_s14  ;;  %v4705_v0 = vrot.slane %v3697_v4, 4 }
 0x1f9   : > { %v3723_v12 = vpop.permute.xlu1 %977  ;;  %v3725_v3 = vpop.permute.xlu2 %1046 }
 0x1fa   : > { %4702 = vst [vmem:[#allocation61_spill] sm:$0xff] %v3723_v12  ;;  %v3727_v28 = vpop.permute.xlu0 %975  ;;  %v296_v21 = vsel %vm274_vm9, %v4706_v40, %v4705_v0  ;;  %v3753_v0 = vstv %s2563_s6  ;;  %s4003_s6 = sld [smem:[#allocation4 + $0x31]] }
 0x1fb   : > { %4703 = vst [vmem:[#allocation62_spill] sm:$0xff] %v3725_v3  ;;  %v4646_v3 = vrot.slane %v3721_v7, 4  ;;  %v301_v15 = vadd.f32 %v296_v21, %v245_v49  ;;  %v253_v45 = vmul.f32 %v3623_v17, %v3753_v0 }
 0x1fc   : > { %4704 = vst [vmem:[#allocation63_spill] sm:$0xff] %v3727_v28  ;;  %v1475_v28 = vmul.f32 %v1474_v16, %v3675_v59 }
 0x1fd   : > { %v389_v40 = vadd.f32 %v3388_v8, %v301_v15  ;;  %v315_v21 = vsel %vm274_vm9, %v4646_v3, %v4645_v54  ;;  %v1501_v15 = vrot.slane %v1495_v29, 4  ;;  %v1502_v8 = vrot.slane %v3745_v52, 4 }
 0x1fe   : > { %v320_v38 = vadd.f32 %v315_v21, %v253_v45  ;;  %v1476_v54 = vmul.f32 %v1474_v16, %v3679_v25 }
 0x1ff   : > { %1481 = vrot.lane.b32.xlu1 %v1475_v28, %s2873_s14  ;;  %1463 = vrot.lane.b32.xlu2 %v1456_v51, %s2873_s14  ;;  %v485_v51 = vadd.f32 %v3498_v41, %v389_v40  ;;  %v1503_v52 = vsel %vm274_vm9, %v1501_v15, %v1502_v8  ;;  %v1477_v40 = vmul.f32 %v1474_v16, %v3703_v58 }
 0x200   : > { %1465 = vrot.lane.b32.xlu0 %v1457_v1, %s2873_s14  ;;  %v1515_v1 = vstv %s2622_s7  ;;  %s4022_s7 = sld [smem:[#allocation4 + $0x4d]] }
 0x201   : > { %v3760_v49 = vpop.permute.xlu1 %1002  ;;  %v3762_v42 = vpop.permute.xlu2 %1071  ;;  %v1517_v3 = vmul.f32 %v1515_v1, %v3679_v25  ;;  %v3775_v41 = vmul.f32 %v1515_v1, %v3703_v58  ;;  %v579_v29 = vadd.f32 %v3439_v57, %v485_v51  ;;  %v1516_v45 = vmul.f32 %v1515_v1, %v3675_v59 }
 0x202   : > { %4707 = vst [vmem:[#allocation64_spill] sm:$0xff] %v3760_v49  ;;  %v3765_v28 = vpop.permute.xlu0 %1000  ;;  %v414_v49 = vadd.f32 %v3399_v63, %v320_v38  ;;  %v237_v1 = vstv %s3770_s16  ;;  %s4059_s16 = sld [smem:[#allocation4 + $0x54]] }
 0x203   : > { %4708 = vst [vmem:[#allocation65_spill] sm:$0xff] %v3762_v42  ;;  %v267_v42 = vstv %s2565_s8  ;;  %v672_v51 = vadd.f32 %v3508_v48, %v579_v29  ;;  %v246_v48 = vmul.f32 %v3604_v6, %v3729_v18  ;;  %s4025_s8 = sld [smem:[#allocation4 + $0x38]] }
 0x204   : > { %4709 = vst [vmem:[#allocation66_spill] sm:$0xff] %v3765_v28  ;;  %v1497_v28 = vmul.f32 %v1494_v62, %v3703_v58  ;;  %v3785_v21 = vmul.f32 %v3623_v17, %v267_v42  ;;  %v270_v57 = vmul.f32 %v3604_v6, %v267_v42  ;;  %v3792_v62 = vstv %s3751_s23  ;;  %s4035_s23 = sld [smem:[#allocation4 + $0x34]] }
 0x205   : > { %v769_v38 = vadd.f32 %v3573_v53, %v672_v51  ;;  %v261_v29 = vmul.f32 %v3623_v17, %v3792_v62 }
 0x206   : > { %v1504_v12 = vrot.slane %v1497_v28, 4  ;;  %v268_v28 = vmul.f32 %v3616_v61, %v267_v42 }
 0x207   : > { %1506 = vrot.lane.b32.xlu1 %v1503_v52, %s2873_s14  ;;  %1483 = vrot.lane.b32.xlu2 %v1476_v54, %s2873_s14  ;;  %v1523_v54 = vrot.slane %v1517_v3, 4  ;;  %v507_v52 = vadd.f32 %v3512_v56, %v414_v49  ;;  %v305_v3 = vmul.f32 %v3616_v61, %v3712_v27  ;;  %v276_v56 = vrot.slane %v3785_v21, 4 }
 0x208   : > { %1485 = vrot.lane.b32.xlu0 %v1477_v40, %s2873_s14  ;;  %v1522_v40 = vrot.slane %v1516_v45, 4  ;;  %v278_v49 = vrot.slane %v270_v57, 4  ;;  %v853_v53 = vadd.f32 %v3582_v34, %v769_v38  ;;  %v342_v51 = vadd.f32 %v3390_v11, %v261_v29 }
 0x209   : > { %v3794_v16 = vpop.permute.xlu1 %1025  ;;  %v3796_v15 = vpop.permute.xlu2 %1096  ;;  %v604_v31 = vadd.f32 %v3454_v32, %v507_v52  ;;  %v4712_v45 = vrot.slane %v3775_v41, 4  ;;  %v1505_v57 = vsel %vm274_vm9, %v1502_v8, %v1504_v12  ;;  %v239_v34 = vmul.f32 %v3623_v17, %v237_v1 }
 0x20a   : > { %4710 = vst [vmem:[#allocation67_spill] sm:$0xff] %v3794_v16  ;;  %v1024_v63 = vpop.permute.xlu0 %1023  ;;  %v3816_v16 = vmul.f32 %v1540_v60, %v3703_v58  ;;  %v939_v27 = vadd.f32 %v3671_v55, %v853_v53  ;;  %v311_v42 = vrot.slane %v305_v3, 4  ;;  %v1524_v11 = vsel %vm274_vm9, %v1522_v40, %v1523_v54 }
 0x20b   : > { %4711 = vst [vmem:[#allocation68_spill] sm:$0xff] %v3796_v15  ;;  %v1542_v15 = vmul.f32 %v1540_v60, %v3679_v25  ;;  %v1526_v21 = vsel %vm274_vm9, %v1523_v54, %v4712_v45  ;;  %v1541_v38 = vmul.f32 %v1540_v60, %v3675_v59  ;;  %v279_v32 = vsel %vm274_vm9, %v276_v56, %v278_v49 }
 0x20c   : > { %v439_v55 = vadd.f32 %v3411_v26, %v342_v51  ;;  %v697_v52 = vadd.f32 %v3522_v24, %v604_v31  ;;  %v1031_v29 = vadd.f32 %v1024_v63, %v939_v27  ;;  %v252_v17 = vmul.f32 %v3616_v61, %v3753_v0 }
 0x20d   : > { %v4713_v12 = vrot.slane %v3721_v7, 4  ;;  %v1548_v3 = vrot.slane %v1542_v15, 4  ;;  %v1550_v40 = vrot.slane %v3816_v16, 4  ;;  %v1565_v49 = vstv %s3801_s17  ;;  %s4069_s17 = sld [smem:[#allocation4 + $0x3b]] }
 0x20e   : > { %v532_v26 = vadd.f32 %v3526_v9, %v439_v55  ;;  %v794_v31 = vadd.f32 %v3585_v44, %v697_v52  ;;  %v260_v7 = vmul.f32 %v3616_v61, %v3792_v62  ;;  %v283_v53 = vadd.f32 %v279_v32, %v239_v34 }
 0x20f   : > { %1529 = vrot.lane.b32.xlu1 %v1526_v21, %s2873_s14  ;;  %1508 = vrot.lane.b32.xlu2 %v1505_v57, %s2873_s14  ;;  %v313_v8 = vsel %vm274_vm9, %v311_v42, %v4713_v12  ;;  %v286_v51 = vmul.f32 %v3616_v61, %v3691_v23  ;;  %v1547_v15 = vrot.slane %v1541_v38, 4  ;;  %v4714_v27 = vrot.slane %v3697_v4, 4 }
 0x210   : > { %1527 = vrot.lane.b32.xlu0 %v1524_v11, %s2873_s14  ;;  %v254_v9 = vmul.f32 %v3604_v6, %v3753_v0  ;;  %v319_v21 = vadd.f32 %v313_v8, %v252_v17  ;;  %v873_v44 = vadd.f32 %v3597_v20, %v794_v31  ;;  %v275_v57 = vrot.slane %v268_v28, 4 }
 0x211   : > { %v3838_v54 = vpop.permute.xlu1 %1050  ;;  %v1120_v60 = vpop.permute.xlu2 %1119  ;;  %v302_v45 = vadd.f32 %v4714_v27, %v246_v48  ;;  %v365_v42 = vadd.f32 %v3401_v10, %v283_v53  ;;  %v1566_v11 = vmul.f32 %v1565_v49, %v3675_v59  ;;  %v3860_v34 = vmul.f32 %v1565_v49, %v3679_v25  ;;  %v4719_v27 = vld [vmem:[#allocation32_spill] sm:$0xff] }
 0x212   : > { %v1049_v24 = vpop.permute.xlu0 %1048  ;;  %v3845_v63 = vadd.f32 %v1120_v60, %v1031_v29  ;;  %v413_v23 = vadd.f32 %v3457_v2, %v319_v21  ;;  %v629_v38 = vadd.f32 %v3469_v43, %v532_v26  ;;  %v964_v4 = vadd.f32 %v3687_v36, %v873_v44  ;;  %v4724_v44 = vld [vmem:[#allocation24_spill] sm:$0xff] }
 0x213   : > { %v1551_v0 = vsel %vm274_vm9, %v1548_v3, %v1550_v40  ;;  %v238_v20 = vmul.f32 %v3616_v61, %v237_v1  ;;  %v277_v10 = vsel %vm274_vm9, %v275_v57, %v276_v56  ;;  %v292_v48 = vrot.slane %v286_v51, 4  ;;  %v4718_v51 = vld [vmem:[#allocation30_spill] sm:$0xff] }
 0x214   : > { %v1549_v28 = vsel %vm274_vm9, %v1547_v15, %v1548_v3  ;;  %v4715_v2 = vrot.slane %v3775_v41, 4  ;;  %v461_v43 = vadd.f32 %v3423_v37, %v365_v42  ;;  %v244_v36 = vmul.f32 %v3616_v61, %v3729_v18  ;;  %v4725_v42 = vld [vmem:[#allocation39_spill] sm:$0xff] }
 0x215   : > { %v722_v32 = vadd.f32 %v3536_v22, %v629_v38  ;;  %v1056_v1 = vadd.f32 %v1049_v24, %v964_v4  ;;  %v4716_v56 = vrot.slane %v3701_v47, 4  ;;  %v1570_v17 = vrot.slane %v1566_v11, 5  ;;  %v4726_v38 = vld [vmem:[#allocation18_spill] sm:$0xff] }
 0x216   : > { %v1571_v41 = vrot.slane %v3860_v34, 5  ;;  %v1586_v12 = vstv %s3841_s19  ;;  %v506_v18 = vadd.f32 %v3346_v39, %v413_v23  ;;  %v555_v37 = vadd.f32 %v3540_v46, %v461_v43  ;;  %s2613_s19 = sld [smem:[#allocation4 + $0x46]] }
 0x217   : > { %1554 = vrot.lane.b32.xlu1 %v1551_v0, %s2873_s14  ;;  %1531 = vrot.lane.b32.xlu2 %v4715_v2, %s2873_s14  ;;  %v294_v55 = vsel %vm274_vm9, %v292_v48, %v4716_v56  ;;  %v819_v22 = vadd.f32 %v3599_v50, %v722_v32  ;;  %v390_v47 = vadd.f32 %v3291_v35, %v302_v45  ;;  %v4717_v60 = vrot.slane %v3717_v30, 4  ;;  %v4728_v2 = vld [vmem:[#allocation38_spill] sm:$0xff] }
 0x218   : > { %1552 = vrot.lane.b32.xlu0 %v1549_v28, %s2873_s14  ;;  %v262_v26 = vmul.f32 %v3604_v6, %v3792_v62  ;;  %v282_v31 = vadd.f32 %v277_v10, %v238_v20  ;;  %v341_v24 = vadd.f32 %v3279_v5, %v260_v7  ;;  %v300_v49 = vadd.f32 %v294_v55, %v244_v36  ;;  %v4720_v62 = vld [vmem:[#allocation61_spill] sm:$0xff]  ;;  %v4729_v36 = vld [vmem:[#allocation47_spill] sm:$0xff] }
 0x219   : > { %v3883_v52 = vpop.permute.xlu1 %1075  ;;  %v1141_v29 = vpop.permute.xlu2 %1140  ;;  %v321_v3 = vadd.f32 %v4717_v60, %v254_v9  ;;  %v603_v39 = vadd.f32 %v3467_v19, %v506_v18  ;;  %v893_v46 = vadd.f32 %v3614_v13, %v819_v22  ;;  %v486_v53 = vadd.f32 %v3344_v33, %v390_v47  ;;  %v4721_v19 = vld [vmem:[#allocation14_spill] sm:$0xff]  ;;  %v4723_v9 = vld [vmem:[#allocation16_spill] sm:$0xff]  ;;  %v4730_v55 = vld [vmem:[#allocation19_spill] sm:$0xff] }
 0x21a   : > { %v1074_v61 = vpop.permute.xlu0 %1073  ;;  %v3892_v8 = vadd.f32 %v1141_v29, %v1056_v1  ;;  %v1588_v35 = vmul.f32 %v1586_v12, %v3679_v25  ;;  %v1589_v30 = vmul.f32 %v1586_v12, %v3703_v58  ;;  %v438_v15 = vadd.f32 %v4718_v51, %v341_v24  ;;  %v4732_v18 = vld [vmem:[#allocation42_spill] sm:$0xff]  ;;  %v4734_v60 = vld [vmem:[#allocation31_spill] sm:$0xff] }
 0x21b   : > { %v415_v50 = vadd.f32 %v3308_v14, %v321_v3  ;;  %v651_v6 = vadd.f32 %v4719_v27, %v555_v37  ;;  %v985_v45 = vadd.f32 %v4720_v62, %v893_v46  ;;  %v1572_v5 = vsel %vm328_vm5, %v1570_v17, %v1571_v41  ;;  %v4722_v14 = vld [vmem:[#allocation17_spill] sm:$0xff] }
 0x21c   : > { %v343_v13 = vadd.f32 %v4721_v19, %v262_v26  ;;  %v580_v7 = vadd.f32 %v4722_v14, %v486_v53  ;;  %v1587_v33 = vmul.f32 %v1586_v12, %v3675_v59  ;;  %v696_v57 = vadd.f32 %v4724_v44, %v603_v39  ;;  %v4735_v26 = vld [vmem:[#allocation48_spill] sm:$0xff]  ;;  %v4736_v39 = vld [vmem:[#allocation49_spill] sm:$0xff] }
 0x21d   : > { %v508_v21 = vadd.f32 %v4723_v9, %v415_v50  ;;  %v745_v11 = vadd.f32 %v4725_v42, %v651_v6  ;;  %v1081_v23 = vadd.f32 %v1074_v61, %v985_v45  ;;  %v1594_v10 = vrot.slane %v1588_v35, 1  ;;  %v4733_v61 = vld [vmem:[#allocation20_spill] sm:$0xff]  ;;  %v4737_v50 = vld [vmem:[#allocation27_spill] sm:$0xff]  ;;  %v4738_v35 = vld [vmem:[#allocation50_spill] sm:$0xff] }
 0x21e   : > { %v673_v4 = vadd.f32 %v4726_v38, %v580_v7  ;;  %v1596_v48 = vrot.slane %v1589_v30, 1  ;;  %v1607_v16 = vstv %s3887_s24  ;;  %v793_v43 = vadd.f32 %v4728_v2, %v696_v57  ;;  %v4740_v6 = vld [vmem:[#allocation60_spill] sm:$0xff]  ;;  %v4743_v9 = vld [vmem:[#allocation33_spill] sm:$0xff]  ;;  %v4745_v57 = vld [vmem:[#allocation62_spill] sm:$0xff]  ;;  %s4097_s24 = sld [smem:[#allocation4 + $0x42]] }
 0x21f   : > { %1575 = vrot.lane.b32.xlu1 %v1572_v5, %s2874_s29  ;;  %1556 = vrot.lane.b32.xlu2 %v1550_v40, %s2873_s14  ;;  %v4727_v40 = vld [vmem:[#allocation15_spill] sm:$0xff]  ;;  %v834_v32 = vadd.f32 %v4729_v36, %v745_v11  ;;  %s3932_s14 = sld [smem:[#allocation4 + $0x48]]  ;;  %v364_v29 = vadd.f32 %v4730_v55, %v282_v31  ;;  %v1593_v22 = vrot.slane %v1587_v33, 1  ;;  %v605_v47 = vadd.f32 %v4733_v61, %v508_v21  ;;  %v4741_v45 = vld [vmem:[#allocation64_spill] sm:$0xff]  ;;  %v4744_v21 = vld [vmem:[#allocation26_spill] sm:$0xff] }
 0x220   : > { %1573 = vrot.lane.b32.xlu0 %v1570_v17, %s2874_s29  ;;  %v531_v28 = vadd.f32 %v4727_v40, %v438_v15  ;;  %v4731_v17 = vld [vmem:[#allocation13_spill] sm:$0xff]  ;;  %v770_v37 = vadd.f32 %v4732_v18, %v673_v4  ;;  %v872_v24 = vadd.f32 %v4735_v26, %v793_v43  ;;  %v1609_v51 = vmul.f32 %v1607_v16, %v3679_v25  ;;  %v4739_v15 = vld [vmem:[#allocation28_spill] sm:$0xff]  ;;  %v4747_v4 = vld [vmem:[#allocation67_spill] sm:$0xff] }
 0x221   : > { %v3924_v0 = vpop.permute.xlu1 %1117  ;;  %v1166_v20 = vpop.permute.xlu2 %1165  ;;  %v440_v12 = vadd.f32 %v4731_v17, %v343_v13  ;;  %v915_v46 = vadd.f32 %v4736_v39, %v834_v32  ;;  %v1608_v31 = vmul.f32 %v1607_v16, %v3675_v59  ;;  %v388_v27 = vadd.f32 %v4739_v15, %v300_v49  ;;  %v4742_v13 = vld [vmem:[#allocation52_spill] sm:$0xff]  ;;  %v4750_v17 = vld [vmem:[#allocation25_spill] sm:$0xff]  ;;  %v4751_v18 = vld [vmem:[#allocation51_spill] sm:$0xff] }
 0x222   : > { %v1099_v1 = vpop.permute.xlu0 %1098  ;;  %v3930_v56 = vadd.f32 %v1166_v20, %v1081_v23  ;;  %v628_v3 = vadd.f32 %v4734_v60, %v531_v28  ;;  %v854_v30 = vadd.f32 %v4738_v35, %v770_v37  ;;  %v963_v62 = vadd.f32 %v4740_v6, %v872_v24  ;;  %v4746_v23 = vld [vmem:[#allocation35_spill] sm:$0xff]  ;;  %v4748_v40 = vld [vmem:[#allocation40_spill] sm:$0xff]  ;;  %v4755_v39 = vld [vmem:[#allocation34_spill] sm:$0xff] }
 0x223   : > { %v533_v53 = vadd.f32 %v4737_v50, %v440_v12  ;;  %v1007_v5 = vadd.f32 %v4741_v45, %v915_v46  ;;  %v1597_v19 = vsel %vm352_vm3, %v1594_v10, %v1596_v48  ;;  %v1595_v7 = vsel %vm352_vm3, %v1593_v22, %v1594_v10  ;;  %v4749_v32 = vld [vmem:[#allocation44_spill] sm:$0xff]  ;;  %v4752_v22 = vld [vmem:[#allocation23_spill] sm:$0xff]  ;;  %v4758_v6 = vld [vmem:[#allocation41_spill] sm:$0xff] }
 0x224   : > { %v940_v14 = vadd.f32 %v4742_v13, %v854_v30  ;;  %v1610_v33 = vmul.f32 %v1607_v16, %v3703_v58  ;;  %v460_v49 = vadd.f32 %v4743_v9, %v364_v29  ;;  %v721_v44 = vadd.f32 %v4744_v21, %v628_v3  ;;  %v4754_v3 = vld [vmem:[#allocation53_spill] sm:$0xff]  ;;  %v4756_v50 = vld [vmem:[#allocation63_spill] sm:$0xff] }
 0x225   : > { %v1055_v42 = vadd.f32 %v4745_v57, %v963_v62  ;;  %v1103_v11 = vadd.f32 %v1099_v1, %v1007_v5  ;;  %v698_v38 = vadd.f32 %v4746_v23, %v605_v47  ;;  %v1615_v34 = vrot.slane %v1609_v51, 1  ;;  %v4753_v47 = vld [vmem:[#allocation21_spill] sm:$0xff] }
 0x226   : > { %v1032_v20 = vadd.f32 %v4747_v4, %v940_v14  ;;  %v818_v16 = vadd.f32 %v4748_v40, %v721_v44  ;;  %v1632_v36 = vstv %s3932_s14  ;;  %v1617_v29 = vrot.slane %v1610_v33, 1  ;;  %v4759_v45 = vld [vmem:[#allocation65_spill] sm:$0xff]  ;;  %v4761_v14 = vld [vmem:[#allocation36_spill] sm:$0xff]  ;;  %v4762_v44 = vld [vmem:[#allocation43_spill] sm:$0xff]  ;;  %s4117_s14 = sld [smem:[#allocation4 + $0x5b]] }
 0x227   : > { %1600 = vrot.lane.b32.xlu1 %v1597_v19, %s2874_s29  ;;  %1577 = vrot.lane.b32.xlu2 %v1571_v41, %s2874_s29  ;;  %v1614_v41 = vrot.slane %v1608_v31, 1  ;;  %v795_v1 = vadd.f32 %v4749_v32, %v698_v38  ;;  %v554_v12 = vadd.f32 %v4750_v17, %v460_v49  ;;  %v484_v61 = vadd.f32 %v4752_v22, %v388_v27  ;;  %v4757_v31 = vld [vmem:[#allocation55_spill] sm:$0xff]  ;;  %v4760_v19 = vld [vmem:[#allocation29_spill] sm:$0xff]  ;;  %v4765_v40 = vld [vmem:[#allocation22_spill] sm:$0xff] }
 0x228   : > { %1598 = vrot.lane.b32.xlu0 %v1595_v7, %s2874_s29  ;;  %v892_v37 = vadd.f32 %v4751_v18, %v818_v16  ;;  %v630_v60 = vadd.f32 %v4753_v47, %v533_v53  ;;  %v1634_v24 = vmul.f32 %v1632_v36, %v3679_v25  ;;  %v1633_v51 = vmul.f32 %v1632_v36, %v3675_v59  ;;  %v4763_v4 = vld [vmem:[#allocation45_spill] sm:$0xff]  ;;  %v4767_v32 = vld [vmem:[#allocation66_spill] sm:$0xff] }
 0x229   : > { %v1139_v10 = vpop.permute.xlu1 %1138  ;;  %v1191_v48 = vpop.permute.xlu2 %1190  ;;  %v874_v26 = vadd.f32 %v4754_v3, %v795_v1  ;;  %v650_v46 = vadd.f32 %v4755_v39, %v554_v12  ;;  %v1616_v30 = vsel %vm352_vm3, %v1614_v41, %v1615_v34  ;;  %v1618_v27 = vsel %vm352_vm3, %v1615_v34, %v1617_v29  ;;  %v4764_v41 = vld [vmem:[#allocation54_spill] sm:$0xff]  ;;  %v4768_v12 = vld [vmem:[#allocation57_spill] sm:$0xff] }
 0x22a   : > { %v3963_v28 = vadd.f32 %v1139_v10, %v1055_v42  ;;  %v1122_v2 = vpop.permute.xlu0 %1121  ;;  %v3965_v43 = vadd.f32 %v1191_v48, %v1103_v11  ;;  %v984_v35 = vadd.f32 %v4756_v50, %v892_v37  ;;  %v1635_v53 = vmul.f32 %v1632_v36, %v3703_v58 }
 0x22b   : > { %v1128_v55 = vadd.f32 %v1122_v2, %v1032_v20  ;;  %v965_v15 = vadd.f32 %v4757_v31, %v874_v26  ;;  %v744_v62 = vadd.f32 %v4758_v6, %v650_v46  ;;  %v578_v13 = vadd.f32 %v4760_v19, %v484_v61  ;;  %v4766_v2 = vld [vmem:[#allocation56_spill] sm:$0xff] }
 0x22c   : > { %v1080_v5 = vadd.f32 %v4759_v45, %v984_v35  ;;  %v723_v7 = vadd.f32 %v4761_v14, %v630_v60  ;;  %v1640_v21 = vrot.slane %v1634_v24, 1  ;;  %v1639_v38 = vrot.slane %v1633_v51, 1  ;;  %v4769_v61 = vld [vmem:[#allocation68_spill] sm:$0xff]  ;;  %v4770_v60 = vld [vmem:[#allocation37_spill] sm:$0xff]  ;;  %v4772_v45 = vld [vmem:[#allocation58_spill] sm:$0xff] }
 0x22d   : > { %v1057_v33 = vadd.f32 %v3838_v54, %v965_v15  ;;  %v833_v57 = vadd.f32 %v4762_v44, %v744_v62  ;;  %v1642_v48 = vrot.slane %v1635_v53, 1  ;;  %v1657_v34 = vstv %s3969_s25  ;;  %v4771_v15 = vld [vmem:[#allocation46_spill] sm:$0xff]  ;;  %s4208_s25 = sld [smem:[#allocation4 + $0x50]] }
 0x22e   : > { %v820_v20 = vadd.f32 %v4763_v4, %v723_v7  ;;  %v671_v16 = vadd.f32 %v4765_v40, %v578_v13  ;;  %v1658_v17 = vmul.f32 %v1657_v34, %v3675_v59  ;;  %v1660_v22 = vmul.f32 %v1657_v34, %v3703_v58 }
 0x22f   : > { %1623 = vrot.lane.b32.xlu1 %v1617_v29, %s2874_s29  ;;  %1619 = vrot.lane.b32.xlu2 %v1616_v30, %s2874_s29  ;;  %v914_v54 = vadd.f32 %v4764_v41, %v833_v57  ;;  %v1659_v29 = vmul.f32 %v1657_v34, %v3679_v25  ;;  %v1643_v37 = vsel %vm352_vm3, %v1640_v21, %v1642_v48  ;;  %v1703_v46 = vstv %s2630_s26  ;;  %s2636_s26 = sld [smem:[#allocation4 + $0x57]] }
 0x230   : > { %1621 = vrot.lane.b32.xlu0 %v1618_v27, %s2874_s29  ;;  %v894_v36 = vadd.f32 %v4766_v2, %v820_v20  ;;  %v768_v3 = vadd.f32 %v4770_v60, %v671_v16  ;;  %v1664_v31 = vrot.slane %v1658_v17, 1  ;;  %v1667_v6 = vrot.slane %v1660_v22, 1 }
 0x231   : > { %v1164_v9 = vpop.permute.xlu1 %1163  ;;  %v1214_v49 = vpop.permute.xlu2 %1213  ;;  %v1006_v1 = vadd.f32 %v4767_v32, %v914_v54  ;;  %v1665_v51 = vrot.slane %v1659_v29, 1  ;;  %v1682_v62 = vstv %s2629_s27  ;;  %v4029_v19 = vmul.f32 %v1703_v46, %v3679_v25  ;;  %s2637_s27 = sld [smem:[#allocation4 + $0x5e]] }
 0x232   : > { %v3993_v42 = vadd.f32 %v1164_v9, %v1080_v5  ;;  %v1143_v11 = vpop.permute.xlu0 %1142  ;;  %v3995_v23 = vadd.f32 %v1214_v49, %v1128_v55  ;;  %v1641_v55 = vsel %vm352_vm3, %v1639_v38, %v1640_v21  ;;  %v986_v18 = vadd.f32 %v4768_v12, %v894_v36  ;;  %v4773_v9 = vld [vmem:[#allocation59_spill] sm:$0xff] }
 0x233   : > { %v1149_v10 = vadd.f32 %v1143_v11, %v1057_v33  ;;  %v1102_v47 = vadd.f32 %v4769_v61, %v1006_v1  ;;  %v852_v27 = vadd.f32 %v4771_v15, %v768_v3  ;;  %v1704_v5 = vmul.f32 %v1703_v46, %v3675_v59 }
 0x234   : > { %v1082_v26 = vadd.f32 %v3883_v52, %v986_v18  ;;  %v1293_v13 = vstv %s4003_s6  ;;  %v1666_v14 = vsel %vm352_vm3, %v1664_v31, %v1665_v51  ;;  %v1684_v7 = vmul.f32 %v1682_v62, %v3679_v25  ;;  %s2638_s6 = sld [smem:[#allocation4 + $0x35]] }
 0x235   : > { %v938_v52 = vadd.f32 %v4772_v45, %v852_v27  ;;  %v1683_v33 = vmul.f32 %v1682_v62, %v3675_v59  ;;  %v1668_v21 = vsel %vm352_vm3, %v1665_v51, %v1667_v6  ;;  %v1685_v44 = vmul.f32 %v1682_v62, %v3703_v58 }
 0x236   : > { %v4045_v11 = vmul.f32 %v1293_v13, %v3679_v25  ;;  %v1710_v20 = vrot.slane %v1704_v5, 5  ;;  %v1690_v54 = vrot.slane %v1684_v7, 5  ;;  %v4057_v36 = vstv %s4022_s7  ;;  %s2639_s7 = sld [smem:[#allocation4 + $0x3c]] }
 0x237   : > { %1648 = vrot.lane.b32.xlu1 %v1642_v48, %s2874_s29  ;;  %1644 = vrot.lane.b32.xlu2 %v1641_v55, %s2874_s29  ;;  %v1030_v49 = vadd.f32 %v4773_v9, %v938_v52  ;;  %v1689_v40 = vrot.slane %v1683_v33, 5  ;;  %v1692_v2 = vrot.slane %v1685_v44, 5  ;;  %v4063_v1 = vstv %s4025_s8  ;;  %s2640_s8 = sld [smem:[#allocation4 + $0x43]] }
 0x238   : > { %1646 = vrot.lane.b32.xlu0 %v1643_v37, %s2874_s29  ;;  %v1299_v32 = vrot.slane %v4045_v11, 7  ;;  %v1728_v29 = vstv %s4035_s23  ;;  %v1706_v17 = vmul.f32 %v1703_v46, %v3703_v58  ;;  %v4077_v37 = vmul.f32 %v4057_v36, %v3679_v25  ;;  %s2641_s23 = sld [smem:[#allocation4 + $0x4a]] }
 0x239   : > { %v1189_v24 = vpop.permute.xlu1 %1188  ;;  %v1239_v39 = vpop.permute.xlu2 %1238  ;;  %v1126_v57 = vadd.f32 %v3924_v0, %v1030_v49  ;;  %v4052_v0 = vmul.f32 %v1293_v13, %v3675_v59  ;;  %v1691_v55 = vsel %vm328_vm5, %v1689_v40, %v1690_v54  ;;  %v1693_v18 = vsel %vm328_vm5, %v1690_v54, %v1692_v2 }
 0x23a   : > { %v4017_v50 = vadd.f32 %v1189_v24, %v1102_v47  ;;  %v1168_v35 = vpop.permute.xlu0 %1167  ;;  %v4019_v30 = vadd.f32 %v1239_v39, %v1149_v10  ;;  %v1711_v10 = vrot.slane %v4029_v19, 5  ;;  %v4081_v22 = vmul.f32 %v4057_v36, %v3703_v58 }
 0x23b   : > { %v1174_v53 = vadd.f32 %v1168_v35, %v1082_v26  ;;  %v1298_v12 = vrot.slane %v4052_v0, 7  ;;  %v4086_v61 = vmul.f32 %v4063_v1, %v3679_v25  ;;  %v4088_v47 = vstv %s2612_s28  ;;  %s2643_s28 = sld [smem:[#allocation4 + $0x58]] }
 0x23c   : > { %v4092_v60 = vmul.f32 %v4063_v1, %v3675_v59  ;;  %v1729_v24 = vmul.f32 %v1728_v29, %v3675_v59  ;;  %v1713_v35 = vrot.slane %v1706_v17, 5  ;;  %v1371_v15 = vrot.slane %v4077_v37, 3 }
 0x23d   : > { %v1300_v51 = vsel %vm658_vm7, %v1298_v12, %v1299_v32  ;;  %v1373_v27 = vrot.slane %v4081_v22, 3  ;;  %v1316_v62 = vrot.slane %v4086_v61, 7  ;;  %v1749_v5 = vstv %s4069_s17  ;;  %s4406_s17 = sld [smem:[#allocation4 + $0x36]] }
 0x23e   : > { %v1315_v45 = vrot.slane %v4092_v60, 7  ;;  %v1733_v52 = vrot.slane %v1729_v24, 6  ;;  %v1730_v19 = vmul.f32 %v1728_v29, %v3679_v25  ;;  %v4148_v44 = vmul.f32 %v4088_v47, %v3675_v59 }
 0x23f   : > { %1673 = vrot.lane.b32.xlu1 %v1667_v6, %s2874_s29  ;;  %1669 = vrot.lane.b32.xlu2 %v1666_v14, %s2874_s29  ;;  %v4112_v6 = vmul.f32 %v4088_v47, %v3679_v25  ;;  %v1374_v13 = vsel %vm732_vm8, %v1371_v15, %v1373_v27  ;;  %v1346_v14 = vstv %s2613_s19  ;;  %v1330_v22 = vmul.f32 %v4088_v47, %v3703_v58  ;;  %s2646_s19 = sld [smem:[#allocation4 + $0x3d]] }
 0x240   : > { %1671 = vrot.lane.b32.xlu0 %v1668_v21, %s2874_s29  ;;  %v1317_v21 = vsel %vm658_vm7, %v1315_v45, %v1316_v62  ;;  %v1734_v54 = vrot.slane %v1730_v19, 6  ;;  %v1347_v40 = vmul.f32 %v1346_v14, %v3675_v59  ;;  %v1334_v24 = vrot.slane %v4148_v44, 7 }
 0x241   : > { %v1212_v38 = vpop.permute.xlu1 %1211  ;;  %v1264_v4 = vpop.permute.xlu2 %1263  ;;  %v1335_v9 = vrot.slane %v4112_v6, 7  ;;  %v1337_v44 = vrot.slane %v1330_v22, 7 }
 0x242   : > { %v1219_v48 = vadd.f32 %v1212_v38, %v3845_v63  ;;  %v1210_v34 = vpop.permute.xlu0 %1209  ;;  %v4049_v41 = vadd.f32 %v1264_v4, %v1174_v53  ;;  %v1712_v63 = vsel %vm328_vm5, %v1710_v20, %v1711_v10  ;;  %v1750_v4 = vmul.f32 %v1749_v5, %v3675_v59 }
 0x243   : > { %v4054_v16 = vadd.f32 %v1210_v34, %v1126_v57  ;;  %v1774_v20 = vstv %s4097_s24  ;;  %s2647_s24 = sld [smem:[#allocation4 + $0x44]] }
 0x244   : > { %v1305_v53 = vadd.f32 %v1300_v51, %v1219_v48  ;;  %v1735_v51 = vsel %vm493_vm4, %v1733_v52, %v1734_v54 }
 0x246   : > { %v1379_v49 = vadd.f32 %v1374_v13, %v1305_v53  ;;  %v1353_v53 = vrot.slane %v1347_v40, 3 }
 0x247   : > { %1715 = vrot.lane.b32.xlu1 %v1712_v63, %s2874_s29  ;;  %1694 = vrot.lane.b32.xlu2 %v1691_v55, %s2874_s29  ;;  %v1348_v63 = vmul.f32 %v1346_v14, %v3679_v25 }
 0x248   : > { %1696 = vrot.lane.b32.xlu0 %v1693_v18, %s2874_s29  ;;  %v4166_v18 = vmul.f32 %v1774_v20, %v3679_v25 }
 0x249   : > { %v1237_v3 = vpop.permute.xlu1 %1236  ;;  %v4094_v26 = vpop.permute.xlu2 %1425 }
 0x24a   : > { %v1244_v39 = vadd.f32 %v1237_v3, %v3892_v8  ;;  %v1235_v46 = vpop.permute.xlu0 %1234  ;;  %v4115_v8 = vstv %s4059_s16  ;;  %v4169_v3 = vstv %s4117_s14  ;;  %s2644_s16 = sld [smem:[#allocation4 + $0x5f]] }
 0x24b   : > { %v4106_v31 = vadd.f32 %v1235_v46, %v3963_v28  ;;  %v1714_v28 = vsel %vm328_vm5, %v1711_v10, %v1713_v35  ;;  %v4133_v7 = vmul.f32 %v4115_v8, %v3679_v25  ;;  %v4137_v33 = vmul.f32 %v4115_v8, %v3703_v58  ;;  %s2652_s14 = sld [smem:[#allocation4 + $0x37]] }
 0x24c   : > { %v1324_v17 = vadd.f32 %v1317_v21, %v1244_v39  ;;  %v1756_v46 = vrot.slane %v1750_v4, 6  ;;  %v1364_v39 = vmul.f32 %v4057_v36, %v3675_v59  ;;  %v1349_v21 = vmul.f32 %v1346_v14, %v3703_v58 }
 0x24d   : > { %v1390_v55 = vrot.slane %v4133_v7, 3  ;;  %v4647_v29 = vrot.slane %v4137_v33, 3  ;;  %v1402_v11 = vmul.f32 %v4169_v3, %v3675_v59 }
 0x24f   : > { %1736 = vrot.lane.b32.xlu1 %v1733_v52, %s2875_s20  ;;  %1717 = vrot.lane.b32.xlu2 %v1714_v28, %s2874_s29  ;;  %v1354_v28 = vrot.slane %v1348_v63, 3  ;;  %v1393_v19 = vsel %vm732_vm8, %v1390_v55, %v4647_v29  ;;  %v4190_v52 = vmul.f32 %v4169_v3, %v3703_v58 }
 0x250   : > { %1719 = vrot.lane.b32.xlu0 %v1713_v35, %s2874_s29  ;;  %s4156_s29 = sld [smem:[#allocation4 + $0x49]]  ;;  %v1752_v35 = vmul.f32 %v1749_v5, %v3703_v58  ;;  %v1398_v36 = vadd.f32 %v1393_v19, %v1324_v17  ;;  %v1370_v17 = vrot.slane %v1364_v39, 3 }
 0x251   : > { %v1262_v57 = vpop.permute.xlu1 %1261  ;;  %v1444_v38 = vpop.permute.xlu2 %1443  ;;  %v1411_v29 = vrot.slane %v4190_v52, 3 }
 0x252   : > { %v1269_v10 = vadd.f32 %v1262_v57, %v3930_v56  ;;  %v1260_v48 = vpop.permute.xlu0 %1259  ;;  %v4153_v34 = vadd.f32 %v1444_v38, %v1379_v49  ;;  %v1775_v56 = vmul.f32 %v1774_v20, %v3675_v59  ;;  %v1782_v49 = vrot.slane %v4166_v18, 2 }
 0x253   : > { %v4159_v2 = vadd.f32 %v1260_v48, %v3993_v42  ;;  %v1751_v42 = vmul.f32 %v1749_v5, %v3679_v25  ;;  %v4186_v5 = vmul.f32 %v4169_v3, %v3679_v25  ;;  %v1336_v57 = vsel %vm658_vm7, %v1334_v24, %v1335_v9 }
 0x254   : > { %v1781_v13 = vrot.slane %v1775_v56, 2  ;;  %v1759_v40 = vrot.slane %v1752_v35, 6  ;;  %v1355_v18 = vsel %vm732_vm8, %v1353_v53, %v1354_v28 }
 0x255   : > { %v1757_v48 = vrot.slane %v1751_v42, 6  ;;  %v1409_v19 = vrot.slane %v4186_v5, 3  ;;  %v1304_v42 = vadd.f32 %v1298_v12, %v4054_v16  ;;  %v1777_v16 = vmul.f32 %v1774_v20, %v3703_v58 }
 0x256   : > { %v1795_v56 = vstv %s4156_s29  ;;  %v1783_v35 = vsel %vm542_vm6, %v1781_v13, %v1782_v49  ;;  %s2650_s29 = sld [smem:[#allocation4 + $0x59]] }
 0x257   : > { %1761 = vrot.lane.b32.xlu1 %v1756_v46, %s2875_s20  ;;  %1738 = vrot.lane.b32.xlu2 %v1735_v51, %s2875_s20  ;;  %v1797_v53 = vmul.f32 %v1795_v56, %v3679_v25  ;;  %v1796_v0 = vmul.f32 %v1795_v56, %v3675_v59  ;;  %v1412_v12 = vsel %vm732_vm8, %v1409_v19, %v1411_v29 }
 0x258   : > { %1740 = vrot.lane.b32.xlu0 %v1734_v54, %s2875_s20 }
 0x259   : > { %v1287_v38 = vpop.permute.xlu1 %1286  ;;  %v1464_v4 = vpop.permute.xlu2 %1463 }
 0x25a   : > { %v1291_v63 = vadd.f32 %v1287_v38, %v3965_v43  ;;  %v1285_v51 = vpop.permute.xlu0 %1284  ;;  %v4201_v54 = vadd.f32 %v1464_v4, %v1398_v36  ;;  %v1343_v43 = vadd.f32 %v1336_v57, %v1269_v10  ;;  %v1356_v36 = vrot.slane %v1349_v21, 3 }
 0x25b   : > { %v1290_v14 = vadd.f32 %v1285_v51, %v4017_v50  ;;  %v1758_v38 = vsel %vm493_vm4, %v1756_v46, %v1757_v48  ;;  %v4217_v50 = vmul.f32 %v1795_v56, %v3703_v58  ;;  %v1760_v4 = vsel %vm493_vm4, %v1757_v48, %v1759_v40 }
 0x25c   : > { %v1372_v51 = vsel %vm732_vm8, %v1370_v17, %v1371_v15  ;;  %v1383_v10 = vmul.f32 %v4115_v8, %v3675_v59  ;;  %v1357_v20 = vsel %vm732_vm8, %v1354_v28, %v1356_v36  ;;  %v1417_v46 = vadd.f32 %v1412_v12, %v1343_v43 }
 0x25d   : > { %v1360_v39 = vadd.f32 %v1355_v18, %v1290_v14  ;;  %v1378_v15 = vadd.f32 %v1372_v51, %v1304_v42  ;;  %v1361_v21 = vadd.f32 %v1357_v20, %v1291_v63  ;;  %v1803_v48 = vrot.slane %v1797_v53, 2  ;;  %v4283_v20 = vld [vmem:[#allocation3 + $0x8] sm:$0xff] }
 0x25e   : > { %v1805_v40 = vrot.slane %v4217_v50, 2  ;;  %v1784_v18 = vrot.slane %v1777_v16, 2  ;;  %v1311_v28 = vmul.f32 %v4063_v1, %v3703_v58  ;;  %v1323_v63 = vadd.f32 %v1315_v45, %v4106_v31 }
 0x25f   : > { %1786 = vrot.lane.b32.xlu1 %v1783_v35, %s2875_s20  ;;  %1763 = vrot.lane.b32.xlu2 %v1758_v38, %s2875_s20  ;;  %v4235_v37 = vadd.f32 %v4094_v26, %v1360_v39  ;;  %v1802_v26 = vrot.slane %v1796_v0, 2  ;;  %v1389_v35 = vrot.slane %v1383_v10, 3  ;;  %v1820_v39 = vstv %s4208_s25  ;;  %s2656_s25 = sld [smem:[#allocation4 + $0x53]] }
 0x260   : > { %1765 = vrot.lane.b32.xlu0 %v1760_v4, %s2875_s20  ;;  %v1306_v42 = vadd.f32 %v1299_v32, %v3995_v23  ;;  %v1806_v43 = vsel %vm542_vm6, %v1803_v48, %v1805_v40  ;;  %v1785_v38 = vsel %vm542_vm6, %v1782_v49, %v1784_v18  ;;  %v1822_v53 = vmul.f32 %v1820_v39, %v3679_v25 }
 0x261   : > { %v1442_v13 = vpop.permute.xlu1 %1441  ;;  %v1484_v57 = vpop.permute.xlu2 %1483  ;;  %v1804_v36 = vsel %vm542_vm6, %v1802_v26, %v1803_v48  ;;  %v1823_v50 = vmul.f32 %v1820_v39, %v3703_v58  ;;  %v1391_v1 = vsel %vm732_vm8, %v1389_v35, %v1390_v55  ;;  %v1821_v23 = vmul.f32 %v1820_v39, %v3675_v59 }
 0x262   : > { %v4240_v17 = vadd.f32 %v1442_v13, %v1378_v15  ;;  %v1428_v56 = vpop.permute.xlu0 %1427  ;;  %v4242_v8 = vadd.f32 %v1484_v57, %v1417_v46  ;;  %v1318_v32 = vrot.slane %v1311_v28, 7  ;;  %v1397_v60 = vadd.f32 %v1391_v1, %v1323_v63  ;;  %v4309_v63 = vld [vmem:[#allocation3 + $0x10] sm:$0x3f] }
 0x263   : > { %v1432_v14 = vadd.f32 %v1428_v56, %v1361_v21  ;;  %v1380_v31 = vadd.f32 %v1373_v27, %v1306_v42  ;;  %v1828_v55 = vrot.slane %v1822_v53, 2  ;;  %v1830_v51 = vrot.slane %v1823_v50, 2 }
 0x264   : > { %v1827_v16 = vrot.slane %v1821_v23, 2  ;;  %v1408_v12 = vrot.slane %v1402_v11, 3  ;;  %v1845_v59 = vstv %s2636_s26  ;;  %v1319_v3 = vsel %vm658_vm7, %v1316_v62, %v1318_v32  ;;  %v4293_v62 = vld [vmem:[#allocation3] sm:$0xff]  ;;  %s2651_s26 = sld [smem:[#allocation4 + $0x60]] }
 0x265   : > { %v1342_v27 = vadd.f32 %v1334_v24, %v4159_v2  ;;  %v1325_v10 = vadd.f32 %v1319_v3, %v4019_v30  ;;  %v1831_v15 = vsel %vm542_vm6, %v1828_v55, %v1830_v51  ;;  %v1847_v46 = vmul.f32 %v4283_v20, %v1845_v59 }
 0x266   : > { %v1848_v13 = vmul.f32 %v1845_v59, %v3703_v58  ;;  %v1829_v61 = vsel %vm542_vm6, %v1827_v16, %v1828_v55  ;;  %v1410_v47 = vsel %vm732_vm8, %v1408_v12, %v1409_v19  ;;  %v1846_v30 = vmul.f32 %v4293_v62, %v1845_v59 }
 0x267   : > { %1809 = vrot.lane.b32.xlu1 %v1806_v43, %s2875_s20  ;;  %1788 = vrot.lane.b32.xlu2 %v1785_v38, %s2875_s20  ;;  %v1416_v2 = vadd.f32 %v1410_v47, %v1342_v27  ;;  %v4774_v58 = vrot.slane %v4137_v33, 3  ;;  %v1853_v5 = vrot.slane %v1847_v46, 2  ;;  %v1338_v35 = vsel %vm658_vm7, %v1335_v9, %v1337_v44 }
 0x268   : > { %1807 = vrot.lane.b32.xlu0 %v1804_v36, %s2875_s20  ;;  %v1855_v19 = vrot.slane %v1848_v13, 2  ;;  %v1852_v18 = vrot.slane %v1846_v30, 2  ;;  %v1344_v39 = vadd.f32 %v1338_v35, %v4049_v41  ;;  %v1912_v59 = vstv %s2639_s7  ;;  %s2655_s7 = sld [smem:[#allocation4 + $0x4c]] }
 0x269   : > { %v1462_v25 = vpop.permute.xlu1 %1461  ;;  %v1509_v45 = vpop.permute.xlu2 %1508  ;;  %v1399_v21 = vadd.f32 %v4774_v58, %v1325_v10  ;;  %v1914_v3 = vmul.f32 %v4283_v20, %v1912_v59  ;;  %v1915_v22 = vmul.f32 %v4309_v63, %v1912_v59 }
 0x26a   : > { %v4269_v49 = vadd.f32 %v1462_v25, %v1397_v60  ;;  %v1446_v4 = vpop.permute.xlu0 %1445  ;;  %v4271_v7 = vadd.f32 %v1509_v45, %v1432_v14  ;;  %v1870_v14 = vstv %s2637_s27  ;;  %v1856_v33 = vsel %vm542_vm6, %v1853_v5, %v1855_v19  ;;  %s2654_s27 = sld [smem:[#allocation4 + $0x45]] }
 0x26b   : > { %v1452_v0 = vadd.f32 %v1446_v4, %v1380_v31  ;;  %v1872_v28 = vmul.f32 %v4283_v20, %v1870_v14  ;;  %v1873_v42 = vmul.f32 %v4309_v63, %v1870_v14  ;;  %v1854_v43 = vsel %vm542_vm6, %v1852_v18, %v1853_v5 }
 0x26c   : > { %v1871_v6 = vmul.f32 %v4293_v62, %v1870_v14  ;;  %v1418_v41 = vadd.f32 %v1411_v29, %v1344_v39  ;;  %v1891_v60 = vstv %s2638_s6  ;;  %v1922_v47 = vrot.slane %v1915_v22, 7  ;;  %s2649_s6 = sld [smem:[#allocation4 + $0x52]] }
 0x26d   : > { %v1878_v1 = vrot.slane %v1872_v28, 6  ;;  %v1880_v23 = vrot.slane %v1873_v42, 6  ;;  %v1893_v29 = vmul.f32 %v4283_v20, %v1891_v60  ;;  %v1962_v28 = vstv %s2641_s23  ;;  %s2653_s23 = sld [smem:[#allocation4 + $0x3e]] }
 0x26e   : > { %v1877_v32 = vrot.slane %v1871_v6, 6  ;;  %v2033_v22 = vstv %s2644_s16 }
 0x26f   : > { %1834 = vrot.lane.b32.xlu1 %v1831_v15, %s2875_s20  ;;  %1811 = vrot.lane.b32.xlu2 %v1805_v40, %s2875_s20  ;;  %v1881_v25 = vsel %vm493_vm4, %v1878_v1, %v1880_v23  ;;  %v1897_v16 = vrot.slane %v1893_v29, 7 }
 0x270   : > { %1832 = vrot.lane.b32.xlu0 %v1829_v61, %s2875_s20  ;;  %v1879_v52 = vsel %vm493_vm4, %v1877_v32, %v1878_v1  ;;  %v1920_v61 = vrot.slane %v1914_v3, 7 }
 0x271   : > { %v1482_v24 = vpop.permute.xlu1 %1481  ;;  %v1532_v57 = vpop.permute.xlu2 %1531 }
 0x272   : > { %v4299_v48 = vadd.f32 %v1482_v24, %v1416_v2  ;;  %v1466_v40 = vpop.permute.xlu0 %1465  ;;  %v4301_v56 = vadd.f32 %v1532_v57, %v1452_v0  ;;  %v1937_v2 = vstv %s2640_s8  ;;  %v1923_v24 = vsel %vm658_vm7, %v1920_v61, %v1922_v47  ;;  %s2658_s8 = sld [smem:[#allocation4 + $0x61]] }
 0x273   : > { %v1472_v26 = vadd.f32 %v1466_v40, %v1399_v21  ;;  %v1939_v58 = vmul.f32 %v4283_v20, %v1937_v2  ;;  %v1940_v21 = vmul.f32 %v4309_v63, %v1937_v2  ;;  %v1938_v57 = vmul.f32 %v4293_v62, %v1937_v2 }
 0x274   : > { %v2034_v47 = vmul.f32 %v4293_v62, %v2033_v22  ;;  %v2035_v2 = vmul.f32 %v4283_v20, %v2033_v22 }
 0x275   : > { %v1945_v14 = vrot.slane %v1939_v58, 7  ;;  %v1947_v35 = vrot.slane %v1940_v21, 7 }
 0x276   : > { %v2040_v21 = vrot.slane %v2034_v47, 3 }
 0x277   : > { %1859 = vrot.lane.b32.xlu1 %v1856_v33, %s2875_s20  ;;  %1836 = vrot.lane.b32.xlu2 %v1830_v51, %s2875_s20  ;;  %v1944_v33 = vrot.slane %v1938_v57, 7  ;;  %v1948_v6 = vsel %vm658_vm7, %v1945_v14, %v1947_v35  ;;  %v2036_v35 = vmul.f32 %v4309_v63, %v2033_v22 }
 0x278   : > { %1857 = vrot.lane.b32.xlu0 %v1854_v43, %s2875_s20 }
 0x279   : > { %v1507_v9 = vpop.permute.xlu1 %1506  ;;  %v1557_v36 = vpop.permute.xlu2 %1556 }
 0x27a   : > { %v4320_v38 = vadd.f32 %v1507_v9, %v4235_v37  ;;  %v1486_v53 = vpop.permute.xlu0 %1485  ;;  %v4322_v50 = vadd.f32 %v1557_v36, %v1472_v26  ;;  %v1892_v37 = vmul.f32 %v4293_v62, %v1891_v60  ;;  %v1964_v9 = vmul.f32 %v4283_v20, %v1962_v28 }
 0x27b   : > { %v1492_v11 = vadd.f32 %v1486_v53, %v1418_v41  ;;  %v1946_v41 = vsel %vm658_vm7, %v1944_v33, %v1945_v14 }
 0x27c   : > { %v1896_v12 = vrot.slane %v1892_v37, 7 }
 0x27e   : > { %v1898_v27 = vsel %vm658_vm7, %v1896_v12, %v1897_v16 }
 0x27f   : > { %1884 = vrot.lane.b32.xlu1 %v1881_v25, %s2875_s20  ;;  %1861 = vrot.lane.b32.xlu2 %v1855_v19, %s2875_s20  ;;  %v1970_v25 = vrot.slane %v1964_v9, 3 }
 0x280   : > { %1882 = vrot.lane.b32.xlu0 %v1879_v52, %s2875_s20  ;;  %s2642_s20 = sld [smem:[#allocation4 + $0x51]] }
 0x281   : > { %v1530_v31 = vpop.permute.xlu1 %1529  ;;  %v1578_v45 = vpop.permute.xlu2 %1577 }
 0x282   : > { %v4332_v4 = vadd.f32 %v1530_v31, %v4153_v34  ;;  %v1528_v55 = vpop.permute.xlu0 %1527  ;;  %v4334_v51 = vadd.f32 %v1578_v45, %v1492_v11  ;;  %v1913_v34 = vmul.f32 %v4293_v62, %v1912_v59  ;;  %v2008_v31 = vstv %s2643_s28 }
 0x283   : > { %v1536_v0 = vadd.f32 %v1528_v55, %v4240_v17 }
 0x284   : > { %v1919_v44 = vrot.slane %v1913_v34, 7 }
 0x286   : > { %v1983_v5 = vstv %s2642_s20  ;;  %s2657_s20 = sld [smem:[#allocation4 + $0x5a]] }
 0x287   : > { %1903 = vrot.lane.b32.xlu1 %v1897_v16, %s2876_s30  ;;  %1899 = vrot.lane.b32.xlu2 %v1896_v12, %s2876_s30  ;;  %v1984_v42 = vmul.f32 %v4293_v62, %v1983_v5  ;;  %v1985_v43 = vmul.f32 %v4283_v20, %v1983_v5  ;;  %v1986_v45 = vmul.f32 %v4309_v63, %v1983_v5 }
 0x288   : > { %1901 = vrot.lane.b32.xlu0 %v1898_v27, %s2876_s30  ;;  %v2009_v16 = vmul.f32 %v4293_v62, %v2008_v31 }
 0x289   : > { %v1555_v10 = vpop.permute.xlu1 %1554  ;;  %v1620_v17 = vpop.permute.xlu2 %1619  ;;  %v1990_v1 = vrot.slane %v1984_v42, 3  ;;  %v1991_v23 = vrot.slane %v1985_v43, 3  ;;  %v1993_v3 = vrot.slane %v1986_v45, 3  ;;  %v2043_v43 = vrot.slane %v2036_v35, 3 }
 0x28a   : > { %v4345_v15 = vadd.f32 %v1555_v10, %v4201_v54  ;;  %v1553_v46 = vpop.permute.xlu0 %1552  ;;  %v4347_v13 = vadd.f32 %v1620_v17, %v1536_v0  ;;  %v1921_v54 = vsel %vm658_vm7, %v1919_v44, %v1920_v61  ;;  %v2015_v17 = vrot.slane %v2009_v16, 3 }
 0x28b   : > { %v1561_v30 = vadd.f32 %v1553_v46, %v4269_v49  ;;  %v1992_v55 = vsel %vm732_vm8, %v1990_v1, %v1991_v23  ;;  %v2072_v1 = vstv %s2646_s19 }
 0x28f   : > { %1928 = vrot.lane.b32.xlu1 %v1923_v24, %s2876_s30  ;;  %1924 = vrot.lane.b32.xlu2 %v1919_v44, %s2876_s30  ;;  %v1994_v44 = vsel %vm732_vm8, %v1991_v23, %v1993_v3  ;;  %v2011_v24 = vmul.f32 %v4309_v63, %v2008_v31  ;;  %v2074_v23 = vmul.f32 %v4283_v20, %v2072_v1 }
 0x290   : > { %1926 = vrot.lane.b32.xlu0 %v1921_v54, %s2876_s30 }
 0x291   : > { %v1576_v49 = vpop.permute.xlu1 %1575  ;;  %v1645_v40 = vpop.permute.xlu2 %1644 }
 0x292   : > { %v4359_v19 = vadd.f32 %v1576_v49, %v4242_v8  ;;  %v1574_v26 = vpop.permute.xlu0 %1573  ;;  %v4361_v18 = vadd.f32 %v1645_v40, %v1561_v30  ;;  %v1963_v8 = vmul.f32 %v4293_v62, %v1962_v28  ;;  %v2041_v49 = vrot.slane %v2035_v2, 3 }
 0x293   : > { %v1582_v39 = vadd.f32 %v1574_v26, %v4299_v48  ;;  %v1965_v48 = vmul.f32 %v4309_v63, %v1962_v28  ;;  %v2018_v40 = vrot.slane %v2011_v24, 3 }
 0x294   : > { %v1969_v52 = vrot.slane %v1963_v8, 3  ;;  %v2042_v26 = vsel %vm732_vm8, %v2040_v21, %v2041_v49  ;;  %v2044_v8 = vsel %vm732_vm8, %v2041_v49, %v2043_v43 }
 0x295   : > { %v1972_v37 = vrot.slane %v1965_v48, 3 }
 0x296   : > { %v1971_v0 = vsel %vm732_vm8, %v1969_v52, %v1970_v25 }
 0x297   : > { %1953 = vrot.lane.b32.xlu1 %v1948_v6, %s2876_s30  ;;  %1949 = vrot.lane.b32.xlu2 %v1944_v33, %s2876_s30  ;;  %v1973_v12 = vsel %vm732_vm8, %v1970_v25, %v1972_v37  ;;  %v2073_v25 = vmul.f32 %v4293_v62, %v2072_v1 }
 0x298   : > { %1951 = vrot.lane.b32.xlu0 %v1946_v41, %s2876_s30 }
 0x299   : > { %v1601_v36 = vpop.permute.xlu1 %1600  ;;  %v1670_v53 = vpop.permute.xlu2 %1669 }
 0x29a   : > { %v4375_v11 = vadd.f32 %v1601_v36, %v4271_v7  ;;  %v1599_v32 = vpop.permute.xlu0 %1598  ;;  %v4377_v60 = vadd.f32 %v1670_v53, %v1582_v39  ;;  %v2010_v7 = vmul.f32 %v4283_v20, %v2008_v31 }
 0x29b   : > { %v1604_v29 = vadd.f32 %v1599_v32, %v4320_v38 }
 0x29c   : > { %v2016_v46 = vrot.slane %v2010_v7, 3 }
 0x29e   : > { %v2017_v30 = vsel %vm732_vm8, %v2015_v17, %v2016_v46  ;;  %v2019_v14 = vsel %vm732_vm8, %v2016_v46, %v2018_v40 }
 0x29f   : > { %1995 = vrot.lane.b32.xlu1 %v1992_v55, %s2876_s30  ;;  %1974 = vrot.lane.b32.xlu2 %v1971_v0, %s2876_s30  ;;  %v2075_v0 = vmul.f32 %v4309_v63, %v2072_v1 }
 0x2a0   : > { %1976 = vrot.lane.b32.xlu0 %v1973_v12, %s2876_s30 }
 0x2a1   : > { %v1624_v38 = vpop.permute.xlu1 %1623  ;;  %v1695_v59 = vpop.permute.xlu2 %1694 }
 0x2a2   : > { %v4390_v27 = vadd.f32 %v1624_v38, %v4301_v56  ;;  %v1622_v34 = vpop.permute.xlu0 %1621  ;;  %v4392_v10 = vadd.f32 %v1695_v59, %v1604_v29 }
 0x2a3   : > { %v1629_v61 = vadd.f32 %v1622_v34, %v4332_v4 }
 0x2a7   : > { %2020 = vrot.lane.b32.xlu1 %v2017_v30, %s2876_s30  ;;  %1997 = vrot.lane.b32.xlu2 %v1994_v44, %s2876_s30 }
 0x2a8   : > { %1999 = vrot.lane.b32.xlu0 %v1993_v3, %s2876_s30 }
 0x2a9   : > { %v1649_v56 = vpop.permute.xlu1 %1648  ;;  %v1718_v58 = vpop.permute.xlu2 %1717 }
 0x2aa   : > { %v1655_v4 = vadd.f32 %v1649_v56, %v4322_v50  ;;  %v1647_v54 = vpop.permute.xlu0 %1646  ;;  %v4404_v57 = vadd.f32 %v1718_v58, %v1629_v61 }
 0x2ab   : > { %v1654_v5 = vadd.f32 %v1647_v54, %v4345_v15  ;;  %v2058_v15 = vstv %s4406_s17 }
 0x2ac   : > { %v2059_v9 = vmul.f32 %v4293_v62, %v2058_v15  ;;  %v2060_v32 = vmul.f32 %v4283_v20, %v2058_v15 }
 0x2af   : > { %2045 = vrot.lane.b32.xlu1 %v2042_v26, %s2876_s30  ;;  %2022 = vrot.lane.b32.xlu2 %v2019_v14, %s2876_s30 }
 0x2b0   : > { %2024 = vrot.lane.b32.xlu0 %v2018_v40, %s2876_s30 }
 0x2b1   : > { %v1674_v50 = vpop.permute.xlu1 %1673  ;;  %v1739_v39 = vpop.permute.xlu2 %1738 }
 0x2b2   : > { %v4416_v33 = vadd.f32 %v1674_v50, %v4334_v51  ;;  %v1672_v28 = vpop.permute.xlu0 %1671  ;;  %v4418_v42 = vadd.f32 %v1739_v39, %v1654_v5 }
 0x2b3   : > { %v1679_v6 = vadd.f32 %v1672_v28, %v4359_v19 }
 0x2b7   : > { %2063 = vrot.lane.b32.xlu1 %v2059_v9, %s2877_s5  ;;  %2047 = vrot.lane.b32.xlu2 %v2044_v8, %s2876_s30 }
 0x2b8   : > { %2049 = vrot.lane.b32.xlu0 %v2043_v43, %s2876_s30  ;;  %s2648_s30 = sld [smem:[#allocation4 + $0x4b]] }
 0x2b9   : > { %v1716_v51 = vpop.permute.xlu1 %1715  ;;  %v1764_v41 = vpop.permute.xlu2 %1763 }
 0x2ba   : > { %v4428_v48 = vadd.f32 %v1716_v51, %v4347_v13  ;;  %v1697_v36 = vpop.permute.xlu0 %1696  ;;  %v4430_v53 = vadd.f32 %v1764_v41, %v1679_v6  ;;  %v2295_v6 = vstv %s2656_s25 }
 0x2bb   : > { %v1701_v19 = vadd.f32 %v1697_v36, %v4375_v11  ;;  %v2092_v11 = vstv %s2647_s24  ;;  %v2297_v8 = vmul.f32 %v4283_v20, %v2295_v6  ;;  %v2298_v51 = vmul.f32 %v4309_v63, %v2295_v6 }
 0x2bc   : > { %v2094_v55 = vmul.f32 %v4283_v20, %v2092_v11  ;;  %v2093_v16 = vmul.f32 %v4293_v62, %v2092_v11  ;;  %v2095_v17 = vmul.f32 %v4309_v63, %v2092_v11  ;;  %v2296_v41 = vmul.f32 %v4293_v62, %v2295_v6 }
 0x2be   : > { %v2112_v3 = vstv %s2648_s30  ;;  %s2445_s30 = scalar_lea.sflag [#allocation6], %s2997_s4 }
 0x2bf   : > { %2081 = vrot.lane.b32.xlu1 %v2074_v23, %s2877_s5  ;;  %2065 = vrot.lane.b32.xlu2 %v2060_v32, %s2877_s5  ;;  %v2114_v34 = vmul.f32 %v4283_v20, %v2112_v3  ;;  %v2113_v46 = vmul.f32 %v4293_v62, %v2112_v3  ;;  %v2115_v54 = vmul.f32 %v4309_v63, %v2112_v3  ;;  %v2303_v32 = vrot.slane %v2297_v8, 1 }
 0x2c0   : > { %2079 = vrot.lane.b32.xlu0 %v2073_v25, %s2877_s5  ;;  %v2305_v25 = vrot.slane %v2298_v51, 1  ;;  %v2270_v51 = vstv %s2655_s7 }
 0x2c1   : > { %v1737_v13 = vpop.permute.xlu1 %1736  ;;  %v1789_v52 = vpop.permute.xlu2 %1788 }
 0x2c2   : > { %v4440_v29 = vadd.f32 %v1737_v13, %v4361_v18  ;;  %v1720_v37 = vpop.permute.xlu0 %1719  ;;  %v4442_v31 = vadd.f32 %v1789_v52, %v1701_v19  ;;  %v2302_v52 = vrot.slane %v2296_v41, 1  ;;  %v2306_v11 = vsel %vm352_vm3, %v2303_v32, %v2305_v25 }
 0x2c3   : > { %v1726_v45 = vadd.f32 %v1720_v37, %v4390_v27  ;;  %v2203_v27 = vstv %s2652_s14  ;;  %v2178_v37 = vstv %s2651_s26  ;;  %v2272_v41 = vmul.f32 %v4283_v20, %v2270_v51 }
 0x2c4   : > { %v2204_v61 = vmul.f32 %v4293_v62, %v2203_v27  ;;  %v2205_v47 = vmul.f32 %v4283_v20, %v2203_v27 }
 0x2c6   : > { %v2208_v56 = vrot.slane %v2204_v61, 5  ;;  %v2209_v58 = vrot.slane %v2205_v47, 5 }
 0x2c7   : > { %2101 = vrot.lane.b32.xlu1 %v2094_v55, %s2877_s5  ;;  %2083 = vrot.lane.b32.xlu2 %v2075_v0, %s2877_s5  ;;  %v2181_v55 = vmul.f32 %v4309_v63, %v2178_v37  ;;  %v2179_v0 = vmul.f32 %v4293_v62, %v2178_v37 }
 0x2c8   : > { %2099 = vrot.lane.b32.xlu0 %v2093_v16, %s2877_s5  ;;  %v2210_v49 = vsel %vm328_vm5, %v2208_v56, %v2209_v58 }
 0x2c9   : > { %v1762_v18 = vpop.permute.xlu1 %1761  ;;  %v1812_v7 = vpop.permute.xlu2 %1811 }
 0x2ca   : > { %v4452_v12 = vadd.f32 %v1762_v18, %v4377_v60  ;;  %v1741_v38 = vpop.permute.xlu0 %1740  ;;  %v4454_v59 = vadd.f32 %v1812_v7, %v1726_v45  ;;  %v2180_v45 = vmul.f32 %v4283_v20, %v2178_v37 }
 0x2cb   : > { %v1747_v22 = vadd.f32 %v1741_v38, %v1655_v4  ;;  %v2153_v4 = vstv %s2650_s29 }
 0x2cc   : > { %v2155_v40 = vmul.f32 %v4283_v20, %v2153_v4  ;;  %v2156_v5 = vmul.f32 %v4309_v63, %v2153_v4  ;;  %v2186_v3 = vrot.slane %v2180_v45, 4 }
 0x2ce   : > { %v2163_v28 = vrot.slane %v2156_v5, 4 }
 0x2cf   : > { %2121 = vrot.lane.b32.xlu1 %v2114_v34, %s2877_s5  ;;  %2103 = vrot.lane.b32.xlu2 %v2095_v17, %s2877_s5  ;;  %v2185_v34 = vrot.slane %v2179_v0, 4  ;;  %v2245_v17 = vstv %s2654_s27  ;;  %s2816_s27 = scalar_lea.hbm %s4644_s2, 32 }
 0x2d0   : > { %2119 = vrot.lane.b32.xlu0 %v2113_v46, %s2877_s5  ;;  %v2247_v61 = vmul.f32 %v4283_v20, %v2245_v17  ;;  %v2248_v47 = vmul.f32 %v4309_v63, %v2245_v17 }
 0x2d1   : > { %v1787_v60 = vpop.permute.xlu1 %1786  ;;  %v1837_v30 = vpop.permute.xlu2 %1836 }
 0x2d2   : > { %v4465_v44 = vadd.f32 %v1787_v60, %v4392_v10  ;;  %v1766_v2 = vpop.permute.xlu0 %1765  ;;  %v4467_v24 = vadd.f32 %v1837_v30, %v1747_v22  ;;  %v2154_v10 = vmul.f32 %v4293_v62, %v2153_v4  ;;  %v2188_v22 = vrot.slane %v2181_v55, 4 }
 0x2d3   : > { %v1772_v21 = vadd.f32 %v1766_v2, %v4416_v33  ;;  %v2161_v33 = vrot.slane %v2155_v40, 4  ;;  %v2246_v60 = vmul.f32 %v4293_v62, %v2245_v17  ;;  %v2255_v4 = vrot.slane %v2248_v47, 1 }
 0x2d4   : > { %v2160_v43 = vrot.slane %v2154_v10, 4  ;;  %v2189_v46 = vsel %vm274_vm9, %v2186_v3, %v2188_v22  ;;  %v2132_v40 = vstv %s2649_s6  ;;  %v2341_v55 = vstv %s2658_s8 }
 0x2d5   : > { %v2164_v9 = vsel %vm274_vm9, %v2161_v33, %v2163_v28  ;;  %v2134_v10 = vmul.f32 %v4283_v20, %v2132_v40  ;;  %v2343_v0 = vmul.f32 %v4283_v20, %v2341_v55 }
 0x2d7   : > { %2213 = vrot.lane.b32.xlu1 %v2210_v49, %s2878_s3  ;;  %2123 = vrot.lane.b32.xlu2 %v2115_v54, %s2877_s5  ;;  %v2252_v49 = vrot.slane %v2246_v60, 1  ;;  %v2349_v17 = vrot.slane %v2343_v0, 5 }
 0x2d8   : > { %2211 = vrot.lane.b32.xlu0 %v2208_v56, %s2878_s3 }
 0x2d9   : > { %v1810_v26 = vpop.permute.xlu1 %1809  ;;  %v1862_v14 = vpop.permute.xlu2 %1861 }
 0x2da   : > { %v4479_v35 = vadd.f32 %v1810_v26, %v4404_v57  ;;  %v1808_v50 = vpop.permute.xlu0 %1807  ;;  %v4481_v39 = vadd.f32 %v1862_v14, %v1772_v21  ;;  %v2162_v57 = vsel %vm274_vm9, %v2160_v43, %v2161_v33  ;;  %v2253_v21 = vrot.slane %v2247_v61, 1 }
 0x2db   : > { %v1816_v15 = vadd.f32 %v1808_v50, %v4428_v48  ;;  %v2135_v26 = vmul.f32 %v4309_v63, %v2132_v40  ;;  %v2133_v14 = vmul.f32 %v4293_v62, %v2132_v40  ;;  %v2140_v43 = vrot.slane %v2134_v10, 4 }
 0x2dc   : > { %v2256_v5 = vsel %vm352_vm3, %v2253_v21, %v2255_v4 }
 0x2dd   : > { %v2142_v6 = vrot.slane %v2135_v26, 4  ;;  %v2139_v8 = vrot.slane %v2133_v14, 4 }
 0x2df   : > { %2167 = vrot.lane.b32.xlu1 %v2164_v9, %s2877_s5  ;;  %2215 = vrot.lane.b32.xlu2 %v2209_v58, %s2878_s3 }
 0x2e0   : > { %2165 = vrot.lane.b32.xlu0 %v2162_v57, %s2877_s5  ;;  %v2143_v57 = vsel %vm274_vm9, %v2140_v43, %v2142_v6 }
 0x2e1   : > { %v1835_v48 = vpop.permute.xlu1 %1834  ;;  %v1900_v36 = vpop.permute.xlu2 %1899 }
 0x2e2   : > { %v4493_v1 = vadd.f32 %v1835_v48, %v4418_v42  ;;  %v1833_v19 = vpop.permute.xlu0 %1832  ;;  %v4495_v23 = vadd.f32 %v1900_v36, %v1816_v15  ;;  %v2304_v42 = vsel %vm352_vm3, %v2302_v52, %v2303_v32  ;;  %v2271_v48 = vmul.f32 %v4293_v62, %v2270_v51 }
 0x2e3   : > { %v1841_v13 = vadd.f32 %v1833_v19, %v4440_v29  ;;  %v2273_v36 = vmul.f32 %v4309_v63, %v2270_v51  ;;  %v2278_v52 = vrot.slane %v2272_v41, 1 }
 0x2e4   : > { %v2277_v37 = vrot.slane %v2271_v48, 1 }
 0x2e5   : > { %v2280_v45 = vrot.slane %v2273_v36, 1 }
 0x2e7   : > { %2309 = vrot.lane.b32.xlu1 %v2306_v11, %s2878_s3  ;;  %2169 = vrot.lane.b32.xlu2 %v2163_v28, %s2877_s5 }
 0x2e8   : > { %2307 = vrot.lane.b32.xlu0 %v2304_v42, %s2878_s3  ;;  %v2279_v42 = vsel %vm352_vm3, %v2277_v37, %v2278_v52 }
 0x2e9   : > { %v1860_v29 = vpop.permute.xlu1 %1859  ;;  %v1925_v16 = vpop.permute.xlu2 %1924 }
 0x2ea   : > { %v4507_v18 = vadd.f32 %v1860_v29, %v4430_v53  ;;  %v1858_v7 = vpop.permute.xlu0 %1857  ;;  %v4509_v38 = vadd.f32 %v1925_v16, %v1841_v13  ;;  %v2187_v53 = vsel %vm274_vm9, %v2185_v34, %v2186_v3  ;;  %v2342_v29 = vmul.f32 %v4293_v62, %v2341_v55 }
 0x2eb   : > { %v1866_v27 = vadd.f32 %v1858_v7, %v4452_v12  ;;  %v2344_v16 = vmul.f32 %v4309_v63, %v2341_v55  ;;  %v2320_v3 = vstv %s2657_s20 }
 0x2ec   : > { %v2321_v60 = vmul.f32 %v4293_v62, %v2320_v3 }
 0x2ed   : > { %v2351_v47 = vrot.slane %v2344_v16, 5 }
 0x2ef   : > { %2192 = vrot.lane.b32.xlu1 %v2189_v46, %s2877_s5  ;;  %2311 = vrot.lane.b32.xlu2 %v2305_v25, %s2878_s3  ;;  %v2348_v46 = vrot.slane %v2342_v29, 5 }
 0x2f0   : > { %2190 = vrot.lane.b32.xlu0 %v2187_v53, %s2877_s5  ;;  %v2224_v53 = vstv %s2653_s23 }
 0x2f1   : > { %v1885_v12 = vpop.permute.xlu1 %1884  ;;  %v1950_v30 = vpop.permute.xlu2 %1949 }
 0x2f2   : > { %v4521_v2 = vadd.f32 %v1885_v12, %v4442_v31  ;;  %v1883_v56 = vpop.permute.xlu0 %1882  ;;  %v4523_v58 = vadd.f32 %v1950_v30, %v1866_v27  ;;  %v2254_v31 = vsel %vm352_vm3, %v2252_v49, %v2253_v21  ;;  %v2322_v12 = vmul.f32 %v4283_v20, %v2320_v3 }
 0x2f3   : > { %v1888_v54 = vadd.f32 %v1883_v56, %v4465_v44  ;;  %v2350_v30 = vsel %vm328_vm5, %v2348_v46, %v2349_v17  ;;  %v2226_v56 = vmul.f32 %v4283_v20, %v2224_v53  ;;  %v2225_v21 = vmul.f32 %v4293_v62, %v2224_v53 }
 0x2f4   : > { %v2327_v49 = vrot.slane %v2321_v60, 5  ;;  %v2328_v40 = vrot.slane %v2322_v12, 5 }
 0x2f5   : > { %v2232_v26 = vrot.slane %v2226_v56, 1  ;;  %v2231_v62 = vrot.slane %v2225_v21, 1 }
 0x2f7   : > { %2259 = vrot.lane.b32.xlu1 %v2256_v5, %s2878_s3  ;;  %2194 = vrot.lane.b32.xlu2 %v2188_v22, %s2877_s5 }
 0x2f8   : > { %2257 = vrot.lane.b32.xlu0 %v2254_v31, %s2878_s3 }
 0x2f9   : > { %v1904_v44 = vpop.permute.xlu1 %1903  ;;  %v1975_v50 = vpop.permute.xlu2 %1974 }
 0x2fa   : > { %v4535_v33 = vadd.f32 %v1904_v44, %v4454_v59  ;;  %v1902_v28 = vpop.permute.xlu0 %1901  ;;  %v4537_v15 = vadd.f32 %v1975_v50, %v1888_v54  ;;  %v2141_v59 = vsel %vm274_vm9, %v2139_v8, %v2140_v43  ;;  %v2329_v44 = vsel %vm328_vm5, %v2327_v49, %v2328_v40 }
 0x2fb   : > { %v1909_v9 = vadd.f32 %v1902_v28, %v4479_v35  ;;  %v2233_v50 = vsel %vm352_vm3, %v2231_v62, %v2232_v26  ;;  %v2323_v28 = vmul.f32 %v4309_v63, %v2320_v3 }
 0x2fd   : > { %v2330_v51 = vrot.slane %v2323_v28, 5 }
 0x2ff   : > { %2146 = vrot.lane.b32.xlu1 %v2143_v57, %s2877_s5  ;;  %2261 = vrot.lane.b32.xlu2 %v2255_v4, %s2878_s3 }
 0x300   : > { %2144 = vrot.lane.b32.xlu0 %v2141_v59, %s2877_s5  ;;  %s2555_s5 = sshll.u32 %s2997_s4, 4 }
 0x301   : > { %v1929_v35 = vpop.permute.xlu1 %1928  ;;  %v1998_v19 = vpop.permute.xlu2 %1997 }
 0x302   : > { %v4549_v32 = vadd.f32 %v1929_v35, %v4467_v24  ;;  %v1927_v25 = vpop.permute.xlu0 %1926  ;;  %v4551_v13 = vadd.f32 %v1998_v19, %v1909_v9  ;;  %v2281_v24 = vsel %vm352_vm3, %v2278_v52, %v2280_v45 }
 0x303   : > { %v1934_v11 = vadd.f32 %v1927_v25, %v4493_v1 }
 0x307   : > { %2286 = vrot.lane.b32.xlu1 %v2280_v45, %s2878_s3  ;;  %2282 = vrot.lane.b32.xlu2 %v2279_v42, %s2878_s3 }
 0x308   : > { %2284 = vrot.lane.b32.xlu0 %v2281_v24, %s2878_s3 }
 0x309   : > { %v1954_v1 = vpop.permute.xlu1 %1953  ;;  %v2023_v7 = vpop.permute.xlu2 %2022 }
 0x30a   : > { %v1960_v22 = vadd.f32 %v1954_v1, %v4481_v39  ;;  %v1952_v27 = vpop.permute.xlu0 %1951  ;;  %v2030_v34 = vadd.f32 %v2023_v7, %v1934_v11  ;;  %v2352_v39 = vsel %vm328_vm5, %v2349_v17, %v2351_v47 }
 0x30b   : > { %v1959_v61 = vadd.f32 %v1952_v27, %v4507_v18  ;;  %v2227_v18 = vmul.f32 %v4309_v63, %v2224_v53  ;;  %v2331_v63 = vsel %vm328_vm5, %v2328_v40, %v2330_v51 }
 0x30d   : > { %v2234_v14 = vrot.slane %v2227_v18, 1 }
 0x30f   : > { %2357 = vrot.lane.b32.xlu1 %v2351_v47, %s2878_s3  ;;  %2353 = vrot.lane.b32.xlu2 %v2350_v30, %s2878_s3  ;;  %v2235_v43 = vsel %vm352_vm3, %v2232_v26, %v2234_v14 }
 0x310   : > { %2355 = vrot.lane.b32.xlu0 %v2352_v39, %s2878_s3 }
 0x311   : > { %v1996_v4 = vpop.permute.xlu1 %1995  ;;  %v2048_v54 = vpop.permute.xlu2 %2047 }
 0x312   : > { %v2004_v5 = vadd.f32 %v1996_v4, %v4495_v23  ;;  %v1977_v10 = vpop.permute.xlu0 %1976  ;;  %v2055_v20 = vadd.f32 %v2048_v54, %v1959_v61 }
 0x313   : > { %v1981_v31 = vadd.f32 %v1977_v10, %v4521_v2 }
 0x317   : > { %2332 = vrot.lane.b32.xlu1 %v2329_v44, %s2878_s3  ;;  %2236 = vrot.lane.b32.xlu2 %v2233_v50, %s2878_s3 }
 0x318   : > { %2238 = vrot.lane.b32.xlu0 %v2235_v43, %s2878_s3 }
 0x319   : > { %v2021_v23 = vpop.permute.xlu1 %2020  ;;  %v2066_v6 = vpop.permute.xlu2 %2065 }
 0x31a   : > { %v2029_v9 = vadd.f32 %v2021_v23, %v4509_v38  ;;  %v2000_v2 = vpop.permute.xlu0 %1999  ;;  %v4584_v8 = vadd.f32 %v2066_v6, %v1981_v31 }
 0x31b   : > { %v2006_v57 = vadd.f32 %v2000_v2, %v4535_v33 }
 0x31f   : > { %2334 = vrot.lane.b32.xlu2 %v2331_v63, %s2878_s3  ;;  %s2667_s3 = sshll.u32 %s2917_s13, 4  ;;  %s177_s13 = scalar_lea.vmem [#allocation9], %s2555_s5 }
 0x320   : > { %s2456_s17 = scalar_lea.hbm %s4644_s2, %s2667_s3  ;;  %s2457_s19 = sshll.u32 %s177_s13, 4  ;;  %s2458_s19 = int_to_ptr.vmem [resolvable:$true] %s2457_s19 }
 0x321   : > { %v2046_v41 = vpop.permute.xlu1 %2045  ;;  %v2084_v48 = vpop.permute.xlu2 %2083  ;;  %s2459_s24 = sshll.u32 %s2456_s17, 4  ;;  %s2460_s24 = int_to_ptr.hbm [resolvable:$true] %s2459_s24 }
 0x322   : > { %v2054_v59 = vadd.f32 %v2046_v41, %v4523_v58  ;;  %v2025_v36 = vpop.permute.xlu0 %2024  ;;  %v4590_v35 = vadd.f32 %v2084_v48, %v2006_v57  ;;  %s2810_s14 = sshra.s32 %s2460_s24, 4  ;;  %s2811_s14 = int_to_ptr.hbm [resolvable:$true] %s2810_s14 }
 0x323   : > { %v2031_v19 = vadd.f32 %v2025_v36, %v4549_v32  ;;  %s2812_s29 = scalar_lea.hbm %s2811_s14, 16  ;;  %p2817_p0 = scmp.lt.s32.totalorder %s2811_s14, %s4644_s2 }
 0x324   : > { %p2813_p4 = scmp.ne.s32.totalorder %s2811_s14, %s2812_s29  ;;  %p2818_p3 = scmp.lt.s32.totalorder %s2816_s27, %s2812_s29 }
 0x326   : > { %p2814_p6 = pnand %p2813_p4, %p2948_p11  ;;  %p2819_p5 = por %p2818_p3, %p2817_p0 }
 0x328   : > { %p2815_p13 = pneg %p2814_p6 }
 0x329   : > { %v2064_v38 = vpop.permute.xlu1 %2063  ;;  %v2104_v25 = vpop.permute.xlu2 %2103 }
 0x32a   : > { %v4594_v52 = vadd.f32 %v2064_v38, %v4537_v15  ;;  %v2050_v37 = vpop.permute.xlu0 %2049  ;;  %v2110_v33 = vadd.f32 %v2104_v25, %v2031_v19  ;;  %p2820_p8 = pnand %p2819_p5, %p2815_p13 }
 0x32b   : > { %v2056_v11 = vadd.f32 %v2050_v37, %v1960_v22 }
 0x331   : > { %v2082_v45 = vpop.permute.xlu1 %2081  ;;  %v2124_v55 = vpop.permute.xlu2 %2123 }
 0x332   : > { %v2089_v42 = vadd.f32 %v2082_v45, %v4551_v13  ;;  %v2080_v0 = vpop.permute.xlu0 %2079  ;;  %v2130_v53 = vadd.f32 %v2124_v55, %v2056_v11 }
 0x333   : > { %v2088_v29 = vadd.f32 %v2080_v0, %v2004_v5 }
 0x339   : > { %v2102_v58 = vpop.permute.xlu1 %2101  ;;  %v2216_v24 = vpop.permute.xlu2 %2215 }
 0x33a   : > { %v2109_v16 = vadd.f32 %v2102_v58, %v2030_v34  ;;  %v2100_v1 = vpop.permute.xlu0 %2099  ;;  %v2222_v60 = vadd.f32 %v2216_v24, %v2130_v53 }
 0x33b   : > { %v2108_v7 = vadd.f32 %v2100_v1, %v2029_v9 }
 0x341   : > { %v2122_v32 = vpop.permute.xlu1 %2121  ;;  %v2170_v3 = vpop.permute.xlu2 %2169 }
 0x342   : > { %v2120_v27 = vpop.permute.xlu0 %2119  ;;  %v2129_v12 = vadd.f32 %v2122_v32, %v2055_v20  ;;  %v2176_v25 = vadd.f32 %v2170_v3, %v4590_v35 }
 0x343   : > { %v2128_v13 = vadd.f32 %v2120_v27, %v2054_v59 }
 0x349   : > { %v2214_v17 = vpop.permute.xlu1 %2213  ;;  %v2312_v15 = vpop.permute.xlu2 %2311 }
 0x34a   : > { %v2212_v46 = vpop.permute.xlu0 %2211  ;;  %v2221_v30 = vadd.f32 %v2214_v17, %v2129_v12  ;;  %v2318_v56 = vadd.f32 %v2312_v15, %v2222_v60 }
 0x34b   : > { %v2220_v21 = vadd.f32 %v2212_v46, %v2128_v13 }
 0x34c   : > { %v2383_v49 = vrot.slane %v2318_v56, 1 }
 0x351   : > { %v2168_v61 = vpop.permute.xlu1 %2167  ;;  %v2195_v47 = vpop.permute.xlu2 %2194 }
 0x352   : > { %v2166_v22 = vpop.permute.xlu0 %2165  ;;  %v2201_v9 = vadd.f32 %v2195_v47, %v2110_v33  ;;  %v2175_v37 = vadd.f32 %v2168_v61, %v2089_v42 }
 0x353   : > { %v2174_v48 = vadd.f32 %v2166_v22, %v2088_v29 }
 0x359   : > { %v2310_v39 = vpop.permute.xlu1 %2309  ;;  %v2262_v4 = vpop.permute.xlu2 %2261 }
 0x35a   : > { %v2317_v34 = vadd.f32 %v2310_v39, %v2221_v30  ;;  %v2308_v18 = vpop.permute.xlu0 %2307  ;;  %v2268_v55 = vadd.f32 %v2262_v4, %v2176_v25 }
 0x35b   : > { %v2316_v54 = vadd.f32 %v2308_v18, %v2220_v21 }
 0x35c   : > { %v2381_v40 = vrot.slane %v2317_v34, 1 }
 0x35d   : > { %v2380_v5 = vrot.slane %v2316_v54, 1 }
 0x35e   : > { %v2384_v10 = vsel %vm352_vm3, %v2381_v40, %v2383_v49 }
 0x35f   : > { %v2382_v26 = vsel %vm352_vm3, %v2380_v5, %v2381_v40 }
 0x361   : > { %v2193_v62 = vpop.permute.xlu1 %2192  ;;  %v2283_v20 = vpop.permute.xlu2 %2282 }
 0x362   : > { %v2191_v31 = vpop.permute.xlu0 %2190  ;;  %v2200_v51 = vadd.f32 %v2193_v62, %v2109_v16 }
 0x363   : > { %v2199_v14 = vadd.f32 %v2191_v31, %v2108_v7 }
 0x365   : > { %v2291_v44 = vadd.f32 %v2283_v20, %v2199_v14 }
 0x367   : > { %v2388_v50 = vadd.f32 %v2382_v26, %v2291_v44 }
 0x369   : > { %v2260_v28 = vpop.permute.xlu1 %2259  ;;  %v2354_v2 = vpop.permute.xlu2 %2353  ;;  %v2394_v11 = vrot.slane %v2388_v50, 2 }
 0x36a   : > { %v2258_v43 = vpop.permute.xlu0 %2257  ;;  %v2267_v0 = vadd.f32 %v2260_v28, %v2175_v37 }
 0x36b   : > { %v2266_v19 = vadd.f32 %v2258_v43, %v2174_v48 }
 0x36d   : > { %v2362_v58 = vadd.f32 %v2354_v2, %v2266_v19 }
 0x36f   : > { %v2368_v15 = vrot.slane %v2362_v58, 1 }
 0x371   : > { %v2147_v23 = vpop.permute.xlu1 %2146  ;;  %v2237_v16 = vpop.permute.xlu2 %2236 }
 0x372   : > { %v2145_v6 = vpop.permute.xlu0 %2144  ;;  %v2151_v47 = vadd.f32 %v2147_v23, %v4584_v8 }
 0x373   : > { %v2150_v27 = vadd.f32 %v2145_v6, %v4594_v52 }
 0x375   : > { %v2242_v61 = vadd.f32 %v2237_v16, %v2150_v27 }
 0x379   : > { %v2287_v57 = vpop.permute.xlu1 %2286  ;;  %v2335_v13 = vpop.permute.xlu2 %2334 }
 0x37a   : > { %v2293_v63 = vadd.f32 %v2287_v57, %v2201_v9  ;;  %v2285_v41 = vpop.permute.xlu0 %2284 }
 0x37b   : > { %v2292_v59 = vadd.f32 %v2285_v41, %v2200_v51 }
 0x37c   : > { %v2390_v36 = vadd.f32 %v2383_v49, %v2293_v63 }
 0x37d   : > { %v2389_v38 = vadd.f32 %v2384_v10, %v2292_v59 }
 0x37e   : > { %v2397_v1 = vrot.slane %v2390_v36, 2 }
 0x37f   : > { %v2395_v45 = vrot.slane %v2389_v38, 2 }
 0x381   : > { %v2358_v24 = vpop.permute.xlu1 %2357  ;;  %v2396_v33 = vsel %vm542_vm6, %v2394_v11, %v2395_v45  ;;  %v2398_v35 = vsel %vm542_vm6, %v2395_v45, %v2397_v1 }
 0x382   : > { %v2364_v7 = vadd.f32 %v2358_v24, %v2268_v55  ;;  %v2356_v32 = vpop.permute.xlu0 %2355 }
 0x383   : > { %v2363_v29 = vadd.f32 %v2356_v32, %v2267_v0 }
 0x384   : > { %v2371_v17 = vrot.slane %v2364_v7, 1 }
 0x385   : > { %v2369_v46 = vrot.slane %v2363_v29, 1 }
 0x387   : > { %v2370_v42 = vsel %vm352_vm3, %v2368_v15, %v2369_v46  ;;  %v2372_v3 = vsel %vm352_vm3, %v2369_v46, %v2371_v17 }
 0x389   : > { %v2333_v22 = vpop.permute.xlu1 %2332 }
 0x38a   : > { %v2338_v53 = vadd.f32 %v2333_v22, %v2242_v61  ;;  %v2239_v60 = vpop.permute.xlu0 %2238 }
 0x38b   : > { %v2243_v12 = vadd.f32 %v2239_v60, %v2151_v47 }
 0x38c   : > { %v2375_v30 = vadd.f32 %v2370_v42, %v2338_v53 }
 0x38d   : > { %v2339_v56 = vadd.f32 %v2335_v13, %v2243_v12 }
 0x38e   : > { %v2401_v52 = vadd.f32 %v2396_v33, %v2375_v30 }
 0x38f   : > { %v2376_v21 = vadd.f32 %v2372_v3, %v2339_v56 }
 0x390   : > { %v2659_v39 = vmul.f32 -1.442695, %v2401_v52 }
 0x391   : > { %v2402_v34 = vadd.f32 %v2398_v35, %v2376_v21 }
 0x392   : > { %2737 = vpow2.f32 %v2659_v39 }
 0x393   : > { %v2660_v18 = vmul.f32 -1.442695, %v2402_v34 }
 0x395   : > { %2739 = vpow2.f32 %v2660_v18 }
 0x398   : > { %v2738_v4 = vpop.eup %2737 }
 0x399   : > { %v2409_v54 = vadd.f32 1.0, %v2738_v4 }
 0x39b   : > { %v2740_v49 = vpop.eup %2739  ;;  %2741 = vrcp.f32 %v2409_v54  ;;  %v2422_v31 = vand.u32 2147483648, %v2409_v54  ;;  %v2420_v20 = vand.u32 2147483647, %v2409_v54  ;;  %vm2416_vm11 = vweird.f32 %v2409_v54 }
 0x39c   : > { %v2410_v8 = vadd.f32 1.0, %v2740_v49 }
 0x39d   : > { %v2423_v43 = vor.u32 1.1754944e-38, %v2422_v31  ;;  %vm2421_vm15 = vcmp.eq.f32.partialorder %v2420_v20, 8.507059e+37 }
 0x39e   : > { %2743 = vrcp.f32 %v2410_v8  ;;  %v2437_v28 = vand.u32 2147483648, %v2410_v8  ;;  %v2435_v6 = vand.u32 2147483647, %v2410_v8  ;;  %vm2431_vm0 = vweird.f32 %v2410_v8 }
 0x3a0   : > { %v2438_v57 = vor.u32 1.1754944e-38, %v2437_v28  ;;  %vm2436_vm2 = vcmp.eq.f32.partialorder %v2435_v6, 8.507059e+37 }
 0x3a1   : > { %v2742_v40 = vpop.eup %2741 }
 0x3a2   : > { %v2412_v5 = vmul.f32 %v2742_v40, %v2409_v54  ;;  %vm2417_vm10 = vweird.f32 %v2742_v40 }
 0x3a3   : > { %vm2418_vm13 = vmor %vm2416_vm11, %vm2417_vm10 }
 0x3a4   : > { %v2744_v10 = vpop.eup %2743  ;;  %v2413_v26 = vsub.f32 1.0, %v2412_v5 }
 0x3a5   : > { %v2427_v62 = vmul.f32 %v2744_v10, %v2410_v8  ;;  %vm2432_vm14 = vweird.f32 %v2744_v10 }
 0x3a6   : > { %v2414_v14 = vmul.f32 %v2742_v40, %v2413_v26  ;;  %vm2433_vm1 = vmor %vm2431_vm0, %vm2432_vm14 }
 0x3a7   : > { %v2428_v44 = vsub.f32 1.0, %v2427_v62 }
 0x3a8   : > { %v2415_v50 = vadd.f32 %v2742_v40, %v2414_v14 }
 0x3a9   : > { %v2429_v23 = vmul.f32 %v2744_v10, %v2428_v44 }
 0x3aa   : > { %v2419_v9 = vsel %vm2418_vm13, %v2742_v40, %v2415_v50 }
 0x3ab   : > { %v2424_v2 = vsel %vm2421_vm15, %v2423_v43, %v2419_v9  ;;  %v2430_v51 = vadd.f32 %v2744_v10, %v2429_v23 }
 0x3ac   : > { %2442 = vst.msk [vmem:[%s177_s13] sm:$0xff] %vm2441_vm12, %v2424_v2 }
 0x3ad   : > { %v2434_v63 = vsel %vm2433_vm1, %v2744_v10, %v2430_v51 }
 0x3ae   : > { %v2439_v41 = vsel %vm2436_vm2, %v2438_v57, %v2434_v63 }
 0x3af   : > { %2443 = vst.msk [vmem:[%s177_s13 + $0x8] sm:$0xff] %vm2441_vm12, %v2439_v41 }
 0x3b0   : > { %2823 = shalt.err (!%p2820_p8)
}
 0x3b1   : > { %s2879_s4 = smov 128   ;;  %s2880_s8 = smov 8  }
 0x3b2   : > { %2674 = dma.vmem_to_hbm [thread:$0]  (%p2948_p11), %s2458_s19, 256, %s2460_s24, %s2445_s30, %s2879_s4, %s2879_s4, %s2880_s8  }
 0x3b3 PF: > { %s2474_s20 = sand.u32 1, %s2854_s9   ;;  %p4775_p9 = scmp.ge.s32.totalorder %s2866_s12, 2 }
 0x3b4   : > { %s2475_s23 = scalar_lea.sflag [#allocation6], %s2474_s20 }
 0x3b5   : > { %p2685_p10 = pnand %p4775_p9, %p2952_p12 }
 0x3b7   : > { %p2686_p1 = pneg %p2685_p10 }
 0x3b9   : > { %2849 = dma.done.wait (%p2686_p1), %s2475_s23, 256  }
 0x3ba   : > { %2851 = vsyncadd (%p2686_p1), %s2475_s23, 4294967040  ;;  %p16_p2 = scmp.ge.s32.totalorder %s2921_s15, 4   ;;  %s4776_s9 = smov %s2858_s10 }
 0x3bb   : > { %s4777_s10 = smov %s2862_s11  ;;  %s4778_s11 = smov %s2933_s18 }
 0x3bc   : > { %s4779_s12 = smov %s2921_s15  ;;  %18 = sbr.rel (!%p16_p2) target bundleno = 6 (0x6), region = 81 }
 0x3c1   :  { %2481 = vsyncpa [#allocation5], 1 }
 0x3c2   :  { %2483 = vsyncpa [#allocation5 + $0x1], 1 }
 0x3c3   :  { %2484 = vsyncpa [#allocation6], 1 }
 0x3c4   :  { %2486 = vsyncpa [#allocation6 + $0x1], 1 }
 0x3c5   :  { %2487 = vsyncpa [#allocation7], 1 }
 0x3c6   :  { %2489 = vsyncpa [#allocation7 + $0x1], 1 }

</bundles_post_ra>
